<compile_context>
chip_gen: v5e
topology: v5e:2x2
jax: 0.10.0
libtpu: 0.0.40
codegen_flags: <defaults>
</compile_context>

<pallas_src>
import functools

import jax
import jax.numpy as jnp
from jax.experimental import pallas as pl
from jax.experimental.pallas import tpu as pltpu

_EPS = 1e-5
_VMEM_LIMIT = 32 * 1024 * 1024  # conservative for v7x (64 MiB physical), fine on v5e/v6e


# ----------------------- fused conv + IN + act (+res) kernel -----------------------

def _fused_conv_in_act(patches, weight, bias, *, norm, act, residual=None, eps=_EPS):
    """patches: (N, K, HW); weight: (Cout, K); bias: (Cout,)
       -> (N, Cout, HW) f32 = act(IN(weight @ patches + bias)) [+ residual]."""
    N, K, HW = patches.shape
    Cout = weight.shape[0]
    p_bf = patches.astype(jnp.bfloat16)
    w_bf = weight.astype(jnp.bfloat16)
    b2 = bias.reshape(Cout, 1).astype(jnp.float32)
    has_res = residual is not None

    def kernel(p_ref, w_ref, b_ref, *rest):
        o_ref = rest[-1]
        acc = jnp.dot(w_ref[...], p_ref[0, :, :],
                      preferred_element_type=jnp.float32)            # (Cout, HW)
        acc = acc + b_ref[...]
        if norm:
            mean = jnp.mean(acc, axis=-1, keepdims=True)
            cen = acc - mean
            var = jnp.mean(cen * cen, axis=-1, keepdims=True)        # biased, like PyTorch IN
            acc = cen * jax.lax.rsqrt(var + eps)
        if act == "relu":
            acc = jnp.maximum(acc, 0.0)
        elif act == "tanh":
            acc = jnp.tanh(acc)
        if has_res:
            acc = acc + rest[0][0, :, :]
        o_ref[0, :, :] = acc

    in_specs = [pl.BlockSpec((1, K, HW), lambda n: (n, 0, 0)),
                pl.BlockSpec((Cout, K), lambda n: (0, 0)),
                pl.BlockSpec((Cout, 1), lambda n: (0, 0))]
    args = [p_bf, w_bf, b2]
    if has_res:
        in_specs.append(pl.BlockSpec((1, Cout, HW), lambda n: (n, 0, 0)))
        args.append(residual.astype(jnp.float32))

    flops = int(2.0 * N * Cout * K * HW)
    transc = int(N * Cout * HW) if act == "tanh" else 0
    bytes_accessed = int(p_bf.size * 2 + w_bf.size * 2 + b2.size * 4
                         + (residual.size * 4 if has_res else 0) + N * Cout * HW * 4)

    return pl.pallas_call(
        kernel,
        out_shape=jax.ShapeDtypeStruct((N, Cout, HW), jnp.float32),
        grid=(N,),
        in_specs=in_specs,
        out_specs=pl.BlockSpec((1, Cout, HW), lambda n: (n, 0, 0)),
        compiler_params=pltpu.CompilerParams(
            dimension_semantics=("parallel",),
            vmem_limit_bytes=_VMEM_LIMIT),
        cost_estimate=pl.CostEstimate(flops=flops, transcendentals=transc,
                                      bytes_accessed=bytes_accessed),
    )(*args)


# --------------------------------- conv wrappers -----------------------------------

def _im2col_cmajor(x, kh, kw, stride):
    """x: (N, C, Hp, Wp) already padded -> (N, C*kh*kw, Ho*Wo), K ordered (ci, kh, kw)."""
    N, C, H, W = x.shape
    Ho = (H - kh) // stride + 1
    Wo = (W - kw) // stride + 1
    cols = []
    for i in range(kh):
        for j in range(kw):
            cols.append(x[:, :, i:i + stride * Ho:stride, j:j + stride * Wo:stride])
    p = jnp.stack(cols, axis=2)                     # (N, C, kh*kw, Ho, Wo)
    return p.reshape(N, C * kh * kw, Ho * Wo), (Ho, Wo)


def conv2d_in_act(x, w_oihw, b, *, stride=1, pad=0, pad_mode="constant",
                  norm=True, act="none", residual=None):
    """Fused Conv2d(+bias) + [InstanceNorm] + activation (+ residual).  NCHW in/out."""
    if pad > 0:
        x = jnp.pad(x, ((0, 0), (0, 0), (pad, pad), (pad, pad)), mode=pad_mode)
    N = x.shape[0]
    Cout, Cin, KH, KW = w_oihw.shape
    patches, (Ho, Wo) = _im2col_cmajor(x, KH, KW, stride)
    wm = w_oihw.reshape(Cout, Cin * KH * KW)
    res_flat = None if residual is None else residual.reshape(N, Cout, Ho * Wo)
    out = _fused_conv_in_act(patches, wm, b, norm=norm, act=act, residual=res_flat)
    return out.reshape(N, Cout, Ho, Wo)


def conv_transpose2d_in_relu(x, w_iohw, b, eps=_EPS):
    """ConvTranspose2d(k=3, s=2, p=1, output_padding=1) + InstanceNorm + ReLU, fused.

    Sub-pixel decomposition: each output-parity class (dy,dx) in {0,1}^2 is a small conv on
    the un-dilated input; the 4 parity GEMMs share one (4*Cin, H*W) patch matrix in VMEM and
    IN statistics are accumulated across all 4 classes (IN is permutation-invariant)."""
    N, Cin, H, W = x.shape
    CinW, Cout, KH, KW = w_iohw.shape
    assert (CinW, KH, KW) == (Cin, 3, 3), "hardcoded for k=3, s=2, p=1, op=1"
    HW = H * W

    # 2x2 neighbourhood taps (zero-pad bottom/right by one)
    xp = jnp.pad(x, ((0, 0), (0, 0), (0, 1), (0, 1)))
    p00 = xp[:, :, :H, :W]
    p01 = xp[:, :, :H, 1:W + 1]
    p10 = xp[:, :, 1:H + 1, :W]
    p11 = xp[:, :, 1:H + 1, 1:W + 1]
    patches = jnp.concatenate([p00, p01, p10, p11], axis=1).reshape(N, 4 * Cin, HW)

    z = jnp.zeros((Cout, Cin), jnp.float32)

    def t(ky, kx):                                   # (Cout, Cin) tap matrix
        return w_iohw[:, :, ky, kx].T.astype(jnp.float32)

    w_par = jnp.stack([
        jnp.concatenate([t(1, 1), z, z, z], axis=1),                      # (even, even)
        jnp.concatenate([t(1, 2), t(1, 0), z, z], axis=1),                # (even, odd )
        jnp.concatenate([t(2, 1), z, t(0, 1), z], axis=1),                # (odd , even)
        jnp.concatenate([t(2, 2), t(2, 0), t(0, 2), t(0, 0)], axis=1),    # (odd , odd )
    ], axis=0)                                                            # (4, Cout, 4*Cin)

    p_bf = patches.astype(jnp.bfloat16)
    w_bf = w_par.astype(jnp.bfloat16)
    b2 = b.reshape(Cout, 1).astype(jnp.float32)

    def kernel(p_ref, w_ref, b_ref, o_ref):
        pv = p_ref[0, :, :]                          # (4*Cin, HW)
        bias = b_ref[...]
        ys = []
        s1 = jnp.zeros((Cout, 1), jnp.float32)
        s2 = jnp.zeros((Cout, 1), jnp.float32)
        for p in range(4):
            y = jnp.dot(w_ref[p, :, :], pv, preferred_element_type=jnp.float32) + bias
            ys.append(y)
            s1 = s1 + jnp.sum(y, axis=-1, keepdims=True)
            s2 = s2 + jnp.sum(y * y, axis=-1, keepdims=True)
        inv_n = 1.0 / (4.0 * HW)
        mean = s1 * inv_n
        var = jnp.maximum(s2 * inv_n - mean * mean, 0.0)
        scale = jax.lax.rsqrt(var + eps)
        for p in range(4):
            o_ref[0, p, :, :] = jnp.maximum((ys[p] - mean) * scale, 0.0)

    out = pl.pallas_call(
        kernel,
        out_shape=jax.ShapeDtypeStruct((N, 4, Cout, HW), jnp.float32),
        grid=(N,),
        in_specs=[pl.BlockSpec((1, 4 * Cin, HW), lambda n: (n, 0, 0)),
                  pl.BlockSpec((4, Cout, 4 * Cin), lambda n: (0, 0, 0)),
                  pl.BlockSpec((Cout, 1), lambda n: (0, 0))],
        out_specs=pl.BlockSpec((1, 4, Cout, HW), lambda n: (n, 0, 0, 0)),
        compiler_params=pltpu.CompilerParams(
            dimension_semantics=("parallel",),
            vmem_limit_bytes=_VMEM_LIMIT),
        cost_estimate=pl.CostEstimate(
            flops=int(2.0 * N * 4 * Cout * 4 * Cin * HW),
            transcendentals=0,
            bytes_accessed=int(p_bf.size * 2 + w_bf.size * 2 + b2.size * 4
                               + N * 4 * Cout * HW * 4)),
    )(p_bf, w_bf, b2)

    # interleave parity classes: out[n, c, 2*iy+dy, 2*ix+dx] = sub[n, dy*2+dx, c, iy*W+ix]
    out = out.reshape(N, 2, 2, Cout, H, W).transpose(0, 3, 4, 1, 5, 2)
    return out.reshape(N, Cout, 2 * H, 2 * W)


# ------------------------ attention branch + bilinear resize ------------------------

def attention_branch(features, w0, b0, w1, b1, eps=_EPS):
    """features: (N, C, HW) -> (N, 1, HW).  One kernel: Conv1x1+IN+ReLU+Conv1x1+Sigmoid."""
    N, C, HW = features.shape
    w0m = w0.reshape(1, C).astype(jnp.float32)
    b0v = b0.reshape(1, 1).astype(jnp.float32)
    w1v = w1.reshape(1, 1).astype(jnp.float32)
    b1v = b1.reshape(1, 1).astype(jnp.float32)

    def kernel(f_ref, w0_ref, b0_ref, w1_ref, b1_ref, o_ref):
        h = jnp.dot(w0_ref[...], f_ref[0, :, :],
                    preferred_element_type=jnp.float32) + b0_ref[...]   # (1, HW)
        mean = jnp.mean(h, axis=-1, keepdims=True)
        cen = h - mean
        var = jnp.mean(cen * cen, axis=-1, keepdims=True)
        h = cen * jax.lax.rsqrt(var + eps)
        h = jnp.maximum(h, 0.0)
        a = h * w1_ref[...] + b1_ref[...]
        o_ref[0, :, :] = jax.nn.sigmoid(a)

    return pl.pallas_call(
        kernel,
        out_shape=jax.ShapeDtypeStruct((N, 1, HW), jnp.float32),
        grid=(N,),
        in_specs=[pl.BlockSpec((1, C, HW), lambda n: (n, 0, 0)),
                  pl.BlockSpec((1, C), lambda n: (0, 0)),
                  pl.BlockSpec((1, 1), lambda n: (0, 0)),
                  pl.BlockSpec((1, 1), lambda n: (0, 0)),
                  pl.BlockSpec((1, 1), lambda n: (0, 0))],
        out_specs=pl.BlockSpec((1, 1, HW), lambda n: (n, 0, 0)),
        compiler_params=pltpu.CompilerParams(dimension_semantics=("parallel",)),
    )(features.astype(jnp.float32), w0m, b0v, w1v, b1v)


def _interp_matrix(out_size, in_size):
    """Row-interpolation matrix for bilinear, align_corners=True."""
    assert in_size >= 2 and out_size >= 2
    idx = jnp.arange(out_size, dtype=jnp.float32) * (in_size - 1) / (out_size - 1)
    i0 = jnp.clip(jnp.floor(idx).astype(jnp.int32), 0, in_size - 2)
    t = idx - i0.astype(jnp.float32)
    Wm = jnp.zeros((out_size, in_size), jnp.float32)
    r = jnp.arange(out_size)
    Wm = Wm.at[r, i0].add(1.0 - t)
    Wm = Wm.at[r, i0 + 1].add(t)
    return Wm


def bilinear_resize_align_corners(a, out_hw):
    """a: (N, Hin, Win) -> (N, Hout, Wout).  One kernel: per image  Wh @ A @ Ww^T."""
    N, Hin, Win = a.shape
    Hout, Wout = out_hw
    Wh = _interp_matrix(Hout, Hin)                  # (Hout, Hin)
    WwT = _interp_matrix(Wout, Win).T               # (Win, Wout)

    def kernel(a_ref, wh_ref, ww_ref, o_ref):
        tmp = jnp.dot(wh_ref[...], a_ref[0, :, :], preferred_element_type=jnp.float32)
        o_ref[0, :, :] = jnp.dot(tmp, ww_ref[...], preferred_element_type=jnp.float32)

    return pl.pallas_call(
        kernel,
        out_shape=jax.ShapeDtypeStruct((N, Hout, Wout), jnp.float32),
        grid=(N,),
        in_specs=[pl.BlockSpec((1, Hin, Win), lambda n: (n, 0, 0)),
                  pl.BlockSpec((Hout, Hin), lambda n: (0, 0)),
                  pl.BlockSpec((Win, Wout), lambda n: (0, 0))],
        out_specs=pl.BlockSpec((1, Hout, Wout), lambda n: (n, 0, 0)),
        compiler_params=pltpu.CompilerParams(dimension_semantics=("parallel",)),
    )(a.astype(jnp.float32), Wh, WwT)


# ----------------------------------- parameters -------------------------------------

def init_params(key, input_nc=1, output_nc=1, ngf=8, n_blocks=2):
    params = {}
    keys = iter(jax.random.split(key, 64))

    def w(shape):
        return jax.random.normal(next(keys), shape, jnp.float32) * 0.1

    def b(n):
        return jax.random.normal(next(keys), (n,), jnp.float32) * 0.01

    # encoder
    params["enc0_w"], params["enc0_b"] = w((ngf, input_nc, 7, 7)), b(ngf)
    params["enc1_w"], params["enc1_b"] = w((ngf * 2, ngf, 3, 3)), b(ngf * 2)
    params["enc2_w"], params["enc2_b"] = w((ngf * 4, ngf * 2, 3, 3)), b(ngf * 4)
    # residual blocks
    dim = ngf * 4
    for i in range(n_blocks):
        params[f"res{i}_w1"], params[f"res{i}_b1"] = w((dim, dim, 3, 3)), b(dim)
        params[f"res{i}_w2"], params[f"res{i}_b2"] = w((dim, dim, 3, 3)), b(dim)
    # attention module (in_channels = ngf*4, see NOTE at top of file)
    params["att0_w"], params["att0_b"] = w((1, dim, 1, 1)), b(1)
    params["att1_w"], params["att1_b"] = w((1, 1, 1, 1)), b(1)
    # decoder (ConvTranspose weights in PyTorch (Cin, Cout, KH, KW) layout)
    params["dec0_w"], params["dec0_b"] = w((ngf * 4, ngf * 2, 3, 3)), b(ngf * 2)
    params["dec1_w"], params["dec1_b"] = w((ngf * 2, ngf, 3, 3)), b(ngf)
    params["dec2_w"], params["dec2_b"] = w((output_nc, ngf, 7, 7)), b(output_nc)
    return params


# ------------------------------------- forward --------------------------------------

def attention_generator_forward(params, x_nchw, n_blocks=2):
    x = x_nchw.astype(jnp.float32)                   # NCHW (channel-major) throughout

    # encoder: ReflectionPad(3)+Conv7x7+IN+ReLU, then 2x (Conv3x3 s2 p1 + IN + ReLU)
    h = conv2d_in_act(x, params["enc0_w"], params["enc0_b"], stride=1, pad=3,
                      pad_mode="reflect", norm=True, act="relu")
    h = conv2d_in_act(h, params["enc1_w"], params["enc1_b"], stride=2, pad=1,
                      norm=True, act="relu")
    h = conv2d_in_act(h, params["enc2_w"], params["enc2_b"], stride=2, pad=1,
                      norm=True, act="relu")

    # residual blocks: x + IN(Conv(ReLU(IN(Conv(reflect_pad(x))))))  (2 fused kernels each)
    for i in range(n_blocks):
        r = conv2d_in_act(h, params[f"res{i}_w1"], params[f"res{i}_b1"], stride=1, pad=1,
                          pad_mode="reflect", norm=True, act="relu")
        h = conv2d_in_act(r, params[f"res{i}_w2"], params[f"res{i}_b2"], stride=1, pad=1,
                          pad_mode="reflect", norm=True, act="none", residual=h)
    features = h                                     # (N, ngf*4, H/4, W/4)

    # attention branch: one fused kernel (Conv1x1 + IN + ReLU + Conv1x1 + Sigmoid)
    Nf, Cf, Hf, Wf = features.shape
    att = attention_branch(features.reshape(Nf, Cf, Hf * Wf),
                           params["att0_w"], params["att0_b"],
                           params["att1_w"], params["att1_b"])
    att = att.reshape(Nf, 1, Hf, Wf)

    # decoder: 2x fused (ConvTranspose3x3 s2 + IN + ReLU), then ReflectionPad(3)+Conv7x7+Tanh
    d = conv_transpose2d_in_relu(features, params["dec0_w"], params["dec0_b"])
    d = conv_transpose2d_in_relu(d, params["dec1_w"], params["dec1_b"])
    d = conv2d_in_act(d, params["dec2_w"], params["dec2_b"], stride=1, pad=3,
                      pad_mode="reflect", norm=False, act="tanh")

    output = d                                       # already NCHW
    att_resized = bilinear_resize_align_corners(att[:, 0], output.shape[2:])[:, None, :, :]
    return output, att_resized


# --------------------------------------- main ----------------------------------------

if __name__ == "__main__":
    key = jax.random.PRNGKey(0)
    k_param, k_x = jax.random.split(key)

    N, C, H, W = 2, 1, 16, 16       # small shapes: grayscale 16x16 images
    ngf, n_blocks = 8, 2

    params = init_params(k_param, input_nc=C, output_nc=1, ngf=ngf, n_blocks=n_blocks)
    x = jax.random.normal(k_x, (N, C, H, W), jnp.float32)

    fwd = jax.jit(functools.partial(attention_generator_forward, n_blocks=n_blocks))
    output, attention_map = fwd(params, x)
    output = jax.block_until_ready(output)
    attention_map = jax.block_until_ready(attention_map)

    assert output.shape == (N, 1, H, W), output.shape
    assert attention_map.shape == (N, 1, H, W), attention_map.shape
    assert bool(jnp.all(jnp.isfinite(output))) and bool(jnp.all(jnp.isfinite(attention_map)))
    assert bool(jnp.all((attention_map >= 0.0) & (attention_map <= 1.0)))
    assert bool(jnp.all((output >= -1.0) & (output <= 1.0)))

    print("KERNEL_OK")
</pallas_src>

<mosaic_0001>
module attributes {stable_mosaic.version = 11 : i64} {
  func.func @kernel(%arg0: i32, %arg1: memref<1x49x256xbf16, #tpu.memory_space<vmem>>, %arg2: memref<8x49xbf16, #tpu.memory_space<vmem>>, %arg3: memref<8x1xf32, #tpu.memory_space<vmem>>, %arg4: memref<1x8x256xf32, #tpu.memory_space<vmem>>) attributes {dimension_semantics = [#tpu.dimension_semantics<parallel>], iteration_bounds = array<i64: 2>, scalar_prefetch = 0 : i64, scratch_operands = 0 : i64, tpu.core_type = #tpu.core_type<tc>, window_params = [{transform_indices = @transform_0, window_bounds = array<i64: 1, 49, 256>}, {pipeline_mode = #tpu.pipeline_mode<synchronous>, transform_indices = @transform_1, window_bounds = array<i64: 8, 49>}, {pipeline_mode = #tpu.pipeline_mode<synchronous>, transform_indices = @transform_2, window_bounds = array<i64: 8, 1>}, {transform_indices = @transform_3, window_bounds = array<i64: 1, 8, 256>}]} {
    %c0 = arith.constant 0 : index
    %c0_0 = arith.constant 0 : index
    %0 = vector.load %arg2[%c0, %c0_0] : memref<8x49xbf16, #tpu.memory_space<vmem>>, vector<8x49xbf16>
    %c0_1 = arith.constant 0 : index
    %c0_2 = arith.constant 0 : index
    %c0_3 = arith.constant 0 : index
    %1 = vector.load %arg1[%c0_1, %c0_2, %c0_3] : memref<1x49x256xbf16, #tpu.memory_space<vmem>>, vector<1x49x256xbf16>
    %2 = vector.shape_cast %1 : vector<1x49x256xbf16> to vector<49x256xbf16>
    %cst = arith.constant dense<0.000000e+00> : vector<8x256xf32>
    %3 = tpu.matmul %0, %2, %cst {dimension_numbers = #tpu.dot_dimension_numbers<[1], [0], [0], [1], [0, 0, 1, 1], [], []>} : vector<8x49xbf16>, vector<49x256xbf16>, vector<8x256xf32> -> vector<8x256xf32>
    %c0_4 = arith.constant 0 : index
    %c0_5 = arith.constant 0 : index
    %4 = vector.load %arg3[%c0_4, %c0_5] : memref<8x1xf32, #tpu.memory_space<vmem>>, vector<8x1xf32>
    %5 = vector.broadcast %4 : vector<8x1xf32> to vector<8x256xf32>
    %6 = arith.addf %3, %5 : vector<8x256xf32>
    %cst_6 = arith.constant dense<0.000000e+00> : vector<8xf32>
    %7 = vector.multi_reduction <add>, %6, %cst_6 [1] : vector<8x256xf32> to vector<8xf32>
    %8 = vector.shape_cast %7 : vector<8xf32> to vector<8x1xf32>
    %cst_7 = arith.constant 2.560000e+02 : f32
    %9 = vector.broadcast %cst_7 : f32 to vector<8x1xf32>
    %10 = arith.divf %8, %9 : vector<8x1xf32>
    %11 = vector.broadcast %10 : vector<8x1xf32> to vector<8x256xf32>
    %12 = arith.subf %6, %11 : vector<8x256xf32>
    %13 = arith.mulf %12, %12 : vector<8x256xf32>
    %cst_8 = arith.constant dense<0.000000e+00> : vector<8xf32>
    %14 = vector.multi_reduction <add>, %13, %cst_8 [1] : vector<8x256xf32> to vector<8xf32>
    %15 = vector.shape_cast %14 : vector<8xf32> to vector<8x1xf32>
    %cst_9 = arith.constant 2.560000e+02 : f32
    %16 = vector.broadcast %cst_9 : f32 to vector<8x1xf32>
    %17 = arith.divf %15, %16 : vector<8x1xf32>
    %cst_10 = arith.constant 9.99999974E-6 : f32
    %18 = vector.broadcast %cst_10 : f32 to vector<8x1xf32>
    %19 = arith.addf %17, %18 : vector<8x1xf32>
    %20 = math.rsqrt %19 : vector<8x1xf32>
    %21 = vector.broadcast %20 : vector<8x1xf32> to vector<8x256xf32>
    %22 = arith.mulf %12, %21 : vector<8x256xf32>
    %cst_11 = arith.constant 0.000000e+00 : f32
    %23 = vector.broadcast %cst_11 : f32 to vector<8x256xf32>
    %24 = arith.maximumf %22, %23 : vector<8x256xf32>
    %c0_12 = arith.constant 0 : index
    %c0_13 = arith.constant 0 : index
    %c0_14 = arith.constant 0 : index
    %25 = vector.load %arg4[%c0_12, %c0_13, %c0_14] : memref<1x8x256xf32, #tpu.memory_space<vmem>>, vector<1x8x256xf32>
    %26 = vector.shape_cast %25 : vector<1x8x256xf32> to vector<8x256xf32>
    %27 = vector.shape_cast %24 : vector<8x256xf32> to vector<1x8x256xf32>
    tpu.vector_store %arg4[%c0_12, %c0_13, %c0_14], %27 {strides = array<i32>} : memref<1x8x256xf32, #tpu.memory_space<vmem>>, vector<1x8x256xf32>,
    return
  }
  func.func @transform_0(%arg0: i32) -> (i32, i32, i32) {
    %c0_i32 = arith.constant 0 : i32
    %c0_i32_0 = arith.constant 0 : i32
    %c0_i32_1 = arith.constant 0 : i32
    return %arg0, %c0_i32, %c0_i32_0 : i32, i32, i32
  }
  func.func @transform_1(%arg0: i32) -> (i32, i32) {
    %c0_i32 = arith.constant 0 : i32
    %c0_i32_0 = arith.constant 0 : i32
    %c0_i32_1 = arith.constant 0 : i32
    return %c0_i32, %c0_i32_0 : i32, i32
  }
  func.func @transform_2(%arg0: i32) -> (i32, i32) {
    %c0_i32 = arith.constant 0 : i32
    %c0_i32_0 = arith.constant 0 : i32
    %c0_i32_1 = arith.constant 0 : i32
    return %c0_i32, %c0_i32_0 : i32, i32
  }
  func.func @transform_3(%arg0: i32) -> (i32, i32, i32) {
    %c0_i32 = arith.constant 0 : i32
    %c0_i32_0 = arith.constant 0 : i32
    %c0_i32_1 = arith.constant 0 : i32
    return %arg0, %c0_i32, %c0_i32_0 : i32, i32, i32
  }
}

module attributes {stable_mosaic.version = 11 : i64} {
  func.func @kernel(%arg0: i32, %arg1: memref<1x72x64xbf16, #tpu.memory_space<vmem>>, %arg2: memref<16x72xbf16, #tpu.memory_space<vmem>>, %arg3: memref<16x1xf32, #tpu.memory_space<vmem>>, %arg4: memref<1x16x64xf32, #tpu.memory_space<vmem>>) attributes {dimension_semantics = [#tpu.dimension_semantics<parallel>], iteration_bounds = array<i64: 2>, scalar_prefetch = 0 : i64, scratch_operands = 0 : i64, tpu.core_type = #tpu.core_type<tc>, window_params = [{transform_indices = @transform_0, window_bounds = array<i64: 1, 72, 64>}, {pipeline_mode = #tpu.pipeline_mode<synchronous>, transform_indices = @transform_1, window_bounds = array<i64: 16, 72>}, {pipeline_mode = #tpu.pipeline_mode<synchronous>, transform_indices = @transform_2, window_bounds = array<i64: 16, 1>}, {transform_indices = @transform_3, window_bounds = array<i64: 1, 16, 64>}]} {
    %c0 = arith.constant 0 : index
    %c0_0 = arith.constant 0 : index
    %0 = vector.load %arg2[%c0, %c0_0] : memref<16x72xbf16, #tpu.memory_space<vmem>>, vector<16x72xbf16>
    %c0_1 = arith.constant 0 : index
    %c0_2 = arith.constant 0 : index
    %c0_3 = arith.constant 0 : index
    %1 = vector.load %arg1[%c0_1, %c0_2, %c0_3] : memref<1x72x64xbf16, #tpu.memory_space<vmem>>, vector<1x72x64xbf16>
    %2 = vector.shape_cast %1 : vector<1x72x64xbf16> to vector<72x64xbf16>
    %cst = arith.constant dense<0.000000e+00> : vector<16x64xf32>
    %3 = tpu.matmul %0, %2, %cst {dimension_numbers = #tpu.dot_dimension_numbers<[1], [0], [0], [1], [0, 0, 1, 1], [], []>} : vector<16x72xbf16>, vector<72x64xbf16>, vector<16x64xf32> -> vector<16x64xf32>
    %c0_4 = arith.constant 0 : index
    %c0_5 = arith.constant 0 : index
    %4 = vector.load %arg3[%c0_4, %c0_5] : memref<16x1xf32, #tpu.memory_space<vmem>>, vector<16x1xf32>
    %5 = vector.broadcast %4 : vector<16x1xf32> to vector<16x64xf32>
    %6 = arith.addf %3, %5 : vector<16x64xf32>
    %cst_6 = arith.constant dense<0.000000e+00> : vector<16xf32>
    %7 = vector.multi_reduction <add>, %6, %cst_6 [1] : vector<16x64xf32> to vector<16xf32>
    %8 = vector.shape_cast %7 : vector<16xf32> to vector<16x1xf32>
    %cst_7 = arith.constant 6.400000e+01 : f32
    %9 = vector.broadcast %cst_7 : f32 to vector<16x1xf32>
    %10 = arith.divf %8, %9 : vector<16x1xf32>
    %11 = vector.broadcast %10 : vector<16x1xf32> to vector<16x64xf32>
    %12 = arith.subf %6, %11 : vector<16x64xf32>
    %13 = arith.mulf %12, %12 : vector<16x64xf32>
    %cst_8 = arith.constant dense<0.000000e+00> : vector<16xf32>
    %14 = vector.multi_reduction <add>, %13, %cst_8 [1] : vector<16x64xf32> to vector<16xf32>
    %15 = vector.shape_cast %14 : vector<16xf32> to vector<16x1xf32>
    %cst_9 = arith.constant 6.400000e+01 : f32
    %16 = vector.broadcast %cst_9 : f32 to vector<16x1xf32>
    %17 = arith.divf %15, %16 : vector<16x1xf32>
    %cst_10 = arith.constant 9.99999974E-6 : f32
    %18 = vector.broadcast %cst_10 : f32 to vector<16x1xf32>
    %19 = arith.addf %17, %18 : vector<16x1xf32>
    %20 = math.rsqrt %19 : vector<16x1xf32>
    %21 = vector.broadcast %20 : vector<16x1xf32> to vector<16x64xf32>
    %22 = arith.mulf %12, %21 : vector<16x64xf32>
    %cst_11 = arith.constant 0.000000e+00 : f32
    %23 = vector.broadcast %cst_11 : f32 to vector<16x64xf32>
    %24 = arith.maximumf %22, %23 : vector<16x64xf32>
    %c0_12 = arith.constant 0 : index
    %c0_13 = arith.constant 0 : index
    %c0_14 = arith.constant 0 : index
    %25 = vector.load %arg4[%c0_12, %c0_13, %c0_14] : memref<1x16x64xf32, #tpu.memory_space<vmem>>, vector<1x16x64xf32>
    %26 = vector.shape_cast %25 : vector<1x16x64xf32> to vector<16x64xf32>
    %27 = vector.shape_cast %24 : vector<16x64xf32> to vector<1x16x64xf32>
    tpu.vector_store %arg4[%c0_12, %c0_13, %c0_14], %27 {strides = array<i32>} : memref<1x16x64xf32, #tpu.memory_space<vmem>>, vector<1x16x64xf32>,
    return
  }
  func.func @transform_0(%arg0: i32) -> (i32, i32, i32) {
    %c0_i32 = arith.constant 0 : i32
    %c0_i32_0 = arith.constant 0 : i32
    %c0_i32_1 = arith.constant 0 : i32
    return %arg0, %c0_i32, %c0_i32_0 : i32, i32, i32
  }
  func.func @transform_1(%arg0: i32) -> (i32, i32) {
    %c0_i32 = arith.constant 0 : i32
    %c0_i32_0 = arith.constant 0 : i32
    %c0_i32_1 = arith.constant 0 : i32
    return %c0_i32, %c0_i32_0 : i32, i32
  }
  func.func @transform_2(%arg0: i32) -> (i32, i32) {
    %c0_i32 = arith.constant 0 : i32
    %c0_i32_0 = arith.constant 0 : i32
    %c0_i32_1 = arith.constant 0 : i32
    return %c0_i32, %c0_i32_0 : i32, i32
  }
  func.func @transform_3(%arg0: i32) -> (i32, i32, i32) {
    %c0_i32 = arith.constant 0 : i32
    %c0_i32_0 = arith.constant 0 : i32
    %c0_i32_1 = arith.constant 0 : i32
    return %arg0, %c0_i32, %c0_i32_0 : i32, i32, i32
  }
}

module attributes {stable_mosaic.version = 11 : i64} {
  func.func @kernel(%arg0: i32, %arg1: memref<1x144x16xbf16, #tpu.memory_space<vmem>>, %arg2: memref<32x144xbf16, #tpu.memory_space<vmem>>, %arg3: memref<32x1xf32, #tpu.memory_space<vmem>>, %arg4: memref<1x32x16xf32, #tpu.memory_space<vmem>>) attributes {dimension_semantics = [#tpu.dimension_semantics<parallel>], iteration_bounds = array<i64: 2>, scalar_prefetch = 0 : i64, scratch_operands = 0 : i64, tpu.core_type = #tpu.core_type<tc>, window_params = [{transform_indices = @transform_0, window_bounds = array<i64: 1, 144, 16>}, {pipeline_mode = #tpu.pipeline_mode<synchronous>, transform_indices = @transform_1, window_bounds = array<i64: 32, 144>}, {pipeline_mode = #tpu.pipeline_mode<synchronous>, transform_indices = @transform_2, window_bounds = array<i64: 32, 1>}, {transform_indices = @transform_3, window_bounds = array<i64: 1, 32, 16>}]} {
    %c0 = arith.constant 0 : index
    %c0_0 = arith.constant 0 : index
    %0 = vector.load %arg2[%c0, %c0_0] : memref<32x144xbf16, #tpu.memory_space<vmem>>, vector<32x144xbf16>
    %c0_1 = arith.constant 0 : index
    %c0_2 = arith.constant 0 : index
    %c0_3 = arith.constant 0 : index
    %1 = vector.load %arg1[%c0_1, %c0_2, %c0_3] : memref<1x144x16xbf16, #tpu.memory_space<vmem>>, vector<1x144x16xbf16>
    %2 = vector.shape_cast %1 : vector<1x144x16xbf16> to vector<144x16xbf16>
    %cst = arith.constant dense<0.000000e+00> : vector<32x16xf32>
    %3 = tpu.matmul %0, %2, %cst {dimension_numbers = #tpu.dot_dimension_numbers<[1], [0], [0], [1], [0, 0, 1, 1], [], []>} : vector<32x144xbf16>, vector<144x16xbf16>, vector<32x16xf32> -> vector<32x16xf32>
    %c0_4 = arith.constant 0 : index
    %c0_5 = arith.constant 0 : index
    %4 = vector.load %arg3[%c0_4, %c0_5] : memref<32x1xf32, #tpu.memory_space<vmem>>, vector<32x1xf32>
    %5 = vector.broadcast %4 : vector<32x1xf32> to vector<32x16xf32>
    %6 = arith.addf %3, %5 : vector<32x16xf32>
    %cst_6 = arith.constant dense<0.000000e+00> : vector<32xf32>
    %7 = vector.multi_reduction <add>, %6, %cst_6 [1] : vector<32x16xf32> to vector<32xf32>
    %8 = vector.shape_cast %7 : vector<32xf32> to vector<32x1xf32>
    %cst_7 = arith.constant 1.600000e+01 : f32
    %9 = vector.broadcast %cst_7 : f32 to vector<32x1xf32>
    %10 = arith.divf %8, %9 : vector<32x1xf32>
    %11 = vector.broadcast %10 : vector<32x1xf32> to vector<32x16xf32>
    %12 = arith.subf %6, %11 : vector<32x16xf32>
    %13 = arith.mulf %12, %12 : vector<32x16xf32>
    %cst_8 = arith.constant dense<0.000000e+00> : vector<32xf32>
    %14 = vector.multi_reduction <add>, %13, %cst_8 [1] : vector<32x16xf32> to vector<32xf32>
    %15 = vector.shape_cast %14 : vector<32xf32> to vector<32x1xf32>
    %cst_9 = arith.constant 1.600000e+01 : f32
    %16 = vector.broadcast %cst_9 : f32 to vector<32x1xf32>
    %17 = arith.divf %15, %16 : vector<32x1xf32>
    %cst_10 = arith.constant 9.99999974E-6 : f32
    %18 = vector.broadcast %cst_10 : f32 to vector<32x1xf32>
    %19 = arith.addf %17, %18 : vector<32x1xf32>
    %20 = math.rsqrt %19 : vector<32x1xf32>
    %21 = vector.broadcast %20 : vector<32x1xf32> to vector<32x16xf32>
    %22 = arith.mulf %12, %21 : vector<32x16xf32>
    %cst_11 = arith.constant 0.000000e+00 : f32
    %23 = vector.broadcast %cst_11 : f32 to vector<32x16xf32>
    %24 = arith.maximumf %22, %23 : vector<32x16xf32>
    %c0_12 = arith.constant 0 : index
    %c0_13 = arith.constant 0 : index
    %c0_14 = arith.constant 0 : index
    %25 = vector.load %arg4[%c0_12, %c0_13, %c0_14] : memref<1x32x16xf32, #tpu.memory_space<vmem>>, vector<1x32x16xf32>
    %26 = vector.shape_cast %25 : vector<1x32x16xf32> to vector<32x16xf32>
    %27 = vector.shape_cast %24 : vector<32x16xf32> to vector<1x32x16xf32>
    tpu.vector_store %arg4[%c0_12, %c0_13, %c0_14], %27 {strides = array<i32>} : memref<1x32x16xf32, #tpu.memory_space<vmem>>, vector<1x32x16xf32>,
    return
  }
  func.func @transform_0(%arg0: i32) -> (i32, i32, i32) {
    %c0_i32 = arith.constant 0 : i32
    %c0_i32_0 = arith.constant 0 : i32
    %c0_i32_1 = arith.constant 0 : i32
    return %arg0, %c0_i32, %c0_i32_0 : i32, i32, i32
  }
  func.func @transform_1(%arg0: i32) -> (i32, i32) {
    %c0_i32 = arith.constant 0 : i32
    %c0_i32_0 = arith.constant 0 : i32
    %c0_i32_1 = arith.constant 0 : i32
    return %c0_i32, %c0_i32_0 : i32, i32
  }
  func.func @transform_2(%arg0: i32) -> (i32, i32) {
    %c0_i32 = arith.constant 0 : i32
    %c0_i32_0 = arith.constant 0 : i32
    %c0_i32_1 = arith.constant 0 : i32
    return %c0_i32, %c0_i32_0 : i32, i32
  }
  func.func @transform_3(%arg0: i32) -> (i32, i32, i32) {
    %c0_i32 = arith.constant 0 : i32
    %c0_i32_0 = arith.constant 0 : i32
    %c0_i32_1 = arith.constant 0 : i32
    return %arg0, %c0_i32, %c0_i32_0 : i32, i32, i32
  }
}

module attributes {stable_mosaic.version = 11 : i64} {
  func.func @kernel(%arg0: i32, %arg1: memref<1x288x16xbf16, #tpu.memory_space<vmem>>, %arg2: memref<32x288xbf16, #tpu.memory_space<vmem>>, %arg3: memref<32x1xf32, #tpu.memory_space<vmem>>, %arg4: memref<1x32x16xf32, #tpu.memory_space<vmem>>) attributes {dimension_semantics = [#tpu.dimension_semantics<parallel>], iteration_bounds = array<i64: 2>, scalar_prefetch = 0 : i64, scratch_operands = 0 : i64, tpu.core_type = #tpu.core_type<tc>, window_params = [{transform_indices = @transform_0, window_bounds = array<i64: 1, 288, 16>}, {pipeline_mode = #tpu.pipeline_mode<synchronous>, transform_indices = @transform_1, window_bounds = array<i64: 32, 288>}, {pipeline_mode = #tpu.pipeline_mode<synchronous>, transform_indices = @transform_2, window_bounds = array<i64: 32, 1>}, {transform_indices = @transform_3, window_bounds = array<i64: 1, 32, 16>}]} {
    %c0 = arith.constant 0 : index
    %c0_0 = arith.constant 0 : index
    %0 = vector.load %arg2[%c0, %c0_0] : memref<32x288xbf16, #tpu.memory_space<vmem>>, vector<32x288xbf16>
    %c0_1 = arith.constant 0 : index
    %c0_2 = arith.constant 0 : index
    %c0_3 = arith.constant 0 : index
    %1 = vector.load %arg1[%c0_1, %c0_2, %c0_3] : memref<1x288x16xbf16, #tpu.memory_space<vmem>>, vector<1x288x16xbf16>
    %2 = vector.shape_cast %1 : vector<1x288x16xbf16> to vector<288x16xbf16>
    %cst = arith.constant dense<0.000000e+00> : vector<32x16xf32>
    %3 = tpu.matmul %0, %2, %cst {dimension_numbers = #tpu.dot_dimension_numbers<[1], [0], [0], [1], [0, 0, 1, 1], [], []>} : vector<32x288xbf16>, vector<288x16xbf16>, vector<32x16xf32> -> vector<32x16xf32>
    %c0_4 = arith.constant 0 : index
    %c0_5 = arith.constant 0 : index
    %4 = vector.load %arg3[%c0_4, %c0_5] : memref<32x1xf32, #tpu.memory_space<vmem>>, vector<32x1xf32>
    %5 = vector.broadcast %4 : vector<32x1xf32> to vector<32x16xf32>
    %6 = arith.addf %3, %5 : vector<32x16xf32>
    %cst_6 = arith.constant dense<0.000000e+00> : vector<32xf32>
    %7 = vector.multi_reduction <add>, %6, %cst_6 [1] : vector<32x16xf32> to vector<32xf32>
    %8 = vector.shape_cast %7 : vector<32xf32> to vector<32x1xf32>
    %cst_7 = arith.constant 1.600000e+01 : f32
    %9 = vector.broadcast %cst_7 : f32 to vector<32x1xf32>
    %10 = arith.divf %8, %9 : vector<32x1xf32>
    %11 = vector.broadcast %10 : vector<32x1xf32> to vector<32x16xf32>
    %12 = arith.subf %6, %11 : vector<32x16xf32>
    %13 = arith.mulf %12, %12 : vector<32x16xf32>
    %cst_8 = arith.constant dense<0.000000e+00> : vector<32xf32>
    %14 = vector.multi_reduction <add>, %13, %cst_8 [1] : vector<32x16xf32> to vector<32xf32>
    %15 = vector.shape_cast %14 : vector<32xf32> to vector<32x1xf32>
    %cst_9 = arith.constant 1.600000e+01 : f32
    %16 = vector.broadcast %cst_9 : f32 to vector<32x1xf32>
    %17 = arith.divf %15, %16 : vector<32x1xf32>
    %cst_10 = arith.constant 9.99999974E-6 : f32
    %18 = vector.broadcast %cst_10 : f32 to vector<32x1xf32>
    %19 = arith.addf %17, %18 : vector<32x1xf32>
    %20 = math.rsqrt %19 : vector<32x1xf32>
    %21 = vector.broadcast %20 : vector<32x1xf32> to vector<32x16xf32>
    %22 = arith.mulf %12, %21 : vector<32x16xf32>
    %cst_11 = arith.constant 0.000000e+00 : f32
    %23 = vector.broadcast %cst_11 : f32 to vector<32x16xf32>
    %24 = arith.maximumf %22, %23 : vector<32x16xf32>
    %c0_12 = arith.constant 0 : index
    %c0_13 = arith.constant 0 : index
    %c0_14 = arith.constant 0 : index
    %25 = vector.load %arg4[%c0_12, %c0_13, %c0_14] : memref<1x32x16xf32, #tpu.memory_space<vmem>>, vector<1x32x16xf32>
    %26 = vector.shape_cast %25 : vector<1x32x16xf32> to vector<32x16xf32>
    %27 = vector.shape_cast %24 : vector<32x16xf32> to vector<1x32x16xf32>
    tpu.vector_store %arg4[%c0_12, %c0_13, %c0_14], %27 {strides = array<i32>} : memref<1x32x16xf32, #tpu.memory_space<vmem>>, vector<1x32x16xf32>,
    return
  }
  func.func @transform_0(%arg0: i32) -> (i32, i32, i32) {
    %c0_i32 = arith.constant 0 : i32
    %c0_i32_0 = arith.constant 0 : i32
    %c0_i32_1 = arith.constant 0 : i32
    return %arg0, %c0_i32, %c0_i32_0 : i32, i32, i32
  }
  func.func @transform_1(%arg0: i32) -> (i32, i32) {
    %c0_i32 = arith.constant 0 : i32
    %c0_i32_0 = arith.constant 0 : i32
    %c0_i32_1 = arith.constant 0 : i32
    return %c0_i32, %c0_i32_0 : i32, i32
  }
  func.func @transform_2(%arg0: i32) -> (i32, i32) {
    %c0_i32 = arith.constant 0 : i32
    %c0_i32_0 = arith.constant 0 : i32
    %c0_i32_1 = arith.constant 0 : i32
    return %c0_i32, %c0_i32_0 : i32, i32
  }
  func.func @transform_3(%arg0: i32) -> (i32, i32, i32) {
    %c0_i32 = arith.constant 0 : i32
    %c0_i32_0 = arith.constant 0 : i32
    %c0_i32_1 = arith.constant 0 : i32
    return %arg0, %c0_i32, %c0_i32_0 : i32, i32, i32
  }
}

module attributes {stable_mosaic.version = 11 : i64} {
  func.func @kernel(%arg0: i32, %arg1: memref<1x288x16xbf16, #tpu.memory_space<vmem>>, %arg2: memref<32x288xbf16, #tpu.memory_space<vmem>>, %arg3: memref<32x1xf32, #tpu.memory_space<vmem>>, %arg4: memref<1x32x16xf32, #tpu.memory_space<vmem>>, %arg5: memref<1x32x16xf32, #tpu.memory_space<vmem>>) attributes {dimension_semantics = [#tpu.dimension_semantics<parallel>], iteration_bounds = array<i64: 2>, scalar_prefetch = 0 : i64, scratch_operands = 0 : i64, tpu.core_type = #tpu.core_type<tc>, window_params = [{transform_indices = @transform_0, window_bounds = array<i64: 1, 288, 16>}, {pipeline_mode = #tpu.pipeline_mode<synchronous>, transform_indices = @transform_1, window_bounds = array<i64: 32, 288>}, {pipeline_mode = #tpu.pipeline_mode<synchronous>, transform_indices = @transform_2, window_bounds = array<i64: 32, 1>}, {transform_indices = @transform_3, window_bounds = array<i64: 1, 32, 16>}, {transform_indices = @transform_4, window_bounds = array<i64: 1, 32, 16>}]} {
    %c0 = arith.constant 0 : index
    %c0_0 = arith.constant 0 : index
    %0 = vector.load %arg2[%c0, %c0_0] : memref<32x288xbf16, #tpu.memory_space<vmem>>, vector<32x288xbf16>
    %c0_1 = arith.constant 0 : index
    %c0_2 = arith.constant 0 : index
    %c0_3 = arith.constant 0 : index
    %1 = vector.load %arg1[%c0_1, %c0_2, %c0_3] : memref<1x288x16xbf16, #tpu.memory_space<vmem>>, vector<1x288x16xbf16>
    %2 = vector.shape_cast %1 : vector<1x288x16xbf16> to vector<288x16xbf16>
    %cst = arith.constant dense<0.000000e+00> : vector<32x16xf32>
    %3 = tpu.matmul %0, %2, %cst {dimension_numbers = #tpu.dot_dimension_numbers<[1], [0], [0], [1], [0, 0, 1, 1], [], []>} : vector<32x288xbf16>, vector<288x16xbf16>, vector<32x16xf32> -> vector<32x16xf32>
    %c0_4 = arith.constant 0 : index
    %c0_5 = arith.constant 0 : index
    %4 = vector.load %arg3[%c0_4, %c0_5] : memref<32x1xf32, #tpu.memory_space<vmem>>, vector<32x1xf32>
    %5 = vector.broadcast %4 : vector<32x1xf32> to vector<32x16xf32>
    %6 = arith.addf %3, %5 : vector<32x16xf32>
    %cst_6 = arith.constant dense<0.000000e+00> : vector<32xf32>
    %7 = vector.multi_reduction <add>, %6, %cst_6 [1] : vector<32x16xf32> to vector<32xf32>
    %8 = vector.shape_cast %7 : vector<32xf32> to vector<32x1xf32>
    %cst_7 = arith.constant 1.600000e+01 : f32
    %9 = vector.broadcast %cst_7 : f32 to vector<32x1xf32>
    %10 = arith.divf %8, %9 : vector<32x1xf32>
    %11 = vector.broadcast %10 : vector<32x1xf32> to vector<32x16xf32>
    %12 = arith.subf %6, %11 : vector<32x16xf32>
    %13 = arith.mulf %12, %12 : vector<32x16xf32>
    %cst_8 = arith.constant dense<0.000000e+00> : vector<32xf32>
    %14 = vector.multi_reduction <add>, %13, %cst_8 [1] : vector<32x16xf32> to vector<32xf32>
    %15 = vector.shape_cast %14 : vector<32xf32> to vector<32x1xf32>
    %cst_9 = arith.constant 1.600000e+01 : f32
    %16 = vector.broadcast %cst_9 : f32 to vector<32x1xf32>
    %17 = arith.divf %15, %16 : vector<32x1xf32>
    %cst_10 = arith.constant 9.99999974E-6 : f32
    %18 = vector.broadcast %cst_10 : f32 to vector<32x1xf32>
    %19 = arith.addf %17, %18 : vector<32x1xf32>
    %20 = math.rsqrt %19 : vector<32x1xf32>
    %21 = vector.broadcast %20 : vector<32x1xf32> to vector<32x16xf32>
    %22 = arith.mulf %12, %21 : vector<32x16xf32>
    %c0_11 = arith.constant 0 : index
    %c0_12 = arith.constant 0 : index
    %c0_13 = arith.constant 0 : index
    %23 = vector.load %arg4[%c0_11, %c0_12, %c0_13] : memref<1x32x16xf32, #tpu.memory_space<vmem>>, vector<1x32x16xf32>
    %24 = vector.shape_cast %23 : vector<1x32x16xf32> to vector<32x16xf32>
    %25 = arith.addf %22, %24 : vector<32x16xf32>
    %c0_14 = arith.constant 0 : index
    %c0_15 = arith.constant 0 : index
    %c0_16 = arith.constant 0 : index
    %26 = vector.load %arg5[%c0_14, %c0_15, %c0_16] : memref<1x32x16xf32, #tpu.memory_space<vmem>>, vector<1x32x16xf32>
    %27 = vector.shape_cast %26 : vector<1x32x16xf32> to vector<32x16xf32>
    %28 = vector.shape_cast %25 : vector<32x16xf32> to vector<1x32x16xf32>
    tpu.vector_store %arg5[%c0_14, %c0_15, %c0_16], %28 {strides = array<i32>} : memref<1x32x16xf32, #tpu.memory_space<vmem>>, vector<1x32x16xf32>,
    return
  }
  func.func @transform_0(%arg0: i32) -> (i32, i32, i32) {
    %c0_i32 = arith.constant 0 : i32
    %c0_i32_0 = arith.constant 0 : i32
    %c0_i32_1 = arith.constant 0 : i32
    return %arg0, %c0_i32, %c0_i32_0 : i32, i32, i32
  }
  func.func @transform_1(%arg0: i32) -> (i32, i32) {
    %c0_i32 = arith.constant 0 : i32
    %c0_i32_0 = arith.constant 0 : i32
    %c0_i32_1 = arith.constant 0 : i32
    return %c0_i32, %c0_i32_0 : i32, i32
  }
  func.func @transform_2(%arg0: i32) -> (i32, i32) {
    %c0_i32 = arith.constant 0 : i32
    %c0_i32_0 = arith.constant 0 : i32
    %c0_i32_1 = arith.constant 0 : i32
    return %c0_i32, %c0_i32_0 : i32, i32
  }
  func.func @transform_3(%arg0: i32) -> (i32, i32, i32) {
    %c0_i32 = arith.constant 0 : i32
    %c0_i32_0 = arith.constant 0 : i32
    %c0_i32_1 = arith.constant 0 : i32
    return %arg0, %c0_i32, %c0_i32_0 : i32, i32, i32
  }
  func.func @transform_4(%arg0: i32) -> (i32, i32, i32) {
    %c0_i32 = arith.constant 0 : i32
    %c0_i32_0 = arith.constant 0 : i32
    %c0_i32_1 = arith.constant 0 : i32
    return %arg0, %c0_i32, %c0_i32_0 : i32, i32, i32
  }
}

module attributes {stable_mosaic.version = 11 : i64} {
  func.func @kernel(%arg0: i32, %arg1: memref<1x32x16xf32, #tpu.memory_space<vmem>>, %arg2: memref<1x32xf32, #tpu.memory_space<vmem>>, %arg3: memref<1x1xf32, #tpu.memory_space<vmem>>, %arg4: memref<1x1xf32, #tpu.memory_space<vmem>>, %arg5: memref<1x1xf32, #tpu.memory_space<vmem>>, %arg6: memref<1x1x16xf32, #tpu.memory_space<vmem>>) attributes {dimension_semantics = [#tpu.dimension_semantics<parallel>], iteration_bounds = array<i64: 2>, scalar_prefetch = 0 : i64, scratch_operands = 0 : i64, tpu.core_type = #tpu.core_type<tc>, window_params = [{transform_indices = @transform_0, window_bounds = array<i64: 1, 32, 16>}, {pipeline_mode = #tpu.pipeline_mode<synchronous>, transform_indices = @transform_1, window_bounds = array<i64: 1, 32>}, {pipeline_mode = #tpu.pipeline_mode<synchronous>, transform_indices = @transform_2, window_bounds = array<i64: 1, 1>}, {pipeline_mode = #tpu.pipeline_mode<synchronous>, transform_indices = @transform_3, window_bounds = array<i64: 1, 1>}, {pipeline_mode = #tpu.pipeline_mode<synchronous>, transform_indices = @transform_4, window_bounds = array<i64: 1, 1>}, {transform_indices = @transform_5, window_bounds = array<i64: 1, 1, 16>}]} {
    %c0 = arith.constant 0 : index
    %c0_0 = arith.constant 0 : index
    %0 = vector.load %arg2[%c0, %c0_0] : memref<1x32xf32, #tpu.memory_space<vmem>>, vector<1x32xf32>
    %c0_1 = arith.constant 0 : index
    %c0_2 = arith.constant 0 : index
    %c0_3 = arith.constant 0 : index
    %1 = vector.load %arg1[%c0_1, %c0_2, %c0_3] : memref<1x32x16xf32, #tpu.memory_space<vmem>>, vector<1x32x16xf32>
    %2 = vector.shape_cast %1 : vector<1x32x16xf32> to vector<32x16xf32>
    %cst = arith.constant dense<0.000000e+00> : vector<1x16xf32>
    %3 = tpu.matmul %0, %2, %cst {dimension_numbers = #tpu.dot_dimension_numbers<[1], [0], [0], [1], [0, 0, 1, 1], [], []>} : vector<1x32xf32>, vector<32x16xf32>, vector<1x16xf32> -> vector<1x16xf32>
    %c0_4 = arith.constant 0 : index
    %c0_5 = arith.constant 0 : index
    %4 = vector.load %arg3[%c0_4, %c0_5] : memref<1x1xf32, #tpu.memory_space<vmem>>, vector<1x1xf32>
    %5 = vector.broadcast %4 : vector<1x1xf32> to vector<1x16xf32>
    %6 = arith.addf %3, %5 : vector<1x16xf32>
    %cst_6 = arith.constant dense<0.000000e+00> : vector<1xf32>
    %7 = vector.multi_reduction <add>, %6, %cst_6 [1] : vector<1x16xf32> to vector<1xf32>
    %8 = vector.shape_cast %7 : vector<1xf32> to vector<1x1xf32>
    %cst_7 = arith.constant 1.600000e+01 : f32
    %9 = vector.broadcast %cst_7 : f32 to vector<1x1xf32>
    %10 = arith.divf %8, %9 : vector<1x1xf32>
    %11 = vector.broadcast %10 : vector<1x1xf32> to vector<1x16xf32>
    %12 = arith.subf %6, %11 : vector<1x16xf32>
    %13 = arith.mulf %12, %12 : vector<1x16xf32>
    %cst_8 = arith.constant dense<0.000000e+00> : vector<1xf32>
    %14 = vector.multi_reduction <add>, %13, %cst_8 [1] : vector<1x16xf32> to vector<1xf32>
    %15 = vector.shape_cast %14 : vector<1xf32> to vector<1x1xf32>
    %cst_9 = arith.constant 1.600000e+01 : f32
    %16 = vector.broadcast %cst_9 : f32 to vector<1x1xf32>
    %17 = arith.divf %15, %16 : vector<1x1xf32>
    %cst_10 = arith.constant 9.99999974E-6 : f32
    %18 = vector.broadcast %cst_10 : f32 to vector<1x1xf32>
    %19 = arith.addf %17, %18 : vector<1x1xf32>
    %20 = math.rsqrt %19 : vector<1x1xf32>
    %21 = vector.broadcast %20 : vector<1x1xf32> to vector<1x16xf32>
    %22 = arith.mulf %12, %21 : vector<1x16xf32>
    %cst_11 = arith.constant 0.000000e+00 : f32
    %23 = vector.broadcast %cst_11 : f32 to vector<1x16xf32>
    %24 = arith.maximumf %22, %23 : vector<1x16xf32>
    %c0_12 = arith.constant 0 : index
    %c0_13 = arith.constant 0 : index
    %25 = vector.load %arg4[%c0_12, %c0_13] : memref<1x1xf32, #tpu.memory_space<vmem>>, vector<1x1xf32>
    %26 = vector.broadcast %25 : vector<1x1xf32> to vector<1x16xf32>
    %27 = arith.mulf %24, %26 : vector<1x16xf32>
    %c0_14 = arith.constant 0 : index
    %c0_15 = arith.constant 0 : index
    %28 = vector.load %arg5[%c0_14, %c0_15] : memref<1x1xf32, #tpu.memory_space<vmem>>, vector<1x1xf32>
    %29 = vector.broadcast %28 : vector<1x1xf32> to vector<1x16xf32>
    %30 = arith.addf %27, %29 : vector<1x16xf32>
    %31 = arith.negf %30 : vector<1x16xf32>
    %32 = math.exp %31 : vector<1x16xf32>
    %cst_16 = arith.constant 1.000000e+00 : f32
    %33 = vector.broadcast %cst_16 : f32 to vector<1x16xf32>
    %34 = arith.addf %33, %32 : vector<1x16xf32>
    %35 = arith.divf %33, %34 : vector<1x16xf32>
    %c0_17 = arith.constant 0 : index
    %c0_18 = arith.constant 0 : index
    %c0_19 = arith.constant 0 : index
    %36 = vector.load %arg6[%c0_17, %c0_18, %c0_19] : memref<1x1x16xf32, #tpu.memory_space<vmem>>, vector<1x1x16xf32>
    %37 = vector.shape_cast %36 : vector<1x1x16xf32> to vector<1x16xf32>
    %38 = vector.shape_cast %35 : vector<1x16xf32> to vector<1x1x16xf32>
    tpu.vector_store %arg6[%c0_17, %c0_18, %c0_19], %38 {strides = array<i32>} : memref<1x1x16xf32, #tpu.memory_space<vmem>>, vector<1x1x16xf32>,
    return
  }
  func.func @transform_0(%arg0: i32) -> (i32, i32, i32) {
    %c0_i32 = arith.constant 0 : i32
    %c0_i32_0 = arith.constant 0 : i32
    %c0_i32_1 = arith.constant 0 : i32
    return %arg0, %c0_i32, %c0_i32_0 : i32, i32, i32
  }
  func.func @transform_1(%arg0: i32) -> (i32, i32) {
    %c0_i32 = arith.constant 0 : i32
    %c0_i32_0 = arith.constant 0 : i32
    %c0_i32_1 = arith.constant 0 : i32
    return %c0_i32, %c0_i32_0 : i32, i32
  }
  func.func @transform_2(%arg0: i32) -> (i32, i32) {
    %c0_i32 = arith.constant 0 : i32
    %c0_i32_0 = arith.constant 0 : i32
    %c0_i32_1 = arith.constant 0 : i32
    return %c0_i32, %c0_i32_0 : i32, i32
  }
  func.func @transform_3(%arg0: i32) -> (i32, i32) {
    %c0_i32 = arith.constant 0 : i32
    %c0_i32_0 = arith.constant 0 : i32
    %c0_i32_1 = arith.constant 0 : i32
    return %c0_i32, %c0_i32_0 : i32, i32
  }
  func.func @transform_4(%arg0: i32) -> (i32, i32) {
    %c0_i32 = arith.constant 0 : i32
    %c0_i32_0 = arith.constant 0 : i32
    %c0_i32_1 = arith.constant 0 : i32
    return %c0_i32, %c0_i32_0 : i32, i32
  }
  func.func @transform_5(%arg0: i32) -> (i32, i32, i32) {
    %c0_i32 = arith.constant 0 : i32
    %c0_i32_0 = arith.constant 0 : i32
    %c0_i32_1 = arith.constant 0 : i32
    return %arg0, %c0_i32, %c0_i32_0 : i32, i32, i32
  }
}

module attributes {stable_mosaic.version = 11 : i64} {
  func.func @kernel(%arg0: i32, %arg1: memref<1x4x4xf32, #tpu.memory_space<vmem>>, %arg2: memref<16x4xf32, #tpu.memory_space<vmem>>, %arg3: memref<4x16xf32, #tpu.memory_space<vmem>>, %arg4: memref<1x16x16xf32, #tpu.memory_space<vmem>>) attributes {dimension_semantics = [#tpu.dimension_semantics<parallel>], iteration_bounds = array<i64: 2>, scalar_prefetch = 0 : i64, scratch_operands = 0 : i64, tpu.core_type = #tpu.core_type<tc>, window_params = [{transform_indices = @transform_0, window_bounds = array<i64: 1, 4, 4>}, {pipeline_mode = #tpu.pipeline_mode<synchronous>, transform_indices = @transform_1, window_bounds = array<i64: 16, 4>}, {pipeline_mode = #tpu.pipeline_mode<synchronous>, transform_indices = @transform_2, window_bounds = array<i64: 4, 16>}, {transform_indices = @transform_3, window_bounds = array<i64: 1, 16, 16>}]} {
    %c0 = arith.constant 0 : index
    %c0_0 = arith.constant 0 : index
    %0 = vector.load %arg2[%c0, %c0_0] : memref<16x4xf32, #tpu.memory_space<vmem>>, vector<16x4xf32>
    %c0_1 = arith.constant 0 : index
    %c0_2 = arith.constant 0 : index
    %c0_3 = arith.constant 0 : index
    %1 = vector.load %arg1[%c0_1, %c0_2, %c0_3] : memref<1x4x4xf32, #tpu.memory_space<vmem>>, vector<1x4x4xf32>
    %2 = vector.shape_cast %1 : vector<1x4x4xf32> to vector<4x4xf32>
    %cst = arith.constant dense<0.000000e+00> : vector<16x4xf32>
    %3 = tpu.matmul %0, %2, %cst {dimension_numbers = #tpu.dot_dimension_numbers<[1], [0], [0], [1], [0, 0, 1, 1], [], []>} : vector<16x4xf32>, vector<4x4xf32>, vector<16x4xf32> -> vector<16x4xf32>
    %c0_4 = arith.constant 0 : index
    %c0_5 = arith.constant 0 : index
    %4 = vector.load %arg3[%c0_4, %c0_5] : memref<4x16xf32, #tpu.memory_space<vmem>>, vector<4x16xf32>
    %cst_6 = arith.constant dense<0.000000e+00> : vector<16x16xf32>
    %5 = tpu.matmul %3, %4, %cst_6 {dimension_numbers = #tpu.dot_dimension_numbers<[1], [0], [0], [1], [0, 0, 1, 1], [], []>} : vector<16x4xf32>, vector<4x16xf32>, vector<16x16xf32> -> vector<16x16xf32>
    %c0_7 = arith.constant 0 : index
    %c0_8 = arith.constant 0 : index
    %c0_9 = arith.constant 0 : index
    %6 = vector.load %arg4[%c0_7, %c0_8, %c0_9] : memref<1x16x16xf32, #tpu.memory_space<vmem>>, vector<1x16x16xf32>
    %7 = vector.shape_cast %6 : vector<1x16x16xf32> to vector<16x16xf32>
    %8 = vector.shape_cast %5 : vector<16x16xf32> to vector<1x16x16xf32>
    tpu.vector_store %arg4[%c0_7, %c0_8, %c0_9], %8 {strides = array<i32>} : memref<1x16x16xf32, #tpu.memory_space<vmem>>, vector<1x16x16xf32>,
    return
  }
  func.func @transform_0(%arg0: i32) -> (i32, i32, i32) {
    %c0_i32 = arith.constant 0 : i32
    %c0_i32_0 = arith.constant 0 : i32
    %c0_i32_1 = arith.constant 0 : i32
    return %arg0, %c0_i32, %c0_i32_0 : i32, i32, i32
  }
  func.func @transform_1(%arg0: i32) -> (i32, i32) {
    %c0_i32 = arith.constant 0 : i32
    %c0_i32_0 = arith.constant 0 : i32
    %c0_i32_1 = arith.constant 0 : i32
    return %c0_i32, %c0_i32_0 : i32, i32
  }
  func.func @transform_2(%arg0: i32) -> (i32, i32) {
    %c0_i32 = arith.constant 0 : i32
    %c0_i32_0 = arith.constant 0 : i32
    %c0_i32_1 = arith.constant 0 : i32
    return %c0_i32, %c0_i32_0 : i32, i32
  }
  func.func @transform_3(%arg0: i32) -> (i32, i32, i32) {
    %c0_i32 = arith.constant 0 : i32
    %c0_i32_0 = arith.constant 0 : i32
    %c0_i32_1 = arith.constant 0 : i32
    return %arg0, %c0_i32, %c0_i32_0 : i32, i32, i32
  }
}

module attributes {stable_mosaic.version = 11 : i64} {
  func.func @kernel(%arg0: i32, %arg1: memref<1x128x16xbf16, #tpu.memory_space<vmem>>, %arg2: memref<4x16x128xbf16, #tpu.memory_space<vmem>>, %arg3: memref<16x1xf32, #tpu.memory_space<vmem>>, %arg4: memref<1x4x16x16xf32, #tpu.memory_space<vmem>>) attributes {dimension_semantics = [#tpu.dimension_semantics<parallel>], iteration_bounds = array<i64: 2>, scalar_prefetch = 0 : i64, scratch_operands = 0 : i64, tpu.core_type = #tpu.core_type<tc>, window_params = [{transform_indices = @transform_0, window_bounds = array<i64: 1, 128, 16>}, {pipeline_mode = #tpu.pipeline_mode<synchronous>, transform_indices = @transform_1, window_bounds = array<i64: 4, 16, 128>}, {pipeline_mode = #tpu.pipeline_mode<synchronous>, transform_indices = @transform_2, window_bounds = array<i64: 16, 1>}, {transform_indices = @transform_3, window_bounds = array<i64: 1, 4, 16, 16>}]} {
    %c0 = arith.constant 0 : index
    %c0_0 = arith.constant 0 : index
    %c0_1 = arith.constant 0 : index
    %0 = vector.load %arg1[%c0, %c0_0, %c0_1] : memref<1x128x16xbf16, #tpu.memory_space<vmem>>, vector<1x128x16xbf16>
    %1 = vector.shape_cast %0 : vector<1x128x16xbf16> to vector<128x16xbf16>
    %c0_2 = arith.constant 0 : index
    %c0_3 = arith.constant 0 : index
    %2 = vector.load %arg3[%c0_2, %c0_3] : memref<16x1xf32, #tpu.memory_space<vmem>>, vector<16x1xf32>
    %cst = arith.constant 0.000000e+00 : f32
    %3 = vector.broadcast %cst : f32 to vector<16x1xf32>
    %cst_4 = arith.constant 0.000000e+00 : f32
    %4 = vector.broadcast %cst_4 : f32 to vector<16x1xf32>
    %c0_5 = arith.constant 0 : index
    %c0_6 = arith.constant 0 : index
    %c0_7 = arith.constant 0 : index
    %5 = vector.load %arg2[%c0_5, %c0_6, %c0_7] : memref<4x16x128xbf16, #tpu.memory_space<vmem>>, vector<1x16x128xbf16>
    %6 = vector.shape_cast %5 : vector<1x16x128xbf16> to vector<16x128xbf16>
    %cst_8 = arith.constant dense<0.000000e+00> : vector<16x16xf32>
    %7 = tpu.matmul %6, %1, %cst_8 {dimension_numbers = #tpu.dot_dimension_numbers<[1], [0], [0], [1], [0, 0, 1, 1], [], []>} : vector<16x128xbf16>, vector<128x16xbf16>, vector<16x16xf32> -> vector<16x16xf32>
    %8 = vector.broadcast %2 : vector<16x1xf32> to vector<16x16xf32>
    %9 = arith.addf %7, %8 : vector<16x16xf32>
    %cst_9 = arith.constant dense<0.000000e+00> : vector<16xf32>
    %10 = vector.multi_reduction <add>, %9, %cst_9 [1] : vector<16x16xf32> to vector<16xf32>
    %11 = vector.shape_cast %10 : vector<16xf32> to vector<16x1xf32>
    %12 = arith.addf %3, %11 : vector<16x1xf32>
    %13 = arith.mulf %9, %9 : vector<16x16xf32>
    %cst_10 = arith.constant dense<0.000000e+00> : vector<16xf32>
    %14 = vector.multi_reduction <add>, %13, %cst_10 [1] : vector<16x16xf32> to vector<16xf32>
    %15 = vector.shape_cast %14 : vector<16xf32> to vector<16x1xf32>
    %16 = arith.addf %4, %15 : vector<16x1xf32>
    %c1 = arith.constant 1 : index
    %c0_11 = arith.constant 0 : index
    %c0_12 = arith.constant 0 : index
    %17 = vector.load %arg2[%c1, %c0_11, %c0_12] : memref<4x16x128xbf16, #tpu.memory_space<vmem>>, vector<1x16x128xbf16>
    %18 = vector.shape_cast %17 : vector<1x16x128xbf16> to vector<16x128xbf16>
    %cst_13 = arith.constant dense<0.000000e+00> : vector<16x16xf32>
    %19 = tpu.matmul %18, %1, %cst_13 {dimension_numbers = #tpu.dot_dimension_numbers<[1], [0], [0], [1], [0, 0, 1, 1], [], []>} : vector<16x128xbf16>, vector<128x16xbf16>, vector<16x16xf32> -> vector<16x16xf32>
    %20 = vector.broadcast %2 : vector<16x1xf32> to vector<16x16xf32>
    %21 = arith.addf %19, %20 : vector<16x16xf32>
    %cst_14 = arith.constant dense<0.000000e+00> : vector<16xf32>
    %22 = vector.multi_reduction <add>, %21, %cst_14 [1] : vector<16x16xf32> to vector<16xf32>
    %23 = vector.shape_cast %22 : vector<16xf32> to vector<16x1xf32>
    %24 = arith.addf %12, %23 : vector<16x1xf32>
    %25 = arith.mulf %21, %21 : vector<16x16xf32>
    %cst_15 = arith.constant dense<0.000000e+00> : vector<16xf32>
    %26 = vector.multi_reduction <add>, %25, %cst_15 [1] : vector<16x16xf32> to vector<16xf32>
    %27 = vector.shape_cast %26 : vector<16xf32> to vector<16x1xf32>
    %28 = arith.addf %16, %27 : vector<16x1xf32>
    %c2 = arith.constant 2 : index
    %c0_16 = arith.constant 0 : index
    %c0_17 = arith.constant 0 : index
    %29 = vector.load %arg2[%c2, %c0_16, %c0_17] : memref<4x16x128xbf16, #tpu.memory_space<vmem>>, vector<1x16x128xbf16>
    %30 = vector.shape_cast %29 : vector<1x16x128xbf16> to vector<16x128xbf16>
    %cst_18 = arith.constant dense<0.000000e+00> : vector<16x16xf32>
    %31 = tpu.matmul %30, %1, %cst_18 {dimension_numbers = #tpu.dot_dimension_numbers<[1], [0], [0], [1], [0, 0, 1, 1], [], []>} : vector<16x128xbf16>, vector<128x16xbf16>, vector<16x16xf32> -> vector<16x16xf32>
    %32 = vector.broadcast %2 : vector<16x1xf32> to vector<16x16xf32>
    %33 = arith.addf %31, %32 : vector<16x16xf32>
    %cst_19 = arith.constant dense<0.000000e+00> : vector<16xf32>
    %34 = vector.multi_reduction <add>, %33, %cst_19 [1] : vector<16x16xf32> to vector<16xf32>
    %35 = vector.shape_cast %34 : vector<16xf32> to vector<16x1xf32>
    %36 = arith.addf %24, %35 : vector<16x1xf32>
    %37 = arith.mulf %33, %33 : vector<16x16xf32>
    %cst_20 = arith.constant dense<0.000000e+00> : vector<16xf32>
    %38 = vector.multi_reduction <add>, %37, %cst_20 [1] : vector<16x16xf32> to vector<16xf32>
    %39 = vector.shape_cast %38 : vector<16xf32> to vector<16x1xf32>
    %40 = arith.addf %28, %39 : vector<16x1xf32>
    %c3 = arith.constant 3 : index
    %c0_21 = arith.constant 0 : index
    %c0_22 = arith.constant 0 : index
    %41 = vector.load %arg2[%c3, %c0_21, %c0_22] : memref<4x16x128xbf16, #tpu.memory_space<vmem>>, vector<1x16x128xbf16>
    %42 = vector.shape_cast %41 : vector<1x16x128xbf16> to vector<16x128xbf16>
    %cst_23 = arith.constant dense<0.000000e+00> : vector<16x16xf32>
    %43 = tpu.matmul %42, %1, %cst_23 {dimension_numbers = #tpu.dot_dimension_numbers<[1], [0], [0], [1], [0, 0, 1, 1], [], []>} : vector<16x128xbf16>, vector<128x16xbf16>, vector<16x16xf32> -> vector<16x16xf32>
    %44 = vector.broadcast %2 : vector<16x1xf32> to vector<16x16xf32>
    %45 = arith.addf %43, %44 : vector<16x16xf32>
    %cst_24 = arith.constant dense<0.000000e+00> : vector<16xf32>
    %46 = vector.multi_reduction <add>, %45, %cst_24 [1] : vector<16x16xf32> to vector<16xf32>
    %47 = vector.shape_cast %46 : vector<16xf32> to vector<16x1xf32>
    %48 = arith.addf %36, %47 : vector<16x1xf32>
    %49 = arith.mulf %45, %45 : vector<16x16xf32>
    %cst_25 = arith.constant dense<0.000000e+00> : vector<16xf32>
    %50 = vector.multi_reduction <add>, %49, %cst_25 [1] : vector<16x16xf32> to vector<16xf32>
    %51 = vector.shape_cast %50 : vector<16xf32> to vector<16x1xf32>
    %52 = arith.addf %40, %51 : vector<16x1xf32>
    %cst_26 = arith.constant 1.562500e-02 : f32
    %53 = vector.broadcast %cst_26 : f32 to vector<16x1xf32>
    %54 = arith.mulf %48, %53 : vector<16x1xf32>
    %cst_27 = arith.constant 1.562500e-02 : f32
    %55 = vector.broadcast %cst_27 : f32 to vector<16x1xf32>
    %56 = arith.mulf %52, %55 : vector<16x1xf32>
    %57 = arith.mulf %54, %54 : vector<16x1xf32>
    %58 = arith.subf %56, %57 : vector<16x1xf32>
    %cst_28 = arith.constant 0.000000e+00 : f32
    %59 = vector.broadcast %cst_28 : f32 to vector<16x1xf32>
    %60 = arith.maximumf %58, %59 : vector<16x1xf32>
    %cst_29 = arith.constant 9.99999974E-6 : f32
    %61 = vector.broadcast %cst_29 : f32 to vector<16x1xf32>
    %62 = arith.addf %60, %61 : vector<16x1xf32>
    %63 = math.rsqrt %62 : vector<16x1xf32>
    %64 = vector.broadcast %54 : vector<16x1xf32> to vector<16x16xf32>
    %65 = arith.subf %9, %64 : vector<16x16xf32>
    %66 = vector.broadcast %63 : vector<16x1xf32> to vector<16x16xf32>
    %67 = arith.mulf %65, %66 : vector<16x16xf32>
    %cst_30 = arith.constant 0.000000e+00 : f32
    %68 = vector.broadcast %cst_30 : f32 to vector<16x16xf32>
    %69 = arith.maximumf %67, %68 : vector<16x16xf32>
    %c0_31 = arith.constant 0 : index
    %c0_32 = arith.constant 0 : index
    %c0_33 = arith.constant 0 : index
    %c0_34 = arith.constant 0 : index
    %70 = vector.load %arg4[%c0_31, %c0_32, %c0_33, %c0_34] : memref<1x4x16x16xf32, #tpu.memory_space<vmem>>, vector<1x1x16x16xf32>
    %71 = vector.shape_cast %70 : vector<1x1x16x16xf32> to vector<16x16xf32>
    %72 = vector.shape_cast %69 : vector<16x16xf32> to vector<1x1x16x16xf32>
    tpu.vector_store %arg4[%c0_31, %c0_32, %c0_33, %c0_34], %72 {strides = array<i32>} : memref<1x4x16x16xf32, #tpu.memory_space<vmem>>, vector<1x1x16x16xf32>,
    %73 = vector.broadcast %54 : vector<16x1xf32> to vector<16x16xf32>
    %74 = arith.subf %21, %73 : vector<16x16xf32>
    %75 = vector.broadcast %63 : vector<16x1xf32> to vector<16x16xf32>
    %76 = arith.mulf %74, %75 : vector<16x16xf32>
    %cst_35 = arith.constant 0.000000e+00 : f32
    %77 = vector.broadcast %cst_35 : f32 to vector<16x16xf32>
    %78 = arith.maximumf %76, %77 : vector<16x16xf32>
    %c0_36 = arith.constant 0 : index
    %c1_37 = arith.constant 1 : index
    %c0_38 = arith.constant 0 : index
    %c0_39 = arith.constant 0 : index
    %79 = vector.load %arg4[%c0_36, %c1_37, %c0_38, %c0_39] : memref<1x4x16x16xf32, #tpu.memory_space<vmem>>, vector<1x1x16x16xf32>
    %80 = vector.shape_cast %79 : vector<1x1x16x16xf32> to vector<16x16xf32>
    %81 = vector.shape_cast %78 : vector<16x16xf32> to vector<1x1x16x16xf32>
    tpu.vector_store %arg4[%c0_36, %c1_37, %c0_38, %c0_39], %81 {strides = array<i32>} : memref<1x4x16x16xf32, #tpu.memory_space<vmem>>, vector<1x1x16x16xf32>,
    %82 = vector.broadcast %54 : vector<16x1xf32> to vector<16x16xf32>
    %83 = arith.subf %33, %82 : vector<16x16xf32>
    %84 = vector.broadcast %63 : vector<16x1xf32> to vector<16x16xf32>
    %85 = arith.mulf %83, %84 : vector<16x16xf32>
    %cst_40 = arith.constant 0.000000e+00 : f32
    %86 = vector.broadcast %cst_40 : f32 to vector<16x16xf32>
    %87 = arith.maximumf %85, %86 : vector<16x16xf32>
    %c0_41 = arith.constant 0 : index
    %c2_42 = arith.constant 2 : index
    %c0_43 = arith.constant 0 : index
    %c0_44 = arith.constant 0 : index
    %88 = vector.load %arg4[%c0_41, %c2_42, %c0_43, %c0_44] : memref<1x4x16x16xf32, #tpu.memory_space<vmem>>, vector<1x1x16x16xf32>
    %89 = vector.shape_cast %88 : vector<1x1x16x16xf32> to vector<16x16xf32>
    %90 = vector.shape_cast %87 : vector<16x16xf32> to vector<1x1x16x16xf32>
    tpu.vector_store %arg4[%c0_41, %c2_42, %c0_43, %c0_44], %90 {strides = array<i32>} : memref<1x4x16x16xf32, #tpu.memory_space<vmem>>, vector<1x1x16x16xf32>,
    %91 = vector.broadcast %54 : vector<16x1xf32> to vector<16x16xf32>
    %92 = arith.subf %45, %91 : vector<16x16xf32>
    %93 = vector.broadcast %63 : vector<16x1xf32> to vector<16x16xf32>
    %94 = arith.mulf %92, %93 : vector<16x16xf32>
    %cst_45 = arith.constant 0.000000e+00 : f32
    %95 = vector.broadcast %cst_45 : f32 to vector<16x16xf32>
    %96 = arith.maximumf %94, %95 : vector<16x16xf32>
    %c0_46 = arith.constant 0 : index
    %c3_47 = arith.constant 3 : index
    %c0_48 = arith.constant 0 : index
    %c0_49 = arith.constant 0 : index
    %97 = vector.load %arg4[%c0_46, %c3_47, %c0_48, %c0_49] : memref<1x4x16x16xf32, #tpu.memory_space<vmem>>, vector<1x1x16x16xf32>
    %98 = vector.shape_cast %97 : vector<1x1x16x16xf32> to vector<16x16xf32>
    %99 = vector.shape_cast %96 : vector<16x16xf32> to vector<1x1x16x16xf32>
    tpu.vector_store %arg4[%c0_46, %c3_47, %c0_48, %c0_49], %99 {strides = array<i32>} : memref<1x4x16x16xf32, #tpu.memory_space<vmem>>, vector<1x1x16x16xf32>,
    return
  }
  func.func @transform_0(%arg0: i32) -> (i32, i32, i32) {
    %c0_i32 = arith.constant 0 : i32
    %c0_i32_0 = arith.constant 0 : i32
    %c0_i32_1 = arith.constant 0 : i32
    return %arg0, %c0_i32, %c0_i32_0 : i32, i32, i32
  }
  func.func @transform_1(%arg0: i32) -> (i32, i32, i32) {
    %c0_i32 = arith.constant 0 : i32
    %c0_i32_0 = arith.constant 0 : i32
    %c0_i32_1 = arith.constant 0 : i32
    %c0_i32_2 = arith.constant 0 : i32
    return %c0_i32, %c0_i32_0, %c0_i32_1 : i32, i32, i32
  }
  func.func @transform_2(%arg0: i32) -> (i32, i32) {
    %c0_i32 = arith.constant 0 : i32
    %c0_i32_0 = arith.constant 0 : i32
    %c0_i32_1 = arith.constant 0 : i32
    return %c0_i32, %c0_i32_0 : i32, i32
  }
  func.func @transform_3(%arg0: i32) -> (i32, i32, i32, i32) {
    %c0_i32 = arith.constant 0 : i32
    %c0_i32_0 = arith.constant 0 : i32
    %c0_i32_1 = arith.constant 0 : i32
    %c0_i32_2 = arith.constant 0 : i32
    return %arg0, %c0_i32, %c0_i32_0, %c0_i32_1 : i32, i32, i32, i32
  }
}

module attributes {stable_mosaic.version = 11 : i64} {
  func.func @kernel(%arg0: i32, %arg1: memref<1x64x64xbf16, #tpu.memory_space<vmem>>, %arg2: memref<4x8x64xbf16, #tpu.memory_space<vmem>>, %arg3: memref<8x1xf32, #tpu.memory_space<vmem>>, %arg4: memref<1x4x8x64xf32, #tpu.memory_space<vmem>>) attributes {dimension_semantics = [#tpu.dimension_semantics<parallel>], iteration_bounds = array<i64: 2>, scalar_prefetch = 0 : i64, scratch_operands = 0 : i64, tpu.core_type = #tpu.core_type<tc>, window_params = [{transform_indices = @transform_0, window_bounds = array<i64: 1, 64, 64>}, {pipeline_mode = #tpu.pipeline_mode<synchronous>, transform_indices = @transform_1, window_bounds = array<i64: 4, 8, 64>}, {pipeline_mode = #tpu.pipeline_mode<synchronous>, transform_indices = @transform_2, window_bounds = array<i64: 8, 1>}, {transform_indices = @transform_3, window_bounds = array<i64: 1, 4, 8, 64>}]} {
    %c0 = arith.constant 0 : index
    %c0_0 = arith.constant 0 : index
    %c0_1 = arith.constant 0 : index
    %0 = vector.load %arg1[%c0, %c0_0, %c0_1] : memref<1x64x64xbf16, #tpu.memory_space<vmem>>, vector<1x64x64xbf16>
    %1 = vector.shape_cast %0 : vector<1x64x64xbf16> to vector<64x64xbf16>
    %c0_2 = arith.constant 0 : index
    %c0_3 = arith.constant 0 : index
    %2 = vector.load %arg3[%c0_2, %c0_3] : memref<8x1xf32, #tpu.memory_space<vmem>>, vector<8x1xf32>
    %cst = arith.constant 0.000000e+00 : f32
    %3 = vector.broadcast %cst : f32 to vector<8x1xf32>
    %cst_4 = arith.constant 0.000000e+00 : f32
    %4 = vector.broadcast %cst_4 : f32 to vector<8x1xf32>
    %c0_5 = arith.constant 0 : index
    %c0_6 = arith.constant 0 : index
    %c0_7 = arith.constant 0 : index
    %5 = vector.load %arg2[%c0_5, %c0_6, %c0_7] : memref<4x8x64xbf16, #tpu.memory_space<vmem>>, vector<1x8x64xbf16>
    %6 = vector.shape_cast %5 : vector<1x8x64xbf16> to vector<8x64xbf16>
    %cst_8 = arith.constant dense<0.000000e+00> : vector<8x64xf32>
    %7 = tpu.matmul %6, %1, %cst_8 {dimension_numbers = #tpu.dot_dimension_numbers<[1], [0], [0], [1], [0, 0, 1, 1], [], []>} : vector<8x64xbf16>, vector<64x64xbf16>, vector<8x64xf32> -> vector<8x64xf32>
    %8 = vector.broadcast %2 : vector<8x1xf32> to vector<8x64xf32>
    %9 = arith.addf %7, %8 : vector<8x64xf32>
    %cst_9 = arith.constant dense<0.000000e+00> : vector<8xf32>
    %10 = vector.multi_reduction <add>, %9, %cst_9 [1] : vector<8x64xf32> to vector<8xf32>
    %11 = vector.shape_cast %10 : vector<8xf32> to vector<8x1xf32>
    %12 = arith.addf %3, %11 : vector<8x1xf32>
    %13 = arith.mulf %9, %9 : vector<8x64xf32>
    %cst_10 = arith.constant dense<0.000000e+00> : vector<8xf32>
    %14 = vector.multi_reduction <add>, %13, %cst_10 [1] : vector<8x64xf32> to vector<8xf32>
    %15 = vector.shape_cast %14 : vector<8xf32> to vector<8x1xf32>
    %16 = arith.addf %4, %15 : vector<8x1xf32>
    %c1 = arith.constant 1 : index
    %c0_11 = arith.constant 0 : index
    %c0_12 = arith.constant 0 : index
    %17 = vector.load %arg2[%c1, %c0_11, %c0_12] : memref<4x8x64xbf16, #tpu.memory_space<vmem>>, vector<1x8x64xbf16>
    %18 = vector.shape_cast %17 : vector<1x8x64xbf16> to vector<8x64xbf16>
    %cst_13 = arith.constant dense<0.000000e+00> : vector<8x64xf32>
    %19 = tpu.matmul %18, %1, %cst_13 {dimension_numbers = #tpu.dot_dimension_numbers<[1], [0], [0], [1], [0, 0, 1, 1], [], []>} : vector<8x64xbf16>, vector<64x64xbf16>, vector<8x64xf32> -> vector<8x64xf32>
    %20 = vector.broadcast %2 : vector<8x1xf32> to vector<8x64xf32>
    %21 = arith.addf %19, %20 : vector<8x64xf32>
    %cst_14 = arith.constant dense<0.000000e+00> : vector<8xf32>
    %22 = vector.multi_reduction <add>, %21, %cst_14 [1] : vector<8x64xf32> to vector<8xf32>
    %23 = vector.shape_cast %22 : vector<8xf32> to vector<8x1xf32>
    %24 = arith.addf %12, %23 : vector<8x1xf32>
    %25 = arith.mulf %21, %21 : vector<8x64xf32>
    %cst_15 = arith.constant dense<0.000000e+00> : vector<8xf32>
    %26 = vector.multi_reduction <add>, %25, %cst_15 [1] : vector<8x64xf32> to vector<8xf32>
    %27 = vector.shape_cast %26 : vector<8xf32> to vector<8x1xf32>
    %28 = arith.addf %16, %27 : vector<8x1xf32>
    %c2 = arith.constant 2 : index
    %c0_16 = arith.constant 0 : index
    %c0_17 = arith.constant 0 : index
    %29 = vector.load %arg2[%c2, %c0_16, %c0_17] : memref<4x8x64xbf16, #tpu.memory_space<vmem>>, vector<1x8x64xbf16>
    %30 = vector.shape_cast %29 : vector<1x8x64xbf16> to vector<8x64xbf16>
    %cst_18 = arith.constant dense<0.000000e+00> : vector<8x64xf32>
    %31 = tpu.matmul %30, %1, %cst_18 {dimension_numbers = #tpu.dot_dimension_numbers<[1], [0], [0], [1], [0, 0, 1, 1], [], []>} : vector<8x64xbf16>, vector<64x64xbf16>, vector<8x64xf32> -> vector<8x64xf32>
    %32 = vector.broadcast %2 : vector<8x1xf32> to vector<8x64xf32>
    %33 = arith.addf %31, %32 : vector<8x64xf32>
    %cst_19 = arith.constant dense<0.000000e+00> : vector<8xf32>
    %34 = vector.multi_reduction <add>, %33, %cst_19 [1] : vector<8x64xf32> to vector<8xf32>
    %35 = vector.shape_cast %34 : vector<8xf32> to vector<8x1xf32>
    %36 = arith.addf %24, %35 : vector<8x1xf32>
    %37 = arith.mulf %33, %33 : vector<8x64xf32>
    %cst_20 = arith.constant dense<0.000000e+00> : vector<8xf32>
    %38 = vector.multi_reduction <add>, %37, %cst_20 [1] : vector<8x64xf32> to vector<8xf32>
    %39 = vector.shape_cast %38 : vector<8xf32> to vector<8x1xf32>
    %40 = arith.addf %28, %39 : vector<8x1xf32>
    %c3 = arith.constant 3 : index
    %c0_21 = arith.constant 0 : index
    %c0_22 = arith.constant 0 : index
    %41 = vector.load %arg2[%c3, %c0_21, %c0_22] : memref<4x8x64xbf16, #tpu.memory_space<vmem>>, vector<1x8x64xbf16>
    %42 = vector.shape_cast %41 : vector<1x8x64xbf16> to vector<8x64xbf16>
    %cst_23 = arith.constant dense<0.000000e+00> : vector<8x64xf32>
    %43 = tpu.matmul %42, %1, %cst_23 {dimension_numbers = #tpu.dot_dimension_numbers<[1], [0], [0], [1], [0, 0, 1, 1], [], []>} : vector<8x64xbf16>, vector<64x64xbf16>, vector<8x64xf32> -> vector<8x64xf32>
    %44 = vector.broadcast %2 : vector<8x1xf32> to vector<8x64xf32>
    %45 = arith.addf %43, %44 : vector<8x64xf32>
    %cst_24 = arith.constant dense<0.000000e+00> : vector<8xf32>
    %46 = vector.multi_reduction <add>, %45, %cst_24 [1] : vector<8x64xf32> to vector<8xf32>
    %47 = vector.shape_cast %46 : vector<8xf32> to vector<8x1xf32>
    %48 = arith.addf %36, %47 : vector<8x1xf32>
    %49 = arith.mulf %45, %45 : vector<8x64xf32>
    %cst_25 = arith.constant dense<0.000000e+00> : vector<8xf32>
    %50 = vector.multi_reduction <add>, %49, %cst_25 [1] : vector<8x64xf32> to vector<8xf32>
    %51 = vector.shape_cast %50 : vector<8xf32> to vector<8x1xf32>
    %52 = arith.addf %40, %51 : vector<8x1xf32>
    %cst_26 = arith.constant 3.906250e-03 : f32
    %53 = vector.broadcast %cst_26 : f32 to vector<8x1xf32>
    %54 = arith.mulf %48, %53 : vector<8x1xf32>
    %cst_27 = arith.constant 3.906250e-03 : f32
    %55 = vector.broadcast %cst_27 : f32 to vector<8x1xf32>
    %56 = arith.mulf %52, %55 : vector<8x1xf32>
    %57 = arith.mulf %54, %54 : vector<8x1xf32>
    %58 = arith.subf %56, %57 : vector<8x1xf32>
    %cst_28 = arith.constant 0.000000e+00 : f32
    %59 = vector.broadcast %cst_28 : f32 to vector<8x1xf32>
    %60 = arith.maximumf %58, %59 : vector<8x1xf32>
    %cst_29 = arith.constant 9.99999974E-6 : f32
    %61 = vector.broadcast %cst_29 : f32 to vector<8x1xf32>
    %62 = arith.addf %60, %61 : vector<8x1xf32>
    %63 = math.rsqrt %62 : vector<8x1xf32>
    %64 = vector.broadcast %54 : vector<8x1xf32> to vector<8x64xf32>
    %65 = arith.subf %9, %64 : vector<8x64xf32>
    %66 = vector.broadcast %63 : vector<8x1xf32> to vector<8x64xf32>
    %67 = arith.mulf %65, %66 : vector<8x64xf32>
    %cst_30 = arith.constant 0.000000e+00 : f32
    %68 = vector.broadcast %cst_30 : f32 to vector<8x64xf32>
    %69 = arith.maximumf %67, %68 : vector<8x64xf32>
    %c0_31 = arith.constant 0 : index
    %c0_32 = arith.constant 0 : index
    %c0_33 = arith.constant 0 : index
    %c0_34 = arith.constant 0 : index
    %70 = vector.load %arg4[%c0_31, %c0_32, %c0_33, %c0_34] : memref<1x4x8x64xf32, #tpu.memory_space<vmem>>, vector<1x1x8x64xf32>
    %71 = vector.shape_cast %70 : vector<1x1x8x64xf32> to vector<8x64xf32>
    %72 = vector.shape_cast %69 : vector<8x64xf32> to vector<1x1x8x64xf32>
    tpu.vector_store %arg4[%c0_31, %c0_32, %c0_33, %c0_34], %72 {strides = array<i32>} : memref<1x4x8x64xf32, #tpu.memory_space<vmem>>, vector<1x1x8x64xf32>,
    %73 = vector.broadcast %54 : vector<8x1xf32> to vector<8x64xf32>
    %74 = arith.subf %21, %73 : vector<8x64xf32>
    %75 = vector.broadcast %63 : vector<8x1xf32> to vector<8x64xf32>
    %76 = arith.mulf %74, %75 : vector<8x64xf32>
    %cst_35 = arith.constant 0.000000e+00 : f32
    %77 = vector.broadcast %cst_35 : f32 to vector<8x64xf32>
    %78 = arith.maximumf %76, %77 : vector<8x64xf32>
    %c0_36 = arith.constant 0 : index
    %c1_37 = arith.constant 1 : index
    %c0_38 = arith.constant 0 : index
    %c0_39 = arith.constant 0 : index
    %79 = vector.load %arg4[%c0_36, %c1_37, %c0_38, %c0_39] : memref<1x4x8x64xf32, #tpu.memory_space<vmem>>, vector<1x1x8x64xf32>
    %80 = vector.shape_cast %79 : vector<1x1x8x64xf32> to vector<8x64xf32>
    %81 = vector.shape_cast %78 : vector<8x64xf32> to vector<1x1x8x64xf32>
    tpu.vector_store %arg4[%c0_36, %c1_37, %c0_38, %c0_39], %81 {strides = array<i32>} : memref<1x4x8x64xf32, #tpu.memory_space<vmem>>, vector<1x1x8x64xf32>,
    %82 = vector.broadcast %54 : vector<8x1xf32> to vector<8x64xf32>
    %83 = arith.subf %33, %82 : vector<8x64xf32>
    %84 = vector.broadcast %63 : vector<8x1xf32> to vector<8x64xf32>
    %85 = arith.mulf %83, %84 : vector<8x64xf32>
    %cst_40 = arith.constant 0.000000e+00 : f32
    %86 = vector.broadcast %cst_40 : f32 to vector<8x64xf32>
    %87 = arith.maximumf %85, %86 : vector<8x64xf32>
    %c0_41 = arith.constant 0 : index
    %c2_42 = arith.constant 2 : index
    %c0_43 = arith.constant 0 : index
    %c0_44 = arith.constant 0 : index
    %88 = vector.load %arg4[%c0_41, %c2_42, %c0_43, %c0_44] : memref<1x4x8x64xf32, #tpu.memory_space<vmem>>, vector<1x1x8x64xf32>
    %89 = vector.shape_cast %88 : vector<1x1x8x64xf32> to vector<8x64xf32>
    %90 = vector.shape_cast %87 : vector<8x64xf32> to vector<1x1x8x64xf32>
    tpu.vector_store %arg4[%c0_41, %c2_42, %c0_43, %c0_44], %90 {strides = array<i32>} : memref<1x4x8x64xf32, #tpu.memory_space<vmem>>, vector<1x1x8x64xf32>,
    %91 = vector.broadcast %54 : vector<8x1xf32> to vector<8x64xf32>
    %92 = arith.subf %45, %91 : vector<8x64xf32>
    %93 = vector.broadcast %63 : vector<8x1xf32> to vector<8x64xf32>
    %94 = arith.mulf %92, %93 : vector<8x64xf32>
    %cst_45 = arith.constant 0.000000e+00 : f32
    %95 = vector.broadcast %cst_45 : f32 to vector<8x64xf32>
    %96 = arith.maximumf %94, %95 : vector<8x64xf32>
    %c0_46 = arith.constant 0 : index
    %c3_47 = arith.constant 3 : index
    %c0_48 = arith.constant 0 : index
    %c0_49 = arith.constant 0 : index
    %97 = vector.load %arg4[%c0_46, %c3_47, %c0_48, %c0_49] : memref<1x4x8x64xf32, #tpu.memory_space<vmem>>, vector<1x1x8x64xf32>
    %98 = vector.shape_cast %97 : vector<1x1x8x64xf32> to vector<8x64xf32>
    %99 = vector.shape_cast %96 : vector<8x64xf32> to vector<1x1x8x64xf32>
    tpu.vector_store %arg4[%c0_46, %c3_47, %c0_48, %c0_49], %99 {strides = array<i32>} : memref<1x4x8x64xf32, #tpu.memory_space<vmem>>, vector<1x1x8x64xf32>,
    return
  }
  func.func @transform_0(%arg0: i32) -> (i32, i32, i32) {
    %c0_i32 = arith.constant 0 : i32
    %c0_i32_0 = arith.constant 0 : i32
    %c0_i32_1 = arith.constant 0 : i32
    return %arg0, %c0_i32, %c0_i32_0 : i32, i32, i32
  }
  func.func @transform_1(%arg0: i32) -> (i32, i32, i32) {
    %c0_i32 = arith.constant 0 : i32
    %c0_i32_0 = arith.constant 0 : i32
    %c0_i32_1 = arith.constant 0 : i32
    %c0_i32_2 = arith.constant 0 : i32
    return %c0_i32, %c0_i32_0, %c0_i32_1 : i32, i32, i32
  }
  func.func @transform_2(%arg0: i32) -> (i32, i32) {
    %c0_i32 = arith.constant 0 : i32
    %c0_i32_0 = arith.constant 0 : i32
    %c0_i32_1 = arith.constant 0 : i32
    return %c0_i32, %c0_i32_0 : i32, i32
  }
  func.func @transform_3(%arg0: i32) -> (i32, i32, i32, i32) {
    %c0_i32 = arith.constant 0 : i32
    %c0_i32_0 = arith.constant 0 : i32
    %c0_i32_1 = arith.constant 0 : i32
    %c0_i32_2 = arith.constant 0 : i32
    return %arg0, %c0_i32, %c0_i32_0, %c0_i32_1 : i32, i32, i32, i32
  }
}

module attributes {stable_mosaic.version = 11 : i64} {
  func.func @kernel(%arg0: i32, %arg1: memref<1x392x256xbf16, #tpu.memory_space<vmem>>, %arg2: memref<1x392xbf16, #tpu.memory_space<vmem>>, %arg3: memref<1x1xf32, #tpu.memory_space<vmem>>, %arg4: memref<1x1x256xf32, #tpu.memory_space<vmem>>) attributes {dimension_semantics = [#tpu.dimension_semantics<parallel>], iteration_bounds = array<i64: 2>, scalar_prefetch = 0 : i64, scratch_operands = 0 : i64, tpu.core_type = #tpu.core_type<tc>, window_params = [{transform_indices = @transform_0, window_bounds = array<i64: 1, 392, 256>}, {pipeline_mode = #tpu.pipeline_mode<synchronous>, transform_indices = @transform_1, window_bounds = array<i64: 1, 392>}, {pipeline_mode = #tpu.pipeline_mode<synchronous>, transform_indices = @transform_2, window_bounds = array<i64: 1, 1>}, {transform_indices = @transform_3, window_bounds = array<i64: 1, 1, 256>}]} {
    %c0 = arith.constant 0 : index
    %c0_0 = arith.constant 0 : index
    %0 = vector.load %arg2[%c0, %c0_0] : memref<1x392xbf16, #tpu.memory_space<vmem>>, vector<1x392xbf16>
    %c0_1 = arith.constant 0 : index
    %c0_2 = arith.constant 0 : index
    %c0_3 = arith.constant 0 : index
    %1 = vector.load %arg1[%c0_1, %c0_2, %c0_3] : memref<1x392x256xbf16, #tpu.memory_space<vmem>>, vector<1x392x256xbf16>
    %2 = vector.shape_cast %1 : vector<1x392x256xbf16> to vector<392x256xbf16>
    %cst = arith.constant dense<0.000000e+00> : vector<1x256xf32>
    %3 = tpu.matmul %0, %2, %cst {dimension_numbers = #tpu.dot_dimension_numbers<[1], [0], [0], [1], [0, 0, 1, 1], [], []>} : vector<1x392xbf16>, vector<392x256xbf16>, vector<1x256xf32> -> vector<1x256xf32>
    %c0_4 = arith.constant 0 : index
    %c0_5 = arith.constant 0 : index
    %4 = vector.load %arg3[%c0_4, %c0_5] : memref<1x1xf32, #tpu.memory_space<vmem>>, vector<1x1xf32>
    %5 = vector.broadcast %4 : vector<1x1xf32> to vector<1x256xf32>
    %6 = arith.addf %3, %5 : vector<1x256xf32>
    %7 = math.tanh %6 : vector<1x256xf32>
    %c0_6 = arith.constant 0 : index
    %c0_7 = arith.constant 0 : index
    %c0_8 = arith.constant 0 : index
    %8 = vector.load %arg4[%c0_6, %c0_7, %c0_8] : memref<1x1x256xf32, #tpu.memory_space<vmem>>, vector<1x1x256xf32>
    %9 = vector.shape_cast %8 : vector<1x1x256xf32> to vector<1x256xf32>
    %10 = vector.shape_cast %7 : vector<1x256xf32> to vector<1x1x256xf32>
    tpu.vector_store %arg4[%c0_6, %c0_7, %c0_8], %10 {strides = array<i32>} : memref<1x1x256xf32, #tpu.memory_space<vmem>>, vector<1x1x256xf32>,
    return
  }
  func.func @transform_0(%arg0: i32) -> (i32, i32, i32) {
    %c0_i32 = arith.constant 0 : i32
    %c0_i32_0 = arith.constant 0 : i32
    %c0_i32_1 = arith.constant 0 : i32
    return %arg0, %c0_i32, %c0_i32_0 : i32, i32, i32
  }
  func.func @transform_1(%arg0: i32) -> (i32, i32) {
    %c0_i32 = arith.constant 0 : i32
    %c0_i32_0 = arith.constant 0 : i32
    %c0_i32_1 = arith.constant 0 : i32
    return %c0_i32, %c0_i32_0 : i32, i32
  }
  func.func @transform_2(%arg0: i32) -> (i32, i32) {
    %c0_i32 = arith.constant 0 : i32
    %c0_i32_0 = arith.constant 0 : i32
    %c0_i32_1 = arith.constant 0 : i32
    return %c0_i32, %c0_i32_0 : i32, i32
  }
  func.func @transform_3(%arg0: i32) -> (i32, i32, i32) {
    %c0_i32 = arith.constant 0 : i32
    %c0_i32_0 = arith.constant 0 : i32
    %c0_i32_1 = arith.constant 0 : i32
    return %arg0, %c0_i32, %c0_i32_0 : i32, i32, i32
  }
}

</mosaic_0001>

<bundles_post_ra>
// kernel: attention_generator_forward.12
= control target key start
LH: loop header
LB: loop body
LE: loop exit
PB: predicated region body
PF: predicated region fallthrough
CT: control target
= control target key end

     0   :  { %s440_s12 = smov 0   ;;  %s467_s0 = inlined_call_operand.vmem [shape: bf16[2,49,256], index: 0, kind: input, shape index: {}]   ;;  %s468_s1 = inlined_call_operand.vmem [shape: bf16[8,49], index: 1, kind: input, shape index: {}]   ;;  %s469_s2 = inlined_call_operand.vmem [shape: f32[8,1], index: 2, kind: input, shape index: {}]   ;;  %s470_s3 = inlined_call_operand.vmem [shape: f32[2,8,256], index: 3, kind: output, shape index: {}]  }
   0x1 LB: > { %s351_s13 = sadd.s32 4294967295, %s416_s12   ;;  %p355_p0 = scmp.ge.s32.totalorder %s416_s12, 1  ;;  %s416_s12 = sphi %s440_s12, %s13_s12  }
   0x2   : > { %p137_p1 = scmp.lt.s32.totalorder %s416_s12, 3 }
   0x4   : > { %p138_p2 = pnand %p355_p0, %p137_p1 }
   0x5   : > { %p161_p3 = scmp.lt.s32.totalorder (!%p138_p2), %s351_s13, 1 }
   0x6   : > { %141 = sbr.rel (%p138_p2) target bundleno = 435 (0x1b3), region = 32 }
   0xb   : > { %v418_v0 = vmov 0   ;;  %v180_v1 = vld [vmem:[%s469_s2] sm:$0xff]  ;;  %s472_s13 = smov (!%p161_p3, %s351_s13), 1  ;;  %vm225_vm0 = vcmask 1040384   ;;  %vm221_vm1 = vcmask 400384   ;;  %v419_v37 = vmov 256.0  }
   0xc   : > { %405 = vset.pattern.permute.xlu0 %v418_v0  ;;  %s394_s16 = smul.u32 56, %s472_s13  ;;  %v227_v5 = vsel %vm225_vm0, 65535, %v418_v0  ;;  %v172_v28 = vld [vmem:[%s468_s1] sm:$0xf]  ;;  %406 = vrcp.f32 %v419_v37  ;;  %s387_s22 = sshll.u32 %s472_s13, 4 }
   0xd   : > { %183 = vperm.xlu0 %405, %v180_v1   ;;  %s170_s25 = scalar_lea.vmem %s470_s3, %s387_s22 }
   0xe   : > { %s165_s19 = scalar_lea.vmem %s467_s0, %s394_s16 }
   0xf   : > { %v179_v2 = vld [vmem:[%s165_s19 + $0x30] sm:$0x11]  ;;  %v377_v8 = vld [vmem:[%s165_s19 + $0x20] sm:$0xf]  ;;  %v393_v9 = vld [vmem:[%s165_s19 + $0x24] sm:$0xf0] }
  0x10   : > { %v205_v3 = vunpack.c.l.b16 %v179_v2  ;;  %v206_v4 = vunpack.c.h.b16 %v179_v2  ;;  %v392_v10 = vld [vmem:[%s165_s19 + $0x24] sm:$0xf]  ;;  %v379_v11 = vld [vmem:[%s165_s19 + $0x28] sm:$0xf0]  ;;  %v378_v14 = vor.u32 %v393_v9, %v377_v8  ;;  %v369_v16 = vld [vmem:[%s165_s19 + $0x10] sm:$0xf] }
  0x11   : > { %v382_v15 = vor.u32 %v392_v10, %v379_v11  ;;  %v391_v17 = vld [vmem:[%s165_s19 + $0x14] sm:$0xf0]  ;;  %v390_v18 = vld [vmem:[%s165_s19 + $0x14] sm:$0xf]  ;;  %v371_v19 = vld [vmem:[%s165_s19 + $0x18] sm:$0xf0] }
  0x12   : > { %v213_v6 = vpack.c.b16 %v205_v3, %v205_v3  ;;  %v214_v7 = vpack.c.b16 %v206_v4, %v206_v4  ;;  %v370_v20 = vor.u32 %v391_v17, %v369_v16  ;;  %v374_v21 = vor.u32 %v390_v18, %v371_v19  ;;  %v361_v22 = vld [vmem:[%s165_s19] sm:$0xf]  ;;  %v389_v23 = vld [vmem:[%s165_s19 + $0x4] sm:$0xf0]  ;;  %v388_v24 = vld [vmem:[%s165_s19 + $0x4] sm:$0xf]  ;;  %v407_v38 = vpop.eup %406 }
  0x13   : > { %v363_v25 = vld [vmem:[%s165_s19 + $0x8] sm:$0xf0]  ;;  %v362_v26 = vor.u32 %v389_v23, %v361_v22  ;;  %v264_v39 = vmul.f32 256.0, %v407_v38  ;;  %vm268_vm2 = vweird.f32 %v407_v38 }
  0x14   : > { %v229_v12 = vand.u32 %v227_v5, %v213_v6  ;;  %v232_v13 = vand.u32 %v227_v5, %v214_v7  ;;  %v366_v27 = vor.u32 %v388_v24, %v363_v25 }
  0x15   : > { %v265_v40 = vsub.f32 1.0, %v264_v39 }
  0x16   : > { %238 = vmatpush.bf16.msra.mxu0 %v229_v12  ;;  %251 = vmatpush.bf16.msra.mxu1 %v232_v13 }
  0x17   : > { %v266_v41 = vmul.f32 %v407_v38, %v265_v40 }
  0x19   : > { %v267_v42 = vadd.f32 %v407_v38, %v266_v41 }
  0x1a   : > { %239 = vmatpush.bf16.msra.mxu0 %v378_v14  ;;  %252 = vmatpush.bf16.msra.mxu1 %v382_v15 }
  0x1b   : > { %v269_v43 = vsel %vm268_vm2, %v407_v38, %v267_v42 }
  0x1e   : > { %240 = vmatpush.bf16.msra.mxu0 %v370_v20  ;;  %253 = vmatpush.bf16.msra.mxu1 %v374_v21 }
  0x22   : > { %241 = vmatpush.bf16.msra.mxu0 %v362_v26  ;;  %254 = vmatpush.bf16.msra.mxu1 %v366_v27 }
  0x25   : > { %383 = vmatmul.msk.bf16.vlgmr.msra.gmra.mxu0 %vm221_vm1, %v172_v28  ;;  %384 = vmatmul.msk.bf16.vlgmr.msra.gmra.mxu1 %vm221_vm1, %v172_v28 }
  0x7f   : > { %v184_v29 = vpop.permute.xlu0 %183 }
  0xa2   : > { %v243_v30 = vpop.f32.mrf.mxu0  ;;  %v256_v31 = vpop.f32.mrf.mxu1 }
  0xa3   : > { %v244_v32 = vadd.f32 %v243_v30, %v184_v29  ;;  %v257_v33 = vadd.f32 %v256_v31, %v184_v29 }
  0xa5   : > { %v260_v34 = vadd.f32 %v257_v33, %v244_v32 }
  0xa7   : > { %261 = vadd.xlane.f32.xlu0 %v260_v34 }
  0xaa   : > { %v245_v35 = vpop.f32.mrf.mxu0  ;;  %v258_v36 = vpop.f32.mrf.mxu1 }
 0x11a   : > { %v262_v44 = vpop.xlane.xlu0 %261 }
 0x11b   : > { %v270_v45 = vmul.f32 %v269_v43, %v262_v44 }
 0x11d   : > { %v271_v46 = vsub.f32 %v244_v32, %v270_v45  ;;  %v272_v47 = vsub.f32 %v257_v33, %v270_v45 }
 0x11f   : > { %v273_v48 = vmul.f32 %v271_v46, %v271_v46  ;;  %v274_v49 = vmul.f32 %v272_v47, %v272_v47 }
 0x121   : > { %v275_v50 = vadd.f32 %v274_v49, %v273_v48 }
 0x123   : > { %276 = vadd.xlane.f32.xlu1 %v275_v50 }
 0x196   : > { %v277_v51 = vpop.xlane.xlu1 %276 }
 0x197   : > { %v278_v52 = vmul.f32 %v277_v51, %v269_v43 }
 0x199   : > { %v279_v53 = vadd.f32 1e-05, %v278_v52 }
 0x19b   : > { %408 = vrsqrt.f32 %v279_v53  ;;  %vm286_vm4 = vweird.f32 %v279_v53 }
 0x1a1   : > { %v409_v54 = vpop.eup %408 }
 0x1a2   : > { %v281_v55 = vmul.f32 %v409_v54, %v279_v53  ;;  %vm287_vm3 = vweird.f32 %v409_v54 }
 0x1a3   : > { %vm288_vm5 = vmor %vm286_vm4, %vm287_vm3 }
 0x1a4   : > { %v282_v56 = vmul.f32 %v409_v54, %v281_v55 }
 0x1a6   : > { %v283_v57 = vmul.f32 0.5, %v282_v56 }
 0x1a8   : > { %v284_v58 = vsub.f32 1.5, %v283_v57 }
 0x1aa   : > { %v285_v59 = vmul.f32 %v409_v54, %v284_v58 }
 0x1ac   : > { %v289_v60 = vsel %vm288_vm5, %v409_v54, %v285_v59 }
 0x1ad   : > { %v290_v61 = vmul.f32 %v289_v60, %v271_v46  ;;  %v291_v62 = vmul.f32 %v289_v60, %v272_v47 }
 0x1af   : > { %v292_v63 = vmax.f32 %v290_v61, 0.0  ;;  %v293_v0 = vmax.f32 %v291_v62, 0.0 }
 0x1b1   : > { %294 = vst [vmem:[%s170_s25] sm:$0xff] %v292_v63 }
 0x1b2   : > { %295 = vst [vmem:[%s170_s25 + $0x8] sm:$0xff] %v293_v0 }
 0x1b3 PF: > { %s13_s12 = sadd.s32 1, %s416_s12  }
 0x1b4   : > { %p10_p4 = scmp.ge.s32.totalorder %s13_s12, 4  }
 0x1b6   :  { %12 = sbr.rel (!%p10_p4) target bundleno = 1 (0x1), region = 62 }

// kernel: attention_generator_forward.13
= control target key start
LH: loop header
LB: loop body
LE: loop exit
PB: predicated region body
PF: predicated region fallthrough
CT: control target
= control target key end

     0   :  { %s445_s12 = smov 0   ;;  %s481_s0 = inlined_call_operand.vmem [shape: bf16[2,72,64], index: 0, kind: input, shape index: {}]   ;;  %s482_s1 = inlined_call_operand.vmem [shape: bf16[16,72], index: 1, kind: input, shape index: {}]   ;;  %s483_s2 = inlined_call_operand.vmem [shape: f32[16,1], index: 2, kind: input, shape index: {}]   ;;  %s484_s3 = inlined_call_operand.vmem [shape: f32[2,16,64], index: 3, kind: output, shape index: {}]  }
   0x1 LB: > { %s360_s13 = sadd.s32 4294967295, %s421_s12   ;;  %p364_p0 = scmp.ge.s32.totalorder %s421_s12, 1  ;;  %s421_s12 = sphi %s445_s12, %s13_s12  }
   0x2   : > { %p137_p1 = scmp.lt.s32.totalorder %s421_s12, 3 }
   0x4   : > { %p138_p2 = pnand %p364_p0, %p137_p1 }
   0x5   : > { %p161_p3 = scmp.lt.s32.totalorder (!%p138_p2), %s360_s13, 1 }
   0x6   : > { %141 = sbr.rel (%p138_p2) target bundleno = 443 (0x1bb), region = 32 }
   0xb   : > { %v183_v0 = vld [vmem:[%s483_s2] sm:$0xff]  ;;  %v423_v1 = vmov 0   ;;  %s486_s13 = smov (!%p161_p3, %s360_s13), 1  ;;  %v184_v3 = vld [vmem:[%s483_s2 + $0x8] sm:$0xff]  ;;  %vm231_vm0 = vcmask 1043456   ;;  %vm227_vm1 = vcmask 588800  }
   0xc   : > { %408 = vset.pattern.permute.xlu0 %v423_v1  ;;  %s397_s16 = smul.u32 36, %s486_s13  ;;  %v392_v11 = vld [vmem:[%s482_s1] sm:$0xff]  ;;  %vm249_vm2 = vcmask 523264   ;;  %v424_v20 = vmov 64.0   ;;  %s391_s24 = sshll.u32 %s486_s13, 4 }
   0xd   : > { %187 = vperm.xlu0 %408, %v183_v0   ;;  %409 = vrcp.f32 %v424_v20  ;;  %s170_s27 = scalar_lea.vmem %s484_s3, %s391_s24 }
   0xe   : > { %s165_s19 = scalar_lea.vmem %s481_s0, %s397_s16 }
   0xf   : > { %v182_v2 = vld [vmem:[%s165_s19 + $0x20] sm:$0xf]  ;;  %v396_v7 = vld [vmem:[%s165_s19 + $0x18] sm:$0xff]  ;;  %v395_v8 = vld [vmem:[%s165_s19 + $0x10] sm:$0xff] }
  0x10   : > { %v217_v4 = vunpack.c.l.b16 %v182_v2  ;;  %v394_v9 = vld [vmem:[%s165_s19 + $0x8] sm:$0xff]  ;;  %v393_v10 = vld [vmem:[%s165_s19] sm:$0xff] }
  0x12   : > { %v222_v5 = vpack.c.b16 %v217_v4, %v217_v4 }
  0x13   : > { %v410_v21 = vpop.eup %409 }
  0x14   : > { %v233_v6 = vsel %vm231_vm0, %v222_v5, 0  ;;  %v257_v22 = vmul.f32 64.0, %v410_v21  ;;  %vm261_vm3 = vweird.f32 %v410_v21 }
  0x15   : > { %192 = vperm.xlu0 %408, %v184_v3   ;;  %238 = vmatpush.bf16.msra.mxu0 %v233_v6 }
  0x16   : > { %v258_v23 = vsub.f32 1.0, %v257_v22 }
  0x18   : > { %v259_v24 = vmul.f32 %v410_v21, %v258_v23 }
  0x19   : > { %239 = vmatpush.bf16.msra.mxu0 %v396_v7 }
  0x1a   : > { %v260_v25 = vadd.f32 %v410_v21, %v259_v24 }
  0x1c   : > { %v262_v26 = vsel %vm261_vm3, %v410_v21, %v260_v25 }
  0x1d   : > { %240 = vmatpush.bf16.msra.mxu0 %v395_v8 }
  0x21   : > { %241 = vmatpush.bf16.msra.mxu0 %v394_v9 }
  0x25   : > { %242 = vmatpush.bf16.msra.mxu0 %v393_v10 }
  0x28   : > { %388 = vmatmul.msk.bf16.vlgmr.msra.gmra.mxu0 %vm227_vm1, %v392_v11 }
  0x7f   : > { %v188_v12 = vpop.permute.xlu0 %187 }
  0x87   : > { %v193_v16 = vpop.permute.xlu0 %192 }
  0xa5   : > { %v244_v13 = vpop.f32.mrf.mxu0 }
  0xa6   : > { %v245_v14 = vadd.f32 %v244_v13, %v188_v12 }
  0xa8   : > { %v250_v15 = vsel %vm249_vm2, %v245_v14, 0.0 }
  0xa9   : > { %251 = vadd.xlane.f32.xlu1 %v250_v15 }
  0xad   : > { %v246_v17 = vpop.f32.mrf.mxu0 }
  0xae   : > { %v247_v18 = vadd.f32 %v246_v17, %v193_v16 }
  0xb0   : > { %v253_v19 = vsel %vm249_vm2, %v247_v18, 0.0 }
  0xb1   : > { %254 = vadd.xlane.f32.xlu1 %v253_v19 }
 0x11c   : > { %v252_v27 = vpop.xlane.xlu1 %251 }
 0x11d   : > { %v263_v28 = vmul.f32 %v262_v26, %v252_v27 }
 0x11f   : > { %v265_v29 = vsub.f32 %v245_v14, %v263_v28 }
 0x121   : > { %v267_v30 = vmul.f32 %v265_v29, %v265_v29 }
 0x123   : > { %v269_v31 = vsel %vm249_vm2, %v267_v30, 0.0 }
 0x124   : > { %270 = vadd.xlane.f32.xlu2 %v269_v31  ;;  %v255_v32 = vpop.xlane.xlu1 %254 }
 0x125   : > { %v264_v33 = vmul.f32 %v262_v26, %v255_v32 }
 0x127   : > { %v266_v34 = vsub.f32 %v247_v18, %v264_v33 }
 0x129   : > { %v268_v35 = vmul.f32 %v266_v34, %v266_v34 }
 0x12b   : > { %v272_v36 = vsel %vm249_vm2, %v268_v35, 0.0 }
 0x12c   : > { %273 = vadd.xlane.f32.xlu2 %v272_v36 }
 0x197   : > { %v271_v37 = vpop.xlane.xlu2 %270 }
 0x198   : > { %v275_v38 = vmul.f32 %v271_v37, %v262_v26 }
 0x19a   : > { %v277_v39 = vadd.f32 1e-05, %v275_v38 }
 0x19c   : > { %411 = vrsqrt.f32 %v277_v39  ;;  %vm285_vm5 = vweird.f32 %v277_v39 }
 0x19f   : > { %v274_v40 = vpop.xlane.xlu2 %273 }
 0x1a0   : > { %v276_v41 = vmul.f32 %v274_v40, %v262_v26 }
 0x1a2   : > { %v412_v42 = vpop.eup %411  ;;  %v278_v43 = vadd.f32 1e-05, %v276_v41 }
 0x1a3   : > { %v280_v44 = vmul.f32 %v412_v42, %v277_v39  ;;  %vm286_vm4 = vweird.f32 %v412_v42 }
 0x1a4   : > { %413 = vrsqrt.f32 %v278_v43  ;;  %vm287_vm6 = vmor %vm285_vm5, %vm286_vm4  ;;  %vm295_vm8 = vweird.f32 %v278_v43 }
 0x1a5   : > { %v281_v45 = vmul.f32 %v412_v42, %v280_v44 }
 0x1a7   : > { %v282_v46 = vmul.f32 0.5, %v281_v45 }
 0x1a9   : > { %v283_v47 = vsub.f32 1.5, %v282_v46 }
 0x1aa   : > { %v414_v48 = vpop.eup %413 }
 0x1ab   : > { %v284_v49 = vmul.f32 %v412_v42, %v283_v47  ;;  %v290_v50 = vmul.f32 %v414_v48, %v278_v43  ;;  %vm296_vm7 = vweird.f32 %v414_v48 }
 0x1ac   : > { %vm297_vm9 = vmor %vm295_vm8, %vm296_vm7 }
 0x1ad   : > { %v288_v51 = vsel %vm287_vm6, %v412_v42, %v284_v49  ;;  %v291_v52 = vmul.f32 %v414_v48, %v290_v50 }
 0x1ae   : > { %v299_v53 = vmul.f32 %v288_v51, %v265_v29 }
 0x1af   : > { %v292_v54 = vmul.f32 0.5, %v291_v52 }
 0x1b0   : > { %v301_v55 = vmax.f32 %v299_v53, 0.0 }
 0x1b1   : > { %v293_v56 = vsub.f32 1.5, %v292_v54 }
 0x1b2   : > { %303 = vst.msk [vmem:[%s170_s27] sm:$0xff] %vm249_vm2, %v301_v55 }
 0x1b3   : > { %v294_v57 = vmul.f32 %v414_v48, %v293_v56 }
 0x1b5   : > { %v298_v58 = vsel %vm297_vm9, %v414_v48, %v294_v57 }
 0x1b6   : > { %v300_v59 = vmul.f32 %v298_v58, %v266_v34 }
 0x1b8   : > { %v302_v60 = vmax.f32 %v300_v59, 0.0 }
 0x1ba   : > { %304 = vst.msk [vmem:[%s170_s27 + $0x8] sm:$0xff] %vm249_vm2, %v302_v60 }
 0x1bb PF: > { %s13_s12 = sadd.s32 1, %s421_s12  }
 0x1bc   : > { %p10_p4 = scmp.ge.s32.totalorder %s13_s12, 4  }
 0x1be   :  { %12 = sbr.rel (!%p10_p4) target bundleno = 1 (0x1), region = 62 }

// kernel: attention_generator_forward.14
= control target key start
LH: loop header
LB: loop body
LE: loop exit
PB: predicated region body
PF: predicated region fallthrough
CT: control target
= control target key end

     0   :  { %s632_s12 = smov 0   ;;  %s730_s0 = inlined_call_operand.vmem [shape: bf16[2,144,16], index: 0, kind: input, shape index: {}]   ;;  %s731_s1 = inlined_call_operand.vmem [shape: bf16[32,144], index: 1, kind: input, shape index: {}]   ;;  %s732_s2 = inlined_call_operand.vmem [shape: f32[32,1], index: 2, kind: input, shape index: {}]   ;;  %s733_s3 = inlined_call_operand.vmem [shape: f32[2,32,16], index: 3, kind: output, shape index: {}]  }
   0x1 LB: > { %s493_s13 = sadd.s32 4294967295, %s608_s12   ;;  %p497_p0 = scmp.ge.s32.totalorder %s608_s12, 1  ;;  %s608_s12 = sphi %s632_s12, %s13_s12  }
   0x2   : > { %p137_p1 = scmp.lt.s32.totalorder %s608_s12, 3 }
   0x4   : > { %p138_p2 = pnand %p497_p0, %p137_p1 }
   0x5   : > { %p161_p3 = scmp.lt.s32.totalorder (!%p138_p2), %s493_s13, 1 }
   0x6   : > { %141 = sbr.rel (%p138_p2) target bundleno = 468 (0x1d4), region = 32 }
   0xb   : > { %s735_s13 = smov (!%p161_p3, %s493_s13), 1  ;;  %v558_v1 = vld [vmem:[%s731_s1 + $0x4] sm:$0xf]  ;;  %v505_v2 = vld [vmem:[%s731_s1 + $0x8] sm:$0xf0]  ;;  %v610_v6 = vmov 0  }
   0xc   : > { %s579_s14 = smul.u32 72, %s735_s13  ;;  %v508_v5 = vor.u32 %v558_v1, %v505_v2  ;;  %590 = vset.pattern.permute.xlu0 %v610_v6  ;;  %v194_v7 = vld [vmem:[%s732_s2] sm:$0xff]  ;;  %vm290_vm0 = vcmask 130048   ;;  %591 = vset.pattern.permute.xlu1 %v610_v6  ;;  %v196_v8 = vld [vmem:[%s732_s2 + $0x10] sm:$0xff]  ;;  %v195_v10 = vld [vmem:[%s732_s2 + $0x8] sm:$0xff]  ;;  %v611_v50 = vmov 16.0  }
   0xd   : > { %200 = vperm.xlu0 %590, %v194_v7   ;;  %210 = vperm.xlu1 %591, %v196_v8   ;;  %v197_v12 = vld [vmem:[%s732_s2 + $0x18] sm:$0xff]  ;;  %v560_v14 = vld [vmem:[%s731_s1 + $0x14] sm:$0xf]  ;;  %v503_v19 = vld [vmem:[%s731_s1] sm:$0xf]  ;;  %592 = vrcp.f32 %v611_v50 }
   0xe   : > { %s646_s17 = scalar_lea.vmem %s730_s0, %s579_s14  ;;  %v513_v15 = vld [vmem:[%s731_s1 + $0x18] sm:$0xf0]  ;;  %v559_v20 = vld [vmem:[%s731_s1 + $0x4] sm:$0xf0]  ;;  %v511_v22 = vld [vmem:[%s731_s1 + $0x10] sm:$0xf] }
   0xf   : > { %v569_v0 = vld [vmem:[%s646_s17 + $0x38] sm:$0xff]  ;;  %v570_v3 = vld [vmem:[%s646_s17 + $0x40] sm:$0xff]  ;;  %v568_v4 = vld [vmem:[%s646_s17 + $0x30] sm:$0xff]  ;;  %v516_v17 = vor.u32 %v560_v14, %v513_v15  ;;  %v504_v24 = vor.u32 %v559_v20, %v503_v19 }
  0x10   : > { %297 = vmatpush.bf16.msra.mxu0 %v569_v0  ;;  %571 = vmatpush.bf16.msra.mxu2 %v569_v0  ;;  %v567_v9 = vld [vmem:[%s646_s17 + $0x28] sm:$0xff]  ;;  %v566_v11 = vld [vmem:[%s646_s17 + $0x20] sm:$0xff]  ;;  %v565_v13 = vld [vmem:[%s646_s17 + $0x18] sm:$0xff] }
  0x11   : > { %323 = vmatpush.bf16.msra.mxu1 %v570_v3  ;;  %v564_v16 = vld [vmem:[%s646_s17 + $0x10] sm:$0xff]  ;;  %v563_v18 = vld [vmem:[%s646_s17 + $0x8] sm:$0xff]  ;;  %v562_v21 = vld [vmem:[%s646_s17] sm:$0xff]  ;;  %s557_s17 = sshll.u32 %s735_s13, 5 }
  0x12   : > { %v561_v23 = vld [vmem:[%s731_s1 + $0x14] sm:$0xf0]  ;;  %s715_s20 = scalar_lea.vmem %s733_s3, %s557_s17 }
  0x13   : > { %v512_v25 = vor.u32 %v561_v23, %v511_v22  ;;  %v593_v51 = vpop.eup %592 }
  0x14   : > { %298 = vmatpush.bf16.msra.mxu0 %v568_v4  ;;  %572 = vmatpush.bf16.msra.mxu2 %v568_v4  ;;  %v348_v52 = vmul.f32 16.0, %v593_v51  ;;  %vm352_vm1 = vweird.f32 %v593_v51 }
  0x15   : > { %553 = vmatmul.msk.bf16.vlgmr.msra.gmra.mxu1 %vm290_vm0, %v508_v5  ;;  %205 = vperm.xlu0 %590, %v195_v10  }
  0x16   : > { %215 = vperm.xlu1 %591, %v197_v12   ;;  %v349_v53 = vsub.f32 1.0, %v348_v52 }
  0x18   : > { %299 = vmatpush.bf16.msra.mxu0 %v567_v9  ;;  %573 = vmatpush.bf16.msra.mxu2 %v567_v9  ;;  %v350_v54 = vmul.f32 %v593_v51, %v349_v53 }
  0x1a   : > { %v351_v55 = vadd.f32 %v593_v51, %v350_v54 }
  0x1c   : > { %300 = vmatpush.bf16.msra.mxu0 %v566_v11  ;;  %574 = vmatpush.bf16.msra.mxu2 %v566_v11  ;;  %v353_v56 = vsel %vm352_vm1, %v593_v51, %v351_v55 }
  0x20   : > { %301 = vmatpush.bf16.msra.mxu0 %v565_v13  ;;  %575 = vmatpush.bf16.msra.mxu2 %v565_v13 }
  0x24   : > { %302 = vmatpush.bf16.msra.mxu0 %v564_v16  ;;  %576 = vmatpush.bf16.msra.mxu2 %v564_v16 }
  0x25   : > { %554 = vmatmul.msk.bf16.gmra.mxu1 %vm290_vm0, %v516_v17 }
  0x28   : > { %303 = vmatpush.bf16.msra.mxu0 %v563_v18  ;;  %577 = vmatpush.bf16.msra.mxu2 %v563_v18 }
  0x2c   : > { %304 = vmatpush.bf16.msra.mxu0 %v562_v21  ;;  %578 = vmatpush.bf16.msra.mxu2 %v562_v21 }
  0x2f   : > { %305 = vmatmul.bf16.vlgmr.msra.gmra.mxu0 %v504_v24  ;;  %310 = vmatmul.bf16.vlgmr.msra.gmra.mxu2 %v512_v25 }
  0x7f   : > { %v201_v28 = vpop.permute.xlu0 %200  ;;  %v211_v32 = vpop.permute.xlu1 %210 }
  0x87   : > { %v206_v37 = vpop.permute.xlu0 %205 }
  0x88   : > { %v216_v44 = vpop.permute.xlu1 %215 }
  0x92   : > { %v325_v26 = vpop.f32.mrf.mxu1 }
  0x9a   : > { %v327_v27 = vpop.f32.mrf.mxu1 }
  0xa2   : > { %v330_v34 = vpop.f32.mrf.mxu1 }
  0xaa   : > { %v332_v47 = vpop.f32.mrf.mxu1 }
  0xac   : > { %v306_v29 = vpop.f32.mrf.mxu0 }
  0xad   : > { %v307_v30 = vadd.f32 %v306_v29, %v201_v28 }
  0xaf   : > { %v326_v31 = vadd.f32 %v325_v26, %v307_v30 }
  0xb1   : > { %v335_v33 = vsel %vm290_vm0, %v326_v31, 0.0 }
  0xb2   : > { %v311_v35 = vpop.f32.mrf.mxu2  ;;  %336 = vadd.xlane.f32.xlu2 %v335_v33 }
  0xb3   : > { %v312_v36 = vadd.f32 %v311_v35, %v211_v32 }
  0xb4   : > { %v308_v38 = vpop.f32.mrf.mxu0 }
  0xb5   : > { %v309_v39 = vadd.f32 %v308_v38, %v206_v37  ;;  %v331_v40 = vadd.f32 %v330_v34, %v312_v36 }
  0xb7   : > { %v341_v41 = vsel %vm290_vm0, %v331_v40, 0.0  ;;  %v328_v42 = vadd.f32 %v327_v27, %v309_v39 }
  0xb8   : > { %342 = vadd.xlane.f32.xlu0 %v341_v41 }
  0xb9   : > { %v338_v43 = vsel %vm290_vm0, %v328_v42, 0.0 }
  0xba   : > { %v313_v45 = vpop.f32.mrf.mxu2  ;;  %339 = vadd.xlane.f32.xlu2 %v338_v43 }
  0xbb   : > { %v314_v46 = vadd.f32 %v313_v45, %v216_v44 }
  0xbd   : > { %v333_v48 = vadd.f32 %v332_v47, %v314_v46 }
  0xbf   : > { %v344_v49 = vsel %vm290_vm0, %v333_v48, 0.0 }
  0xc0   : > { %345 = vadd.xlane.f32.xlu1 %v344_v49 }
 0x125   : > { %v337_v57 = vpop.xlane.xlu2 %336 }
 0x126   : > { %v354_v58 = vmul.f32 %v353_v56, %v337_v57 }
 0x128   : > { %v358_v59 = vsub.f32 %v326_v31, %v354_v58 }
 0x12a   : > { %v362_v60 = vmul.f32 %v358_v59, %v358_v59 }
 0x12b   : > { %v343_v61 = vpop.xlane.xlu0 %342 }
 0x12c   : > { %v356_v62 = vmul.f32 %v353_v56, %v343_v61  ;;  %v366_v63 = vsel %vm290_vm0, %v362_v60, 0.0 }
 0x12d   : > { %367 = vadd.xlane.f32.xlu2 %v366_v63  ;;  %v340_v0 = vpop.xlane.xlu2 %339 }
 0x12e   : > { %v360_v1 = vsub.f32 %v331_v40, %v356_v62  ;;  %v355_v2 = vmul.f32 %v353_v56, %v340_v0 }
 0x130   : > { %v364_v3 = vmul.f32 %v360_v1, %v360_v1  ;;  %v700_v4 = vsub.f32 %v328_v42, %v355_v2 }
 0x132   : > { %v372_v5 = vsel %vm290_vm0, %v364_v3, 0.0  ;;  %v363_v8 = vmul.f32 %v700_v4, %v700_v4 }
 0x133   : > { %v346_v6 = vpop.xlane.xlu1 %345 }
 0x134   : > { %v357_v7 = vmul.f32 %v353_v56, %v346_v6  ;;  %v369_v10 = vsel %vm290_vm0, %v363_v8, 0.0 }
 0x135   : > { %373 = vadd.xlane.f32.xlu2 %v372_v5 }
 0x136   : > { %v705_v9 = vsub.f32 %v333_v48, %v357_v7 }
 0x138   : > { %v365_v11 = vmul.f32 %v705_v9, %v705_v9 }
 0x13a   : > { %v375_v12 = vsel %vm290_vm0, %v365_v11, 0.0 }
 0x13d   : > { %370 = vadd.xlane.f32.xlu2 %v369_v10 }
 0x145   : > { %376 = vadd.xlane.f32.xlu2 %v375_v12 }
 0x1a0   : > { %v368_v13 = vpop.xlane.xlu2 %367 }
 0x1a1   : > { %v378_v14 = vmul.f32 %v368_v13, %v353_v56 }
 0x1a3   : > { %v382_v15 = vadd.f32 1e-05, %v378_v14 }
 0x1a5   : > { %594 = vrsqrt.f32 %v382_v15  ;;  %vm392_vm3 = vweird.f32 %v382_v15 }
 0x1a8   : > { %v374_v16 = vpop.xlane.xlu2 %373 }
 0x1a9   : > { %v380_v17 = vmul.f32 %v374_v16, %v353_v56 }
 0x1ab   : > { %v595_v18 = vpop.eup %594  ;;  %v384_v19 = vadd.f32 1e-05, %v380_v17 }
 0x1ac   : > { %v387_v20 = vmul.f32 %v595_v18, %v382_v15  ;;  %vm393_vm2 = vweird.f32 %v595_v18 }
 0x1ad   : > { %596 = vrsqrt.f32 %v384_v19  ;;  %vm394_vm4 = vmor %vm392_vm3, %vm393_vm2  ;;  %vm412_vm6 = vweird.f32 %v384_v19 }
 0x1ae   : > { %v388_v21 = vmul.f32 %v595_v18, %v387_v20 }
 0x1b0   : > { %v389_v22 = vmul.f32 0.5, %v388_v21  ;;  %v371_v23 = vpop.xlane.xlu2 %370 }
 0x1b1   : > { %v379_v24 = vmul.f32 %v371_v23, %v353_v56 }
 0x1b2   : > { %v390_v25 = vsub.f32 1.5, %v389_v22 }
 0x1b3   : > { %v597_v26 = vpop.eup %596  ;;  %v383_v27 = vadd.f32 1e-05, %v379_v24 }
 0x1b4   : > { %v391_v28 = vmul.f32 %v595_v18, %v390_v25  ;;  %v407_v29 = vmul.f32 %v597_v26, %v384_v19  ;;  %vm413_vm5 = vweird.f32 %v597_v26 }
 0x1b5   : > { %598 = vrsqrt.f32 %v383_v27  ;;  %vm414_vm7 = vmor %vm412_vm6, %vm413_vm5  ;;  %vm402_vm9 = vweird.f32 %v383_v27 }
 0x1b6   : > { %v395_v30 = vsel %vm394_vm4, %v595_v18, %v391_v28  ;;  %v408_v31 = vmul.f32 %v597_v26, %v407_v29 }
 0x1b7   : > { %v426_v32 = vmul.f32 %v395_v30, %v358_v59 }
 0x1b8   : > { %v409_v33 = vmul.f32 0.5, %v408_v31  ;;  %v377_v34 = vpop.xlane.xlu2 %376 }
 0x1b9   : > { %v430_v35 = vmax.f32 %v426_v32, 0.0  ;;  %v381_v36 = vmul.f32 %v377_v34, %v353_v56 }
 0x1ba   : > { %v410_v37 = vsub.f32 1.5, %v409_v33 }
 0x1bb   : > { %v599_v38 = vpop.eup %598  ;;  %434 = vst.msk [vmem:[%s715_s20] sm:$0xff] %vm290_vm0, %v430_v35  ;;  %v385_v39 = vadd.f32 1e-05, %v381_v36 }
 0x1bc   : > { %v411_v40 = vmul.f32 %v597_v26, %v410_v37  ;;  %v397_v41 = vmul.f32 %v599_v38, %v383_v27  ;;  %vm403_vm8 = vweird.f32 %v599_v38 }
 0x1bd   : > { %600 = vrsqrt.f32 %v385_v39  ;;  %vm404_vm10 = vmor %vm402_vm9, %vm403_vm8  ;;  %vm422_vm12 = vweird.f32 %v385_v39 }
 0x1be   : > { %v415_v42 = vsel %vm414_vm7, %v597_v26, %v411_v40  ;;  %v398_v43 = vmul.f32 %v599_v38, %v397_v41 }
 0x1bf   : > { %v428_v44 = vmul.f32 %v415_v42, %v360_v1 }
 0x1c0   : > { %v399_v45 = vmul.f32 0.5, %v398_v43 }
 0x1c1   : > { %v432_v46 = vmax.f32 %v428_v44, 0.0 }
 0x1c2   : > { %v400_v47 = vsub.f32 1.5, %v399_v45 }
 0x1c3   : > { %v601_v48 = vpop.eup %600  ;;  %436 = vst.msk [vmem:[%s715_s20 + $0x10] sm:$0xff] %vm290_vm0, %v432_v46 }
 0x1c4   : > { %v401_v49 = vmul.f32 %v599_v38, %v400_v47  ;;  %v417_v50 = vmul.f32 %v601_v48, %v385_v39  ;;  %vm423_vm11 = vweird.f32 %v601_v48 }
 0x1c5   : > { %vm424_vm13 = vmor %vm422_vm12, %vm423_vm11 }
 0x1c6   : > { %v405_v51 = vsel %vm404_vm10, %v599_v38, %v401_v49  ;;  %v418_v52 = vmul.f32 %v601_v48, %v417_v50 }
 0x1c7   : > { %v427_v53 = vmul.f32 %v405_v51, %v700_v4 }
 0x1c8   : > { %v419_v54 = vmul.f32 0.5, %v418_v52 }
 0x1c9   : > { %v431_v55 = vmax.f32 %v427_v53, 0.0 }
 0x1ca   : > { %v420_v56 = vsub.f32 1.5, %v419_v54 }
 0x1cb   : > { %435 = vst.msk [vmem:[%s715_s20 + $0x8] sm:$0xff] %vm290_vm0, %v431_v55 }
 0x1cc   : > { %v421_v57 = vmul.f32 %v601_v48, %v420_v56 }
 0x1ce   : > { %v425_v58 = vsel %vm424_vm13, %v601_v48, %v421_v57 }
 0x1cf   : > { %v429_v59 = vmul.f32 %v425_v58, %v705_v9 }
 0x1d1   : > { %v433_v60 = vmax.f32 %v429_v59, 0.0 }
 0x1d3   : > { %437 = vst.msk [vmem:[%s715_s20 + $0x18] sm:$0xff] %vm290_vm0, %v433_v60 }
 0x1d4 PF: > { %s13_s12 = sadd.s32 1, %s608_s12  }
 0x1d5   : > { %p10_p4 = scmp.ge.s32.totalorder %s13_s12, 4  }
 0x1d7   :  { %12 = sbr.rel (!%p10_p4) target bundleno = 1 (0x1), region = 62 }

// kernel: attention_generator_forward.15
= control target key start
LH: loop header
LB: loop body
LE: loop exit
PB: predicated region body
PF: predicated region fallthrough
CT: control target
= control target key end

     0   :  { %s795_s12 = smov 0   ;;  %s914_s0 = inlined_call_operand.vmem [shape: bf16[2,288,16], index: 0, kind: input, shape index: {}]   ;;  %s915_s1 = inlined_call_operand.vmem [shape: bf16[32,288], index: 1, kind: input, shape index: {}]   ;;  %s916_s2 = inlined_call_operand.vmem [shape: f32[32,1], index: 2, kind: input, shape index: {}]   ;;  %s917_s3 = inlined_call_operand.vmem [shape: f32[2,32,16], index: 3, kind: output, shape index: {}]  }
   0x1 LB: > { %s601_s13 = sadd.s32 4294967295, %s771_s12   ;;  %p605_p0 = scmp.ge.s32.totalorder %s771_s12, 1  ;;  %s771_s12 = sphi %s795_s12, %s13_s12  }
   0x2   : > { %p137_p1 = scmp.lt.s32.totalorder %s771_s12, 3 }
   0x4   : > { %p138_p2 = pnand %p605_p0, %p137_p1 }
   0x5   : > { %p161_p3 = scmp.lt.s32.totalorder (!%p138_p2), %s601_s13, 1 }
   0x6   : > { %141 = sbr.rel (%p138_p2) target bundleno = 470 (0x1d6), region = 32 }
   0xb   : > { %s919_s13 = smov (!%p161_p3, %s601_s13), 1  ;;  %v773_v5 = vmov 0   ;;  %v619_v7 = vld [vmem:[%s915_s1 + $0x8] sm:$0xf]  ;;  %v712_v8 = vld [vmem:[%s915_s1 + $0x10] sm:$0xf0] }
   0xc   : > { %s742_s14 = smul.u32 144, %s919_s13  ;;  %753 = vset.pattern.permute.xlu0 %v773_v5  ;;  %754 = vset.pattern.permute.xlu1 %v773_v5  ;;  %v216_v11 = vld [vmem:[%s916_s2] sm:$0xff]  ;;  %v620_v12 = vor.u32 %v712_v8, %v619_v7  ;;  %vm378_vm0 = vcmask 261120   ;;  %v217_v15 = vld [vmem:[%s916_s2 + $0x8] sm:$0xff]  ;;  %v218_v18 = vld [vmem:[%s916_s2 + $0x10] sm:$0xff]  ;;  %vm442_vm1 = vcmask 130048  }
   0xd   : > { %222 = vperm.xlu0 %753, %v216_v11   ;;  %232 = vperm.xlu1 %754, %v218_v18   ;;  %v631_v21 = vld [vmem:[%s915_s1 + $0x20] sm:$0xf]  ;;  %v715_v22 = vld [vmem:[%s915_s1 + $0x28] sm:$0xf0]  ;;  %v710_v28 = vld [vmem:[%s915_s1 + $0x4] sm:$0xf] }
   0xe   : > { %s809_s17 = scalar_lea.vmem %s914_s0, %s742_s14  ;;  %v632_v25 = vor.u32 %v715_v22, %v631_v21  ;;  %v611_v26 = vld [vmem:[%s915_s1] sm:$0xf]  ;;  %v711_v27 = vld [vmem:[%s915_s1 + $0x8] sm:$0xf0]  ;;  %v219_v29 = vld [vmem:[%s916_s2 + $0x18] sm:$0xff]  ;;  %s709_s25 = sshll.u32 %s919_s13, 5 }
   0xf   : > { %v723_v0 = vld [vmem:[%s809_s17 + $0x38] sm:$0xff]  ;;  %v722_v2 = vld [vmem:[%s809_s17 + $0x30] sm:$0xff]  ;;  %v733_v4 = vld [vmem:[%s809_s17 + $0x88] sm:$0xff]  ;;  %v612_v35 = vor.u32 %v711_v27, %v611_v26  ;;  %s899_s28 = scalar_lea.vmem %s917_s3, %s709_s25 }
  0x10   : > { %v731_v1 = vld [vmem:[%s809_s17 + $0x78] sm:$0xff]  ;;  %385 = vmatpush.bf16.msra.mxu0 %v723_v0  ;;  %v730_v3 = vld [vmem:[%s809_s17 + $0x70] sm:$0xff]  ;;  %734 = vmatpush.bf16.msra.mxu3 %v723_v0  ;;  %v732_v6 = vld [vmem:[%s809_s17 + $0x80] sm:$0xff] }
  0x11   : > { %404 = vmatpush.bf16.msra.mxu1 %v731_v1  ;;  %429 = vmatpush.bf16.msra.mxu2 %v733_v4  ;;  %v721_v9 = vld [vmem:[%s809_s17 + $0x28] sm:$0xff]  ;;  %v720_v13 = vld [vmem:[%s809_s17 + $0x20] sm:$0xff]  ;;  %v719_v16 = vld [vmem:[%s809_s17 + $0x18] sm:$0xff] }
  0x12   : > { %v729_v10 = vld [vmem:[%s809_s17 + $0x68] sm:$0xff]  ;;  %v728_v14 = vld [vmem:[%s809_s17 + $0x60] sm:$0xff]  ;;  %v727_v17 = vld [vmem:[%s809_s17 + $0x58] sm:$0xff] }
  0x13   : > { %v718_v19 = vld [vmem:[%s809_s17 + $0x10] sm:$0xff]  ;;  %v717_v23 = vld [vmem:[%s809_s17 + $0x8] sm:$0xff]  ;;  %v716_v30 = vld [vmem:[%s809_s17] sm:$0xff] }
  0x14   : > { %386 = vmatpush.bf16.msra.mxu0 %v722_v2  ;;  %735 = vmatpush.bf16.msra.mxu3 %v722_v2  ;;  %v726_v20 = vld [vmem:[%s809_s17 + $0x50] sm:$0xff]  ;;  %v725_v24 = vld [vmem:[%s809_s17 + $0x48] sm:$0xff]  ;;  %v724_v31 = vld [vmem:[%s809_s17 + $0x40] sm:$0xff] }
  0x15   : > { %405 = vmatpush.bf16.msra.mxu1 %v730_v3  ;;  %430 = vmatpush.bf16.msra.mxu2 %v732_v6  ;;  %v613_v32 = vld [vmem:[%s915_s1 + $0xc] sm:$0xf0]  ;;  %v623_v33 = vld [vmem:[%s915_s1 + $0x18] sm:$0xf]  ;;  %v714_v34 = vld [vmem:[%s915_s1 + $0x20] sm:$0xf0] }
  0x16   : > { %227 = vperm.xlu0 %753, %v217_v15   ;;  %237 = vperm.xlu1 %754, %v219_v29   ;;  %v616_v36 = vor.u32 %v710_v28, %v613_v32  ;;  %v624_v37 = vor.u32 %v714_v34, %v623_v33  ;;  %v713_v38 = vld [vmem:[%s915_s1 + $0x1c] sm:$0xf]  ;;  %v625_v39 = vld [vmem:[%s915_s1 + $0x24] sm:$0xf0] }
  0x17   : > { %v628_v40 = vor.u32 %v713_v38, %v625_v39 }
  0x18   : > { %387 = vmatpush.bf16.msra.mxu0 %v721_v9  ;;  %736 = vmatpush.bf16.msra.mxu3 %v721_v9  ;;  %v774_v9 = vmov 16.0  }
  0x19   : > { %406 = vmatpush.bf16.msra.mxu1 %v729_v10  ;;  %705 = vmatmul.msk.bf16.vlgmr.msra.gmra.mxu2 %vm378_vm0, %v620_v12  ;;  %755 = vrcp.f32 %v774_v9 }
  0x1c   : > { %388 = vmatpush.bf16.msra.mxu0 %v720_v13  ;;  %737 = vmatpush.bf16.msra.mxu3 %v720_v13 }
  0x1d   : > { %407 = vmatpush.bf16.msra.mxu1 %v728_v14 }
  0x1f   : > { %v756_v10 = vpop.eup %755 }
  0x20   : > { %389 = vmatpush.bf16.msra.mxu0 %v719_v16  ;;  %738 = vmatpush.bf16.msra.mxu3 %v719_v16  ;;  %v456_v11 = vmul.f32 16.0, %v756_v10  ;;  %vm460_vm2 = vweird.f32 %v756_v10 }
  0x21   : > { %408 = vmatpush.bf16.msra.mxu1 %v727_v17 }
  0x22   : > { %v457_v12 = vsub.f32 1.0, %v456_v11 }
  0x24   : > { %390 = vmatpush.bf16.msra.mxu0 %v718_v19  ;;  %739 = vmatpush.bf16.msra.mxu3 %v718_v19  ;;  %v458_v13 = vmul.f32 %v756_v10, %v457_v12 }
  0x25   : > { %409 = vmatpush.bf16.msra.mxu1 %v726_v20 }
  0x26   : > { %v459_v14 = vadd.f32 %v756_v10, %v458_v13 }
  0x28   : > { %391 = vmatpush.bf16.msra.mxu0 %v717_v23  ;;  %740 = vmatpush.bf16.msra.mxu3 %v717_v23  ;;  %v461_v15 = vsel %vm460_vm2, %v756_v10, %v459_v14 }
  0x29   : > { %410 = vmatpush.bf16.msra.mxu1 %v725_v24  ;;  %706 = vmatmul.msk.bf16.gmra.mxu2 %vm378_vm0, %v632_v25 }
  0x2c   : > { %392 = vmatpush.bf16.msra.mxu0 %v716_v30  ;;  %741 = vmatpush.bf16.msra.mxu3 %v716_v30 }
  0x2d   : > { %411 = vmatpush.bf16.msra.mxu1 %v724_v31 }
  0x2f   : > { %393 = vmatmul.bf16.vlgmr.msra.gmra.mxu0 %v612_v35  ;;  %398 = vmatmul.bf16.vlgmr.msra.gmra.mxu3 %v624_v37 }
  0x30   : > { %412 = vmatmul.bf16.vlgmr.msra.gmra.mxu1 %v616_v36 }
  0x40   : > { %417 = vmatmul.bf16.gmra.mxu1 %v628_v40 }
  0x7f   : > { %v223_v42 = vpop.permute.xlu0 %222  ;;  %v233_v54 = vpop.permute.xlu1 %232 }
  0x88   : > { %v228_v49 = vpop.permute.xlu0 %227  ;;  %v238_v0 = vpop.permute.xlu1 %237 }
  0x9c   : > { %v432_v41 = vpop.f32.mrf.mxu2 }
  0xa4   : > { %v434_v48 = vpop.f32.mrf.mxu2 }
  0xac   : > { %v394_v43 = vpop.f32.mrf.mxu0  ;;  %v437_v60 = vpop.f32.mrf.mxu2 }
  0xad   : > { %v413_v44 = vpop.f32.mrf.mxu1  ;;  %v395_v45 = vadd.f32 %v394_v43, %v223_v42 }
  0xaf   : > { %v414_v46 = vadd.f32 %v413_v44, %v395_v45 }
  0xb1   : > { %v433_v47 = vadd.f32 %v432_v41, %v414_v46 }
  0xb2   : > { %v399_v55 = vpop.f32.mrf.mxu3 }
  0xb3   : > { %v443_v50 = vsel %vm442_vm1, %v433_v47, 0.0  ;;  %v400_v57 = vadd.f32 %v399_v55, %v233_v54 }
  0xb4   : > { %v396_v51 = vpop.f32.mrf.mxu0  ;;  %444 = vadd.xlane.f32.xlu2 %v443_v50  ;;  %v439_v6 = vpop.f32.mrf.mxu2 }
  0xb5   : > { %v415_v52 = vpop.f32.mrf.mxu1  ;;  %v397_v53 = vadd.f32 %v396_v51, %v228_v49 }
  0xb7   : > { %v416_v56 = vadd.f32 %v415_v52, %v397_v53 }
  0xb9   : > { %v435_v58 = vadd.f32 %v434_v48, %v416_v56 }
  0xba   : > { %v401_v1 = vpop.f32.mrf.mxu3 }
  0xbb   : > { %v446_v59 = vsel %vm442_vm1, %v435_v58, 0.0  ;;  %v402_v3 = vadd.f32 %v401_v1, %v238_v0 }
  0xbc   : > { %447 = vadd.xlane.f32.xlu2 %v446_v59 }
  0xbd   : > { %v418_v61 = vpop.f32.mrf.mxu1 }
  0xbe   : > { %v419_v62 = vadd.f32 %v418_v61, %v400_v57 }
  0xc0   : > { %v438_v63 = vadd.f32 %v437_v60, %v419_v62 }
  0xc2   : > { %v449_v2 = vsel %vm442_vm1, %v438_v63, 0.0 }
  0xc3   : > { %450 = vadd.xlane.f32.xlu0 %v449_v2 }
  0xc5   : > { %v420_v4 = vpop.f32.mrf.mxu1 }
  0xc6   : > { %v421_v5 = vadd.f32 %v420_v4, %v402_v3 }
  0xc8   : > { %v440_v7 = vadd.f32 %v439_v6, %v421_v5 }
  0xca   : > { %v452_v8 = vsel %vm442_vm1, %v440_v7, 0.0 }
  0xcb   : > { %453 = vadd.xlane.f32.xlu1 %v452_v8 }
 0x127   : > { %v445_v16 = vpop.xlane.xlu2 %444 }
 0x128   : > { %v462_v17 = vmul.f32 %v461_v15, %v445_v16 }
 0x12a   : > { %v466_v18 = vsub.f32 %v433_v47, %v462_v17 }
 0x12c   : > { %v470_v19 = vmul.f32 %v466_v18, %v466_v18 }
 0x12e   : > { %v474_v20 = vsel %vm442_vm1, %v470_v19, 0.0 }
 0x12f   : > { %475 = vadd.xlane.f32.xlu2 %v474_v20  ;;  %v448_v21 = vpop.xlane.xlu2 %447 }
 0x130   : > { %v463_v22 = vmul.f32 %v461_v15, %v448_v21 }
 0x132   : > { %v467_v23 = vsub.f32 %v435_v58, %v463_v22 }
 0x134   : > { %v471_v24 = vmul.f32 %v467_v23, %v467_v23 }
 0x136   : > { %v451_v25 = vpop.xlane.xlu0 %450  ;;  %v477_v27 = vsel %vm442_vm1, %v471_v24, 0.0 }
 0x137   : > { %v464_v26 = vmul.f32 %v461_v15, %v451_v25  ;;  %478 = vadd.xlane.f32.xlu2 %v477_v27 }
 0x139   : > { %v885_v28 = vsub.f32 %v438_v63, %v464_v26 }
 0x13b   : > { %v472_v29 = vmul.f32 %v885_v28, %v885_v28 }
 0x13d   : > { %v480_v32 = vsel %vm442_vm1, %v472_v29, 0.0 }
 0x13e   : > { %v454_v30 = vpop.xlane.xlu1 %453 }
 0x13f   : > { %v465_v31 = vmul.f32 %v461_v15, %v454_v30  ;;  %481 = vadd.xlane.f32.xlu2 %v480_v32 }
 0x141   : > { %v890_v33 = vsub.f32 %v440_v7, %v465_v31 }
 0x143   : > { %v473_v34 = vmul.f32 %v890_v33, %v890_v33 }
 0x145   : > { %v483_v35 = vsel %vm442_vm1, %v473_v34, 0.0 }
 0x147   : > { %484 = vadd.xlane.f32.xlu2 %v483_v35 }
 0x1a2   : > { %v476_v36 = vpop.xlane.xlu2 %475 }
 0x1a3   : > { %v486_v37 = vmul.f32 %v476_v36, %v461_v15 }
 0x1a5   : > { %v490_v38 = vadd.f32 1e-05, %v486_v37 }
 0x1a7   : > { %757 = vrsqrt.f32 %v490_v38  ;;  %vm500_vm4 = vweird.f32 %v490_v38 }
 0x1aa   : > { %v479_v39 = vpop.xlane.xlu2 %478 }
 0x1ab   : > { %v487_v40 = vmul.f32 %v479_v39, %v461_v15 }
 0x1ad   : > { %v758_v41 = vpop.eup %757  ;;  %v491_v42 = vadd.f32 1e-05, %v487_v40 }
 0x1ae   : > { %v495_v43 = vmul.f32 %v758_v41, %v490_v38  ;;  %vm501_vm3 = vweird.f32 %v758_v41 }
 0x1af   : > { %759 = vrsqrt.f32 %v491_v42  ;;  %vm502_vm5 = vmor %vm500_vm4, %vm501_vm3  ;;  %vm510_vm7 = vweird.f32 %v491_v42 }
 0x1b0   : > { %v496_v44 = vmul.f32 %v758_v41, %v495_v43 }
 0x1b2   : > { %v497_v45 = vmul.f32 0.5, %v496_v44  ;;  %v482_v46 = vpop.xlane.xlu2 %481 }
 0x1b3   : > { %v488_v47 = vmul.f32 %v482_v46, %v461_v15 }
 0x1b4   : > { %v498_v48 = vsub.f32 1.5, %v497_v45 }
 0x1b5   : > { %v760_v49 = vpop.eup %759  ;;  %v492_v50 = vadd.f32 1e-05, %v488_v47 }
 0x1b6   : > { %v499_v51 = vmul.f32 %v758_v41, %v498_v48  ;;  %v505_v52 = vmul.f32 %v760_v49, %v491_v42  ;;  %vm511_vm6 = vweird.f32 %v760_v49 }
 0x1b7   : > { %761 = vrsqrt.f32 %v492_v50  ;;  %vm512_vm8 = vmor %vm510_vm7, %vm511_vm6  ;;  %vm520_vm10 = vweird.f32 %v492_v50 }
 0x1b8   : > { %v503_v53 = vsel %vm502_vm5, %v758_v41, %v499_v51  ;;  %v506_v54 = vmul.f32 %v760_v49, %v505_v52 }
 0x1b9   : > { %v534_v55 = vmul.f32 %v503_v53, %v466_v18 }
 0x1ba   : > { %v507_v56 = vmul.f32 0.5, %v506_v54  ;;  %v485_v57 = vpop.xlane.xlu2 %484 }
 0x1bb   : > { %v538_v58 = vmax.f32 %v534_v55, 0.0  ;;  %v489_v59 = vmul.f32 %v485_v57, %v461_v15 }
 0x1bc   : > { %v508_v60 = vsub.f32 1.5, %v507_v56 }
 0x1bd   : > { %v762_v61 = vpop.eup %761  ;;  %542 = vst.msk [vmem:[%s899_s28] sm:$0xff] %vm442_vm1, %v538_v58  ;;  %v493_v62 = vadd.f32 1e-05, %v489_v59 }
 0x1be   : > { %v509_v63 = vmul.f32 %v760_v49, %v508_v60  ;;  %v515_v0 = vmul.f32 %v762_v61, %v492_v50  ;;  %vm521_vm9 = vweird.f32 %v762_v61 }
 0x1bf   : > { %763 = vrsqrt.f32 %v493_v62  ;;  %vm522_vm11 = vmor %vm520_vm10, %vm521_vm9  ;;  %vm530_vm13 = vweird.f32 %v493_v62 }
 0x1c0   : > { %v513_v1 = vsel %vm512_vm8, %v760_v49, %v509_v63  ;;  %v516_v2 = vmul.f32 %v762_v61, %v515_v0 }
 0x1c1   : > { %v535_v3 = vmul.f32 %v513_v1, %v467_v23 }
 0x1c2   : > { %v517_v4 = vmul.f32 0.5, %v516_v2 }
 0x1c3   : > { %v539_v5 = vmax.f32 %v535_v3, 0.0 }
 0x1c4   : > { %v518_v6 = vsub.f32 1.5, %v517_v4 }
 0x1c5   : > { %v764_v7 = vpop.eup %763  ;;  %543 = vst.msk [vmem:[%s899_s28 + $0x8] sm:$0xff] %vm442_vm1, %v539_v5 }
 0x1c6   : > { %v519_v8 = vmul.f32 %v762_v61, %v518_v6  ;;  %v525_v9 = vmul.f32 %v764_v7, %v493_v62  ;;  %vm531_vm12 = vweird.f32 %v764_v7 }
 0x1c7   : > { %vm532_vm14 = vmor %vm530_vm13, %vm531_vm12 }
 0x1c8   : > { %v523_v10 = vsel %vm522_vm11, %v762_v61, %v519_v8  ;;  %v526_v11 = vmul.f32 %v764_v7, %v525_v9 }
 0x1c9   : > { %v536_v12 = vmul.f32 %v523_v10, %v885_v28 }
 0x1ca   : > { %v527_v13 = vmul.f32 0.5, %v526_v11 }
 0x1cb   : > { %v540_v14 = vmax.f32 %v536_v12, 0.0 }
 0x1cc   : > { %v528_v15 = vsub.f32 1.5, %v527_v13 }
 0x1cd   : > { %544 = vst.msk [vmem:[%s899_s28 + $0x10] sm:$0xff] %vm442_vm1, %v540_v14 }
 0x1ce   : > { %v529_v16 = vmul.f32 %v764_v7, %v528_v15 }
 0x1d0   : > { %v533_v17 = vsel %vm532_vm14, %v764_v7, %v529_v16 }
 0x1d1   : > { %v537_v18 = vmul.f32 %v533_v17, %v890_v33 }
 0x1d3   : > { %v541_v19 = vmax.f32 %v537_v18, 0.0 }
 0x1d5   : > { %545 = vst.msk [vmem:[%s899_s28 + $0x18] sm:$0xff] %vm442_vm1, %v541_v19 }
 0x1d6 PF: > { %s13_s12 = sadd.s32 1, %s771_s12  }
 0x1d7   : > { %p10_p4 = scmp.ge.s32.totalorder %s13_s12, 4  }
 0x1d9   :  { %12 = sbr.rel (!%p10_p4) target bundleno = 1 (0x1), region = 62 }

// kernel: attention_generator_forward.16
= control target key start
LH: loop header
LB: loop body
LE: loop exit
PB: predicated region body
PF: predicated region fallthrough
CT: control target
= control target key end

     0   :  { %s866_s15 = smov 0   ;;  %s999_s0 = inlined_call_operand.vmem [shape: bf16[2,288,16], index: 0, kind: input, shape index: {}]   ;;  %s1000_s1 = inlined_call_operand.vmem [shape: bf16[32,288], index: 1, kind: input, shape index: {}]   ;;  %s1001_s2 = inlined_call_operand.vmem [shape: f32[32,1], index: 2, kind: input, shape index: {}]   ;;  %s1002_s3 = inlined_call_operand.vmem [shape: f32[2,32,16], index: 3, kind: input, shape index: {}]   ;;  %s1003_s4 = inlined_call_operand.vmem [shape: f32[2,32,16], index: 4, kind: output, shape index: {}]  }
   0x1 LB: > { %s664_s16 = sadd.s32 4294967295, %s837_s15   ;;  %p668_p0 = scmp.ge.s32.totalorder %s837_s15, 1  ;;  %s837_s15 = sphi %s866_s15, %s14_s15  }
   0x2   : > { %p172_p1 = scmp.lt.s32.totalorder %s837_s15, 3 }
   0x4   : > { %p173_p2 = pnand %p668_p0, %p172_p1 }
   0x5   : > { %p203_p3 = scmp.lt.s32.totalorder (!%p173_p2), %s664_s16, 1 }
   0x6   : > { %176 = sbr.rel (%p173_p2) target bundleno = 470 (0x1d6), region = 36 }
   0xb   : > { %s1005_s16 = smov (!%p203_p3, %s664_s16), 1  ;;  %v839_v5 = vmov 0   ;;  %v684_v7 = vld [vmem:[%s1000_s1 + $0x8] sm:$0xf]  ;;  %v778_v8 = vld [vmem:[%s1000_s1 + $0x10] sm:$0xf0] }
   0xc   : > { %s808_s17 = smul.u32 144, %s1005_s16  ;;  %819 = vset.pattern.permute.xlu0 %v839_v5  ;;  %820 = vset.pattern.permute.xlu1 %v839_v5  ;;  %v263_v11 = vld [vmem:[%s1001_s2] sm:$0xff]  ;;  %v685_v12 = vor.u32 %v778_v8, %v684_v7  ;;  %vm425_vm0 = vcmask 261120   ;;  %v264_v15 = vld [vmem:[%s1001_s2 + $0x8] sm:$0xff]  ;;  %v265_v18 = vld [vmem:[%s1001_s2 + $0x10] sm:$0xff]  ;;  %vm489_vm1 = vcmask 130048  }
   0xd   : > { %269 = vperm.xlu0 %819, %v263_v11   ;;  %279 = vperm.xlu1 %820, %v265_v18   ;;  %v696_v21 = vld [vmem:[%s1000_s1 + $0x20] sm:$0xf]  ;;  %v781_v22 = vld [vmem:[%s1000_s1 + $0x28] sm:$0xf0]  ;;  %v776_v28 = vld [vmem:[%s1000_s1 + $0x4] sm:$0xf] }
   0xe   : > { %s880_s20 = scalar_lea.vmem %s999_s0, %s808_s17  ;;  %v697_v25 = vor.u32 %v781_v22, %v696_v21  ;;  %v676_v26 = vld [vmem:[%s1000_s1] sm:$0xf]  ;;  %v777_v27 = vld [vmem:[%s1000_s1 + $0x8] sm:$0xf0]  ;;  %v266_v29 = vld [vmem:[%s1001_s2 + $0x18] sm:$0xff]  ;;  %s774_s29 = sshll.u32 %s1005_s16, 5 }
   0xf   : > { %v789_v0 = vld [vmem:[%s880_s20 + $0x38] sm:$0xff]  ;;  %v788_v2 = vld [vmem:[%s880_s20 + $0x30] sm:$0xff]  ;;  %v799_v4 = vld [vmem:[%s880_s20 + $0x88] sm:$0xff]  ;;  %v677_v35 = vor.u32 %v777_v27, %v676_v26  ;;  %s974_s6 = scalar_lea.vmem %s1002_s3, %s774_s29  ;;  %s980_s8 = scalar_lea.vmem %s1003_s4, %s774_s29 }
  0x10   : > { %v797_v1 = vld [vmem:[%s880_s20 + $0x78] sm:$0xff]  ;;  %432 = vmatpush.bf16.msra.mxu0 %v789_v0  ;;  %v796_v3 = vld [vmem:[%s880_s20 + $0x70] sm:$0xff]  ;;  %800 = vmatpush.bf16.msra.mxu3 %v789_v0  ;;  %v798_v6 = vld [vmem:[%s880_s20 + $0x80] sm:$0xff] }
  0x11   : > { %451 = vmatpush.bf16.msra.mxu1 %v797_v1  ;;  %476 = vmatpush.bf16.msra.mxu2 %v799_v4  ;;  %v787_v9 = vld [vmem:[%s880_s20 + $0x28] sm:$0xff]  ;;  %v786_v13 = vld [vmem:[%s880_s20 + $0x20] sm:$0xff]  ;;  %v785_v16 = vld [vmem:[%s880_s20 + $0x18] sm:$0xff] }
  0x12   : > { %v795_v10 = vld [vmem:[%s880_s20 + $0x68] sm:$0xff]  ;;  %v794_v14 = vld [vmem:[%s880_s20 + $0x60] sm:$0xff]  ;;  %v793_v17 = vld [vmem:[%s880_s20 + $0x58] sm:$0xff] }
  0x13   : > { %v784_v19 = vld [vmem:[%s880_s20 + $0x10] sm:$0xff]  ;;  %v783_v23 = vld [vmem:[%s880_s20 + $0x8] sm:$0xff]  ;;  %v782_v30 = vld [vmem:[%s880_s20] sm:$0xff] }
  0x14   : > { %433 = vmatpush.bf16.msra.mxu0 %v788_v2  ;;  %801 = vmatpush.bf16.msra.mxu3 %v788_v2  ;;  %v792_v20 = vld [vmem:[%s880_s20 + $0x50] sm:$0xff]  ;;  %v791_v24 = vld [vmem:[%s880_s20 + $0x48] sm:$0xff]  ;;  %v790_v31 = vld [vmem:[%s880_s20 + $0x40] sm:$0xff] }
  0x15   : > { %452 = vmatpush.bf16.msra.mxu1 %v796_v3  ;;  %477 = vmatpush.bf16.msra.mxu2 %v798_v6  ;;  %v678_v32 = vld [vmem:[%s1000_s1 + $0xc] sm:$0xf0]  ;;  %v688_v33 = vld [vmem:[%s1000_s1 + $0x18] sm:$0xf]  ;;  %v780_v34 = vld [vmem:[%s1000_s1 + $0x20] sm:$0xf0] }
  0x16   : > { %274 = vperm.xlu0 %819, %v264_v15   ;;  %284 = vperm.xlu1 %820, %v266_v29   ;;  %v681_v36 = vor.u32 %v776_v28, %v678_v32  ;;  %v689_v37 = vor.u32 %v780_v34, %v688_v33  ;;  %v779_v38 = vld [vmem:[%s1000_s1 + $0x1c] sm:$0xf]  ;;  %v690_v39 = vld [vmem:[%s1000_s1 + $0x24] sm:$0xf0] }
  0x17   : > { %v693_v40 = vor.u32 %v779_v38, %v690_v39 }
  0x18   : > { %434 = vmatpush.bf16.msra.mxu0 %v787_v9  ;;  %802 = vmatpush.bf16.msra.mxu3 %v787_v9  ;;  %v840_v9 = vmov 16.0  }
  0x19   : > { %453 = vmatpush.bf16.msra.mxu1 %v795_v10  ;;  %770 = vmatmul.msk.bf16.vlgmr.msra.gmra.mxu2 %vm425_vm0, %v685_v12  ;;  %821 = vrcp.f32 %v840_v9 }
  0x1c   : > { %435 = vmatpush.bf16.msra.mxu0 %v786_v13  ;;  %803 = vmatpush.bf16.msra.mxu3 %v786_v13 }
  0x1d   : > { %454 = vmatpush.bf16.msra.mxu1 %v794_v14 }
  0x1f   : > { %v822_v10 = vpop.eup %821 }
  0x20   : > { %436 = vmatpush.bf16.msra.mxu0 %v785_v16  ;;  %804 = vmatpush.bf16.msra.mxu3 %v785_v16  ;;  %v503_v11 = vmul.f32 16.0, %v822_v10  ;;  %vm507_vm2 = vweird.f32 %v822_v10 }
  0x21   : > { %455 = vmatpush.bf16.msra.mxu1 %v793_v17 }
  0x22   : > { %v504_v12 = vsub.f32 1.0, %v503_v11 }
  0x24   : > { %437 = vmatpush.bf16.msra.mxu0 %v784_v19  ;;  %805 = vmatpush.bf16.msra.mxu3 %v784_v19  ;;  %v505_v13 = vmul.f32 %v822_v10, %v504_v12  ;;  %v587_v12 = vld [vmem:[%s974_s6 + $0x10] sm:$0xff] }
  0x25   : > { %456 = vmatpush.bf16.msra.mxu1 %v792_v20 }
  0x26   : > { %v506_v14 = vadd.f32 %v822_v10, %v505_v13 }
  0x28   : > { %438 = vmatpush.bf16.msra.mxu0 %v783_v23  ;;  %806 = vmatpush.bf16.msra.mxu3 %v783_v23  ;;  %v508_v15 = vsel %vm507_vm2, %v822_v10, %v506_v14 }
  0x29   : > { %457 = vmatpush.bf16.msra.mxu1 %v791_v24  ;;  %771 = vmatmul.msk.bf16.gmra.mxu2 %vm425_vm0, %v697_v25 }
  0x2c   : > { %439 = vmatpush.bf16.msra.mxu0 %v782_v30  ;;  %807 = vmatpush.bf16.msra.mxu3 %v782_v30 }
  0x2d   : > { %458 = vmatpush.bf16.msra.mxu1 %v790_v31 }
  0x2f   : > { %440 = vmatmul.bf16.vlgmr.msra.gmra.mxu0 %v677_v35  ;;  %445 = vmatmul.bf16.vlgmr.msra.gmra.mxu3 %v689_v37 }
  0x30   : > { %459 = vmatmul.bf16.vlgmr.msra.gmra.mxu1 %v681_v36 }
  0x40   : > { %464 = vmatmul.bf16.gmra.mxu1 %v693_v40 }
  0x7f   : > { %v270_v42 = vpop.permute.xlu0 %269  ;;  %v280_v54 = vpop.permute.xlu1 %279 }
  0x88   : > { %v275_v49 = vpop.permute.xlu0 %274  ;;  %v285_v0 = vpop.permute.xlu1 %284 }
  0x9c   : > { %v479_v41 = vpop.f32.mrf.mxu2 }
  0xa4   : > { %v481_v48 = vpop.f32.mrf.mxu2 }
  0xac   : > { %v441_v43 = vpop.f32.mrf.mxu0  ;;  %v484_v60 = vpop.f32.mrf.mxu2 }
  0xad   : > { %v460_v44 = vpop.f32.mrf.mxu1  ;;  %v442_v45 = vadd.f32 %v441_v43, %v270_v42 }
  0xaf   : > { %v461_v46 = vadd.f32 %v460_v44, %v442_v45 }
  0xb1   : > { %v480_v47 = vadd.f32 %v479_v41, %v461_v46 }
  0xb2   : > { %v446_v55 = vpop.f32.mrf.mxu3 }
  0xb3   : > { %v490_v50 = vsel %vm489_vm1, %v480_v47, 0.0  ;;  %v447_v57 = vadd.f32 %v446_v55, %v280_v54 }
  0xb4   : > { %v443_v51 = vpop.f32.mrf.mxu0  ;;  %491 = vadd.xlane.f32.xlu2 %v490_v50  ;;  %v486_v6 = vpop.f32.mrf.mxu2 }
  0xb5   : > { %v462_v52 = vpop.f32.mrf.mxu1  ;;  %v444_v53 = vadd.f32 %v443_v51, %v275_v49 }
  0xb7   : > { %v463_v56 = vadd.f32 %v462_v52, %v444_v53  ;;  %v585_v53 = vld [vmem:[%s974_s6] sm:$0xff] }
  0xb9   : > { %v482_v58 = vadd.f32 %v481_v48, %v463_v56 }
  0xba   : > { %v448_v1 = vpop.f32.mrf.mxu3 }
  0xbb   : > { %v493_v59 = vsel %vm489_vm1, %v482_v58, 0.0  ;;  %v449_v3 = vadd.f32 %v448_v1, %v285_v0 }
  0xbc   : > { %494 = vadd.xlane.f32.xlu2 %v493_v59 }
  0xbd   : > { %v465_v61 = vpop.f32.mrf.mxu1 }
  0xbe   : > { %v466_v62 = vadd.f32 %v465_v61, %v447_v57 }
  0xc0   : > { %v485_v63 = vadd.f32 %v484_v60, %v466_v62 }
  0xc2   : > { %v496_v2 = vsel %vm489_vm1, %v485_v63, 0.0 }
  0xc3   : > { %497 = vadd.xlane.f32.xlu0 %v496_v2  ;;  %v586_v2 = vld [vmem:[%s974_s6 + $0x8] sm:$0xff] }
  0xc5   : > { %v467_v4 = vpop.f32.mrf.mxu1 }
  0xc6   : > { %v468_v5 = vadd.f32 %v467_v4, %v449_v3 }
  0xc8   : > { %v487_v7 = vadd.f32 %v486_v6, %v468_v5 }
  0xca   : > { %v499_v8 = vsel %vm489_vm1, %v487_v7, 0.0 }
  0xcb   : > { %500 = vadd.xlane.f32.xlu1 %v499_v8 }
 0x127   : > { %v492_v16 = vpop.xlane.xlu2 %491 }
 0x128   : > { %v509_v17 = vmul.f32 %v508_v15, %v492_v16 }
 0x12a   : > { %v513_v18 = vsub.f32 %v480_v47, %v509_v17 }
 0x12c   : > { %v517_v19 = vmul.f32 %v513_v18, %v513_v18 }
 0x12e   : > { %v521_v20 = vsel %vm489_vm1, %v517_v19, 0.0 }
 0x12f   : > { %522 = vadd.xlane.f32.xlu2 %v521_v20  ;;  %v495_v21 = vpop.xlane.xlu2 %494  ;;  %v588_v20 = vld [vmem:[%s974_s6 + $0x18] sm:$0xff] }
 0x130   : > { %v510_v22 = vmul.f32 %v508_v15, %v495_v21 }
 0x132   : > { %v955_v23 = vsub.f32 %v482_v58, %v510_v22 }
 0x134   : > { %v518_v24 = vmul.f32 %v955_v23, %v955_v23 }
 0x136   : > { %v498_v25 = vpop.xlane.xlu0 %497  ;;  %v524_v27 = vsel %vm489_vm1, %v518_v24, 0.0 }
 0x137   : > { %v511_v26 = vmul.f32 %v508_v15, %v498_v25  ;;  %525 = vadd.xlane.f32.xlu2 %v524_v27 }
 0x139   : > { %v960_v28 = vsub.f32 %v485_v63, %v511_v26 }
 0x13b   : > { %v519_v29 = vmul.f32 %v960_v28, %v960_v28 }
 0x13d   : > { %v527_v32 = vsel %vm489_vm1, %v519_v29, 0.0 }
 0x13e   : > { %v501_v30 = vpop.xlane.xlu1 %500 }
 0x13f   : > { %v512_v31 = vmul.f32 %v508_v15, %v501_v30  ;;  %528 = vadd.xlane.f32.xlu2 %v527_v32 }
 0x141   : > { %v965_v33 = vsub.f32 %v487_v7, %v512_v31 }
 0x143   : > { %v520_v34 = vmul.f32 %v965_v33, %v965_v33 }
 0x145   : > { %v530_v35 = vsel %vm489_vm1, %v520_v34, 0.0 }
 0x147   : > { %531 = vadd.xlane.f32.xlu2 %v530_v35 }
 0x1a2   : > { %v523_v36 = vpop.xlane.xlu2 %522 }
 0x1a3   : > { %v533_v37 = vmul.f32 %v523_v36, %v508_v15 }
 0x1a5   : > { %v537_v38 = vadd.f32 1e-05, %v533_v37 }
 0x1a7   : > { %823 = vrsqrt.f32 %v537_v38  ;;  %vm547_vm4 = vweird.f32 %v537_v38 }
 0x1aa   : > { %v526_v39 = vpop.xlane.xlu2 %525 }
 0x1ab   : > { %v534_v40 = vmul.f32 %v526_v39, %v508_v15 }
 0x1ad   : > { %v824_v41 = vpop.eup %823  ;;  %v538_v42 = vadd.f32 1e-05, %v534_v40 }
 0x1ae   : > { %v542_v43 = vmul.f32 %v824_v41, %v537_v38  ;;  %vm548_vm3 = vweird.f32 %v824_v41 }
 0x1af   : > { %825 = vrsqrt.f32 %v538_v42  ;;  %vm549_vm5 = vmor %vm547_vm4, %vm548_vm3  ;;  %vm557_vm7 = vweird.f32 %v538_v42 }
 0x1b0   : > { %v543_v44 = vmul.f32 %v824_v41, %v542_v43 }
 0x1b2   : > { %v544_v45 = vmul.f32 0.5, %v543_v44  ;;  %v529_v46 = vpop.xlane.xlu2 %528 }
 0x1b3   : > { %v535_v47 = vmul.f32 %v529_v46, %v508_v15 }
 0x1b4   : > { %v545_v48 = vsub.f32 1.5, %v544_v45 }
 0x1b5   : > { %v826_v49 = vpop.eup %825  ;;  %v539_v50 = vadd.f32 1e-05, %v535_v47 }
 0x1b6   : > { %v546_v51 = vmul.f32 %v824_v41, %v545_v48  ;;  %v552_v52 = vmul.f32 %v826_v49, %v538_v42  ;;  %vm558_vm6 = vweird.f32 %v826_v49 }
 0x1b7   : > { %827 = vrsqrt.f32 %v539_v50  ;;  %vm559_vm8 = vmor %vm557_vm7, %vm558_vm6  ;;  %vm567_vm10 = vweird.f32 %v539_v50 }
 0x1b8   : > { %v550_v54 = vsel %vm549_vm5, %v824_v41, %v546_v51  ;;  %v553_v55 = vmul.f32 %v826_v49, %v552_v52 }
 0x1b9   : > { %v581_v56 = vmul.f32 %v550_v54, %v513_v18 }
 0x1ba   : > { %v554_v57 = vmul.f32 0.5, %v553_v55  ;;  %v532_v58 = vpop.xlane.xlu2 %531 }
 0x1bb   : > { %v589_v59 = vadd.f32 %v585_v53, %v581_v56  ;;  %v536_v60 = vmul.f32 %v532_v58, %v508_v15 }
 0x1bc   : > { %v555_v61 = vsub.f32 1.5, %v554_v57 }
 0x1bd   : > { %v828_v62 = vpop.eup %827  ;;  %593 = vst.msk [vmem:[%s980_s8] sm:$0xff] %vm489_vm1, %v589_v59  ;;  %v540_v63 = vadd.f32 1e-05, %v536_v60 }
 0x1be   : > { %v556_v0 = vmul.f32 %v826_v49, %v555_v61  ;;  %v562_v1 = vmul.f32 %v828_v62, %v539_v50  ;;  %vm568_vm9 = vweird.f32 %v828_v62 }
 0x1bf   : > { %829 = vrsqrt.f32 %v540_v63  ;;  %vm569_vm11 = vmor %vm567_vm10, %vm568_vm9  ;;  %vm577_vm13 = vweird.f32 %v540_v63 }
 0x1c0   : > { %v560_v3 = vsel %vm559_vm8, %v826_v49, %v556_v0  ;;  %v563_v4 = vmul.f32 %v828_v62, %v562_v1 }
 0x1c1   : > { %v582_v5 = vmul.f32 %v560_v3, %v955_v23 }
 0x1c2   : > { %v564_v6 = vmul.f32 0.5, %v563_v4 }
 0x1c3   : > { %v590_v7 = vadd.f32 %v586_v2, %v582_v5 }
 0x1c4   : > { %v565_v8 = vsub.f32 1.5, %v564_v6 }
 0x1c5   : > { %v830_v9 = vpop.eup %829  ;;  %594 = vst.msk [vmem:[%s980_s8 + $0x8] sm:$0xff] %vm489_vm1, %v590_v7 }
 0x1c6   : > { %v566_v10 = vmul.f32 %v828_v62, %v565_v8  ;;  %v572_v11 = vmul.f32 %v830_v9, %v540_v63  ;;  %vm578_vm12 = vweird.f32 %v830_v9 }
 0x1c7   : > { %vm579_vm14 = vmor %vm577_vm13, %vm578_vm12 }
 0x1c8   : > { %v570_v13 = vsel %vm569_vm11, %v828_v62, %v566_v10  ;;  %v573_v14 = vmul.f32 %v830_v9, %v572_v11 }
 0x1c9   : > { %v583_v15 = vmul.f32 %v570_v13, %v960_v28 }
 0x1ca   : > { %v574_v16 = vmul.f32 0.5, %v573_v14 }
 0x1cb   : > { %v591_v17 = vadd.f32 %v587_v12, %v583_v15 }
 0x1cc   : > { %v575_v18 = vsub.f32 1.5, %v574_v16 }
 0x1cd   : > { %595 = vst.msk [vmem:[%s980_s8 + $0x10] sm:$0xff] %vm489_vm1, %v591_v17 }
 0x1ce   : > { %v576_v19 = vmul.f32 %v830_v9, %v575_v18 }
 0x1d0   : > { %v580_v21 = vsel %vm579_vm14, %v830_v9, %v576_v19 }
 0x1d1   : > { %v584_v22 = vmul.f32 %v580_v21, %v965_v33 }
 0x1d3   : > { %v592_v23 = vadd.f32 %v588_v20, %v584_v22 }
 0x1d5   : > { %596 = vst.msk [vmem:[%s980_s8 + $0x18] sm:$0xff] %vm489_vm1, %v592_v23 }
 0x1d6 PF: > { %s14_s15 = sadd.s32 1, %s837_s15  }
 0x1d7   : > { %p11_p4 = scmp.ge.s32.totalorder %s14_s15, 4  }
 0x1d9   :  { %13 = sbr.rel (!%p11_p4) target bundleno = 1 (0x1), region = 69 }

// kernel: attention_generator_forward.19
= control target key start
LH: loop header
LB: loop body
LE: loop exit
PB: predicated region body
PF: predicated region fallthrough
CT: control target
= control target key end

     0   :  { %s459_s24 = smov 0   ;;  %s486_s0 = inlined_call_operand.vmem [shape: f32[2,32,16], index: 0, kind: input, shape index: {}]   ;;  %s487_s1 = inlined_call_operand.vmem [shape: f32[1,32], index: 1, kind: input, shape index: {}]   ;;  %s488_s2 = inlined_call_operand.<no memory space> [shape: f32[1,1], index: 2, kind: input, shape index: {}]   ;;  %s489_s5 = inlined_call_operand.vmem [shape: f32[2,1,16], index: 5, kind: output, shape index: {}]   ;;  %s490_s3 = inlined_call_operand.<no memory space> [shape: f32[1,1], index: 3, kind: input, shape index: {}]   ;;  %s491_s4 = inlined_call_operand.<no memory space> [shape: f32[1,1], index: 4, kind: input, shape index: {}]  }
   0x1   :  { %v10_v0 = vstv %s488_s2  ;;  %v12_v1 = vstv %s490_s3  ;;  %v14_v2 = vstv %s491_s4 }
   0x2   :  { %11 = vst [vmem:[#allocation2] sm:$0x1] %v10_v0 }
   0x3   :  { %13 = vst [vmem:[#allocation3] sm:$0x1] %v12_v1 }
   0x4   :  { %15 = vst [vmem:[#allocation4] sm:$0x1] %v14_v2 }
   0x5 LB: > { %s377_s2 = sadd.s32 4294967295, %s416_s24   ;;  %p381_p0 = scmp.ge.s32.totalorder %s416_s24, 1  ;;  %s416_s24 = sphi %s459_s24, %s21_s24  }
   0x6   : > { %p193_p1 = scmp.lt.s32.totalorder %s416_s24, 3 }
   0x8   : > { %p194_p2 = pnand %p381_p0, %p193_p1 }
   0x9   : > { %p219_p3 = scmp.lt.s32.totalorder (!%p194_p2), %s377_s2, 1 }
   0xa   : > { %197 = sbr.rel (%p194_p2) target bundleno = 453 (0x1c5), region = 40 }
   0xf   : > { %v418_v3 = vmov 0   ;;  %v232_v4 = vld [vmem:[#allocation2] sm:$0x1]  ;;  %s493_s2 = smov (!%p219_p3, %s377_s2), 1  ;;  %vm239_vm0 = vcmask 261120   ;;  %vm263_vm1 = vcmask 122880  }
  0x10   : > { %399 = vset.pattern.permute.xlu0 %v418_v3  ;;  %400 = vset.pattern.permute.xlu1 %v418_v3  ;;  %s388_s3 = sshll.u32 %s493_s2, 5  ;;  %v227_v9 = vld [vmem:[%s487_s1] sm:$0x1]  ;;  %v419_v15 = vmov 16.0   ;;  %v302_v24 = vld [vmem:[#allocation4] sm:$0x1]  ;;  %s226_s6 = scalar_lea.vmem %s489_s5, %s493_s2 }
  0x11   : > { %235 = vperm.xlu0 %399, %v232_v4   ;;  %401 = vset.pattern.permute.xlu2 %v418_v3  ;;  %s223_s26 = scalar_lea.vmem %s486_s0, %s388_s3  ;;  %402 = vrcp.f32 %v419_v15  ;;  %v294_v28 = vld [vmem:[#allocation3] sm:$0x1] }
  0x12   : > { %v231_v5 = vld [vmem:[%s223_s26 + $0x18] sm:$0xff]  ;;  %v230_v6 = vld [vmem:[%s223_s26 + $0x10] sm:$0xff]  ;;  %v229_v7 = vld [vmem:[%s223_s26 + $0x8] sm:$0xff]  ;;  %305 = vperm.xlu2 %401, %v302_v24  }
  0x13   : > { %255 = vmatpush.msra.mxu0 %v231_v5  ;;  %v228_v8 = vld [vmem:[%s223_s26] sm:$0xff] }
  0x15   : > { %256 = vmatpush.msra.mxu0 %v230_v6 }
  0x17   : > { %257 = vmatpush.msra.mxu0 %v229_v7  ;;  %v403_v16 = vpop.eup %402 }
  0x18   : > { %v268_v17 = vmul.f32 16.0, %v403_v16  ;;  %vm272_vm2 = vweird.f32 %v403_v16 }
  0x19   : > { %258 = vmatpush.msra.mxu0 %v228_v8 }
  0x1a   : > { %384 = vmatmul.msk.f32.vlgmr.msra.gmra.mxu0 %vm239_vm0, %v227_v9  ;;  %v269_v18 = vsub.f32 1.0, %v268_v17 }
  0x1c   : > { %v270_v19 = vmul.f32 %v403_v16, %v269_v18 }
  0x1e   : > { %v271_v20 = vadd.f32 %v403_v16, %v270_v19 }
  0x20   : > { %v273_v21 = vsel %vm272_vm2, %v403_v16, %v271_v20 }
  0x6c   : > { %v306_v39 = vpop.permute.xlu2 %305 }
  0x6d   : > { %v308_v44 = vperm.slane %v306_v39, 0 }
  0x83   : > { %v236_v10 = vpop.permute.xlu0 %235 }
  0x84   : > { %v238_v11 = vperm.slane %v236_v10, 0 }
  0x97   : > { %v260_v12 = vpop.f32.mrf.mxu0 }
  0x98   : > { %v261_v13 = vadd.f32 %v260_v12, %v238_v11 }
  0x9a   : > { %v264_v14 = vsel %vm263_vm1, %v261_v13, 0.0 }
  0x9b   : > { %265 = vadd.xlane.f32.xlu0 %v264_v14 }
 0x10e   : > { %v266_v22 = vpop.xlane.xlu0 %265 }
 0x10f   : > { %v274_v23 = vmul.f32 %v273_v21, %v266_v22 }
 0x111   : > { %v275_v25 = vsub.f32 %v261_v13, %v274_v23 }
 0x113   : > { %v276_v26 = vmul.f32 %v275_v25, %v275_v25 }
 0x115   : > { %v277_v27 = vsel %vm263_vm1, %v276_v26, 0.0 }
 0x116   : > { %278 = vadd.xlane.f32.xlu1 %v277_v27 }
 0x12f   : > { %297 = vperm.xlu1 %400, %v294_v28  }
 0x189   : > { %v279_v29 = vpop.xlane.xlu1 %278 }
 0x18a   : > { %v280_v30 = vmul.f32 %v279_v29, %v273_v21 }
 0x18c   : > { %v281_v31 = vadd.f32 1e-05, %v280_v30 }
 0x18e   : > { %404 = vrsqrt.f32 %v281_v31  ;;  %vm288_vm4 = vweird.f32 %v281_v31 }
 0x194   : > { %v405_v32 = vpop.eup %404 }
 0x195   : > { %v283_v33 = vmul.f32 %v405_v32, %v281_v31  ;;  %vm289_vm3 = vweird.f32 %v405_v32 }
 0x196   : > { %vm290_vm5 = vmor %vm288_vm4, %vm289_vm3 }
 0x197   : > { %v284_v34 = vmul.f32 %v405_v32, %v283_v33 }
 0x199   : > { %v285_v35 = vmul.f32 0.5, %v284_v34 }
 0x19b   : > { %v286_v36 = vsub.f32 1.5, %v285_v35 }
 0x19d   : > { %v287_v37 = vmul.f32 %v405_v32, %v286_v36 }
 0x19f   : > { %v291_v38 = vsel %vm290_vm5, %v405_v32, %v287_v37 }
 0x1a0   : > { %v292_v40 = vmul.f32 %v291_v38, %v275_v25 }
 0x1a1   : > { %v298_v41 = vpop.permute.xlu1 %297 }
 0x1a2   : > { %v293_v42 = vmax.f32 %v292_v40, 0.0  ;;  %v300_v43 = vperm.slane %v298_v41, 0 }
 0x1a4   : > { %v301_v45 = vmul.f32 %v300_v43, %v293_v42 }
 0x1a6   : > { %v309_v46 = vadd.f32 %v308_v44, %v301_v45 }
 0x1a8   : > { %v385_v47 = vmul.f32 -1.442695, %v309_v46 }
 0x1aa   : > { %406 = vpow2.f32 %v385_v47 }
 0x1b0   : > { %v407_v48 = vpop.eup %406 }
 0x1b1   : > { %v313_v49 = vadd.f32 1.0, %v407_v48 }
 0x1b3   : > { %408 = vrcp.f32 %v313_v49  ;;  %v325_v53 = vand.u32 2147483648, %v313_v49  ;;  %v323_v55 = vand.u32 2147483647, %v313_v49  ;;  %vm319_vm7 = vweird.f32 %v313_v49 }
 0x1b5   : > { %v326_v57 = vor.u32 1.1754944e-38, %v325_v53  ;;  %vm324_vm9 = vcmp.eq.f32.partialorder %v323_v55, 8.507059e+37 }
 0x1b9   : > { %v409_v50 = vpop.eup %408 }
 0x1ba   : > { %v315_v51 = vmul.f32 %v409_v50, %v313_v49  ;;  %vm320_vm6 = vweird.f32 %v409_v50 }
 0x1bb   : > { %vm321_vm8 = vmor %vm319_vm7, %vm320_vm6 }
 0x1bc   : > { %v316_v52 = vsub.f32 1.0, %v315_v51 }
 0x1be   : > { %v317_v54 = vmul.f32 %v409_v50, %v316_v52 }
 0x1c0   : > { %v318_v56 = vadd.f32 %v409_v50, %v317_v54 }
 0x1c2   : > { %v322_v58 = vsel %vm321_vm8, %v409_v50, %v318_v56 }
 0x1c3   : > { %v327_v59 = vsel %vm324_vm9, %v326_v57, %v322_v58 }
 0x1c4   : > { %329 = vst.msk [vmem:[%s226_s6] sm:$0x1] %vm263_vm1, %v327_v59 }
 0x1c5 PF: > { %s21_s24 = sadd.s32 1, %s416_s24  }
 0x1c6   : > { %p18_p4 = scmp.ge.s32.totalorder %s21_s24, 4  }
 0x1c8   :  { %20 = sbr.rel (!%p18_p4) target bundleno = 5 (0x5), region = 70 }

// kernel: attention_generator_forward.23
= control target key start
LH: loop header
LB: loop body
LE: loop exit
PB: predicated region body
PF: predicated region fallthrough
CT: control target
= control target key end

     0   :  { %8 = vsyncpa [#allocation3], 0  ;;  %s558_s0 = inlined_call_operand.vmem [shape: f32[2,4,4], index: 0, kind: input, shape index: {}]   ;;  %s559_s1 = inlined_call_operand.vmem [shape: f32[16,4], index: 1, kind: input, shape index: {}]   ;;  %s560_s2 = inlined_call_operand.vmem [shape: f32[4,16], index: 2, kind: input, shape index: {}]   ;;  %s561_s3 = inlined_call_operand.hbm [shape: f32[2,16,16], index: 3, kind: output, shape index: {}]  }
   0x1   :  { %10 = vsyncpa [#allocation3 + $0x1], 0  ;;  %s464_s12 = smov 0   ;;  %s466_s13 = smov 0  }
   0x2   :  { %s468_s14 = smov 0   ;;  %s470_s15 = smov 0  }
   0x3 LB: > { %s485_s16 = sadd.s32 4294967295, %s440_s15   ;;  %s317_s17 = sadd.s32 4294967294, %s440_s15   ;;  %s440_s15 = sphi %s470_s15, %s567_s15   ;;  %s436_s14 = sphi %s468_s14, %s566_s14   ;;  %s432_s13 = sphi %s466_s13, %s565_s13   ;;  %s428_s12 = sphi %s464_s12, %s564_s12  }
   0x4   : > { %s489_s18 = sadd.s32 1, %s440_s15   ;;  %s91_s19 = sadd.s32 1, %s436_s14 }
   0x5   : > { %s88_s20 = ssub.s32 %s440_s15, %s489_s18  ;;  %p101_p0 = scmp.ne.s32.totalorder %s436_s14, %s432_s13 }
   0x6   : > { %p89_p1 = scmp.eq.s32.totalorder %s88_s20, 0  ;;  %p102_p2 = scmp.eq.s32.totalorder %s485_s16, 1 }
   0x7   : > { %p107_p3 = scmp.ne.s32.totalorder %s432_s13, %s428_s12  ;;  %p108_p4 = scmp.eq.s32.totalorder %s317_s17, 1 }
   0x8   : > { %s500_s21 = scalar_select %p89_p1, %s436_s14, %s91_s19  }
   0x9   : > { %p502_p5 = por %p102_p2, %p101_p0  ;;  %p506_p6 = por %p108_p4, %p107_p3 }
   0xa   : > { %p320_p7 = scmp.ge.s32.totalorder %s440_s15, 1  ;;  %p139_p8 = scmp.lt.s32.totalorder %s440_s15, 3 }
   0xc   : > { %p140_p9 = pnand %p320_p7, %p139_p8 }
   0xd   : > { %p162_p10 = scmp.lt.s32.totalorder (!%p140_p9), %s485_s16, 1  ;;  %s159_s8 = sand.u32 (!%p140_p9), 1, %s432_s13  }
   0xe   : > { %143 = sbr.rel (%p140_p9) target bundleno = 293 (0x125), region = 32  ;;  %s321_s9 = sshll.u32 (!%p140_p9), %s159_s8, 4 }
   0xf   : > { %s161_s10 = scalar_lea.vmem (!%p140_p9), [#allocation2], %s321_s9  ;;  %s334_s11 = sshll.u32 (!%p140_p9), %s485_s16, 4 }
  0x10   : > { %s251_s20 = scalar_lea.hbm (!%p140_p9), %s561_s3, %s334_s11  ;;  %s240_s26 = scalar_lea.sflag (!%p140_p9), [#allocation3], %s159_s8 }
  0x11   : > { %s398_s30 = scalar_lea.hbm (!%p140_p9), %s561_s3, 32 }
  0x13   : > { %s163_s24 = scalar_select %p162_p10, %s485_s16, 1  ;;  %vm176_vm0 = vcmask 1043456   ;;  %v167_v0 = vld [vmem:[%s559_s1 + $0x8] sm:$0xff]  ;;  %vm169_vm1 = vcmask 31744   ;;  %v166_v1 = vld [vmem:[%s559_s1] sm:$0xff]  ;;  %vm236_vm2 = vcmask 130048  }
  0x14   : > { %v203_v3 = vld [vmem:[%s560_s2] sm:$0xf] }
  0x15   : > { %s322_s25 = sshll.u32 %s163_s24, 2  ;;  %336 = vmatpush.msk.msra.mxu3 %vm176_vm0, %v203_v3  ;;  %326 = vmatpush.msk.msra.mxu1 %vm176_vm0, %v203_v3  ;;  %s252_s24 = sshll.u32 %s161_s10, 4  ;;  %s253_s24 = int_to_ptr.vmem [resolvable:$true] %s252_s24 }
  0x16   : > { %s165_s28 = scalar_lea.vmem %s558_s0, %s322_s25  ;;  %s254_s25 = sshll.u32 %s251_s20, 4  ;;  %s255_s25 = int_to_ptr.hbm [resolvable:$true] %s254_s25 }
  0x17   : > { %v168_v2 = vld [vmem:[%s165_s28] sm:$0xf]  ;;  %s392_s27 = sshra.s32 %s255_s25, 4  ;;  %s393_s27 = int_to_ptr.hbm [resolvable:$true] %s392_s27 }
  0x18   : > { %335 = vmatpush.msk.msra.mxu2 %vm176_vm0, %v168_v2  ;;  %323 = vmatpush.msk.msra.mxu0 %vm176_vm0, %v168_v2  ;;  %s394_s28 = scalar_lea.hbm %s393_s27, 16  ;;  %p399_p0 = scmp.lt.s32.totalorder %s393_s27, %s561_s3 }
  0x19   : > { %325 = vmatmul.msk.f32.vlgmr.msra.gmra.mxu2 %vm169_vm1, %v167_v0  ;;  %324 = vmatmul.msk.f32.vlgmr.msra.gmra.mxu0 %vm169_vm1, %v166_v1  ;;  %p395_p11 = scmp.ne.s32.totalorder %s393_s27, %s394_s28  ;;  %p400_p1 = scmp.lt.s32.totalorder %s398_s30, %s394_s28 }
  0x1b   : > { %p396_p12 = pnand %p395_p11, %p502_p5  ;;  %p401_p2 = por %p400_p1, %p399_p0 }
  0x1d   : > { %p397_p13 = pneg %p396_p12 }
  0x1f   : > { %p402_p3 = pnand %p401_p2, %p397_p13 }
  0x96   : > { %v197_v4 = vpop.f32.mrf.mxu0 }
  0x97   : > { %327 = vmatmul.msk.f32.vlgmr.msra.gmra.mxu1 %vm169_vm1, %v197_v4 }
  0x9c   : > { %v200_v5 = vpop.f32.mrf.mxu2 }
  0x9d   : > { %328 = vmatmul.msk.f32.vlgmr.msra.gmra.mxu3 %vm169_vm1, %v200_v5 }
 0x114   : > { %v230_v6 = vpop.f32.mrf.mxu1 }
 0x115   : > { %237 = vst.msk [vmem:[%s161_s10] sm:$0xff] %vm236_vm2, %v230_v6 }
 0x120   : > { %v233_v7 = vpop.f32.mrf.mxu3 }
 0x121   : > { %238 = vst.msk [vmem:[%s161_s10 + $0x8] sm:$0xff] %vm236_vm2, %v233_v7 }
 0x122   : > { %405 = shalt.err (!%p402_p3)
}
 0x123   : > { %s442_s6 = smov 128   ;;  %s443_s7 = smov 8  }
 0x124   : > { %337 = dma.vmem_to_hbm [thread:$0]  (%p502_p5), %s253_s24, 256, %s255_s25, %s240_s26, %s442_s6, %s442_s6, %s443_s7  }
 0x125 PF: > { %p343_p4 = scmp.ge.s32.totalorder %s440_s15, 2  ;;  %s269_s8 = sand.u32 1, %s428_s12  }
 0x126   : > { %s270_s9 = scalar_lea.sflag [#allocation3], %s269_s8 }
 0x127   : > { %p340_p7 = pnand %p343_p4, %p506_p6 }
 0x129   : > { %p341_p8 = pneg %p340_p7 }
 0x12b   : > { %423 = dma.done.wait (%p341_p8), %s270_s9, 256  }
 0x12c   : > { %425 = vsyncadd (%p341_p8), %s270_s9, 4294967040  ;;  %p13_p9 = scmp.ge.s32.totalorder %s489_s18, 4   ;;  %s564_s12 = smov %s432_s13 }
 0x12d   : > { %s565_s13 = smov %s436_s14  ;;  %s566_s14 = smov %s500_s21 }
 0x12e   : > { %s567_s15 = smov %s489_s18  ;;  %15 = sbr.rel (!%p13_p9) target bundleno = 3 (0x3), region = 67 }
 0x133   :  { %276 = vsyncpa [#allocation3], 1 }
 0x134   :  { %278 = vsyncpa [#allocation3 + $0x1], 1 }

// kernel: attention_generator_forward.20
= control target key start
LH: loop header
LB: loop body
LE: loop exit
PB: predicated region body
PF: predicated region fallthrough
CT: control target
= control target key end

     0   :  { %s661_s12 = smov 0   ;;  %s795_s0 = inlined_call_operand.vmem [shape: bf16[2,128,16], index: 0, kind: input, shape index: {}]   ;;  %s796_s1 = inlined_call_operand.vmem [shape: bf16[4,16,128], index: 1, kind: input, shape index: {}]   ;;  %s797_s2 = inlined_call_operand.vmem [shape: f32[16,1], index: 2, kind: input, shape index: {}]   ;;  %s798_s3 = inlined_call_operand.vmem [shape: f32[2,4,16,16], index: 3, kind: output, shape index: {}]  }
   0x1 LB: > { %s533_s13 = sadd.s32 4294967295, %s638_s12   ;;  %p537_p0 = scmp.ge.s32.totalorder %s638_s12, 1  ;;  %s638_s12 = sphi %s661_s12, %s13_s12  }
   0x2   : > { %p137_p1 = scmp.lt.s32.totalorder %s638_s12, 3 }
   0x4   : > { %p138_p2 = pnand %p537_p0, %p137_p1 }
   0x5   : > { %p161_p3 = scmp.lt.s32.totalorder (!%p138_p2), %s533_s13, 1 }
   0x6   : > { %141 = sbr.rel (%p138_p2) target bundleno = 383 (0x17f), region = 32 }
   0xb   : > { %s800_s13 = smov (!%p161_p3, %s533_s13), 1  ;;  %v187_v2 = vld [vmem:[%s797_s2] sm:$0xff]  ;;  %v640_v3 = vmov 0   ;;  %v188_v6 = vld [vmem:[%s797_s2 + $0x8] sm:$0xff]  ;;  %v616_v13 = vld [vmem:[%s796_s1 + $0x10] sm:$0xff]  ;;  %vm269_vm0 = vcmask 130048  }
   0xc   : > { %s604_s14 = sshll.u32 %s800_s13, 6  ;;  %627 = vset.pattern.permute.xlu0 %v640_v3  ;;  %v614_v11 = vld [vmem:[%s796_s1] sm:$0xff]  ;;  %v615_v12 = vld [vmem:[%s796_s1 + $0x8] sm:$0xff]  ;;  %v617_v14 = vld [vmem:[%s796_s1 + $0x18] sm:$0xff] }
   0xd   : > { %s677_s17 = scalar_lea.vmem %s795_s0, %s604_s14  ;;  %193 = vperm.xlu0 %627, %v187_v2   ;;  %s770_s5 = scalar_lea.vmem %s798_s3, %s604_s14 }
   0xe   : > { %v613_v0 = vld [vmem:[%s677_s17 + $0x38] sm:$0xff]  ;;  %v612_v1 = vld [vmem:[%s677_s17 + $0x30] sm:$0xff]  ;;  %v611_v4 = vld [vmem:[%s677_s17 + $0x28] sm:$0xff] }
   0xf   : > { %255 = vmatpush.bf16.msra.mxu0 %v613_v0  ;;  %297 = vmatpush.bf16.msra.mxu1 %v613_v0  ;;  %v610_v5 = vld [vmem:[%s677_s17 + $0x20] sm:$0xff]  ;;  %v609_v7 = vld [vmem:[%s677_s17 + $0x18] sm:$0xff]  ;;  %v608_v8 = vld [vmem:[%s677_s17 + $0x10] sm:$0xff] }
  0x10   : > { %338 = vmatpush.bf16.msra.mxu2 %v613_v0  ;;  %379 = vmatpush.bf16.msra.mxu3 %v613_v0  ;;  %v607_v9 = vld [vmem:[%s677_s17 + $0x8] sm:$0xff]  ;;  %v606_v10 = vld [vmem:[%s677_s17] sm:$0xff] }
  0x13   : > { %256 = vmatpush.bf16.msra.mxu0 %v612_v1  ;;  %298 = vmatpush.bf16.msra.mxu1 %v612_v1 }
  0x14   : > { %339 = vmatpush.bf16.msra.mxu2 %v612_v1  ;;  %380 = vmatpush.bf16.msra.mxu3 %v612_v1 }
  0x15   : > { %198 = vperm.xlu0 %627, %v188_v6  }
  0x17   : > { %257 = vmatpush.bf16.msra.mxu0 %v611_v4  ;;  %299 = vmatpush.bf16.msra.mxu1 %v611_v4 }
  0x18   : > { %340 = vmatpush.bf16.msra.mxu2 %v611_v4  ;;  %381 = vmatpush.bf16.msra.mxu3 %v611_v4 }
  0x1b   : > { %258 = vmatpush.bf16.msra.mxu0 %v610_v5  ;;  %300 = vmatpush.bf16.msra.mxu1 %v610_v5 }
  0x1c   : > { %341 = vmatpush.bf16.msra.mxu2 %v610_v5  ;;  %382 = vmatpush.bf16.msra.mxu3 %v610_v5 }
  0x1f   : > { %259 = vmatpush.bf16.msra.mxu0 %v609_v7  ;;  %301 = vmatpush.bf16.msra.mxu1 %v609_v7 }
  0x20   : > { %342 = vmatpush.bf16.msra.mxu2 %v609_v7  ;;  %383 = vmatpush.bf16.msra.mxu3 %v609_v7 }
  0x23   : > { %260 = vmatpush.bf16.msra.mxu0 %v608_v8  ;;  %302 = vmatpush.bf16.msra.mxu1 %v608_v8 }
  0x24   : > { %343 = vmatpush.bf16.msra.mxu2 %v608_v8  ;;  %384 = vmatpush.bf16.msra.mxu3 %v608_v8 }
  0x27   : > { %261 = vmatpush.bf16.msra.mxu0 %v607_v9  ;;  %303 = vmatpush.bf16.msra.mxu1 %v607_v9 }
  0x28   : > { %344 = vmatpush.bf16.msra.mxu2 %v607_v9  ;;  %385 = vmatpush.bf16.msra.mxu3 %v607_v9 }
  0x2b   : > { %262 = vmatpush.bf16.msra.mxu0 %v606_v10  ;;  %304 = vmatpush.bf16.msra.mxu1 %v606_v10 }
  0x2c   : > { %345 = vmatpush.bf16.msra.mxu2 %v606_v10  ;;  %386 = vmatpush.bf16.msra.mxu3 %v606_v10 }
  0x2e   : > { %263 = vmatmul.bf16.vlgmr.msra.gmra.mxu0 %v614_v11  ;;  %305 = vmatmul.bf16.vlgmr.msra.gmra.mxu1 %v615_v12 }
  0x2f   : > { %346 = vmatmul.bf16.vlgmr.msra.gmra.mxu2 %v616_v13  ;;  %387 = vmatmul.bf16.vlgmr.msra.gmra.mxu3 %v617_v14 }
  0x7f   : > { %v194_v15 = vpop.permute.xlu0 %193 }
  0x87   : > { %v199_v25 = vpop.permute.xlu0 %198 }
  0xab   : > { %v264_v16 = vpop.f32.mrf.mxu0  ;;  %v306_v17 = vpop.f32.mrf.mxu1 }
  0xac   : > { %v705_v18 = vadd.f32 %v264_v16, %v194_v15  ;;  %v707_v19 = vadd.f32 %v306_v17, %v194_v15 }
  0xae   : > { %v311_v20 = vsel %vm269_vm0, %v707_v19, 0.0  ;;  %v270_v21 = vsel %vm269_vm0, %v705_v18, 0.0  ;;  %v278_v22 = vmul.f32 %v705_v18, %v705_v18  ;;  %v319_v24 = vmul.f32 %v707_v19, %v707_v19 }
  0xaf   : > { %312 = vadd.xlane.f32.xlu2 %v311_v20  ;;  %271 = vadd.xlane.f32.xlu1 %v270_v21 }
  0xb0   : > { %v280_v23 = vsel %vm269_vm0, %v278_v22, 0.0  ;;  %v321_v28 = vsel %vm269_vm0, %v319_v24, 0.0 }
  0xb1   : > { %281 = vadd.xlane.f32.xlu0 %v280_v23 }
  0xb2   : > { %v347_v30 = vpop.f32.mrf.mxu2  ;;  %v388_v37 = vpop.f32.mrf.mxu3 }
  0xb3   : > { %v266_v26 = vpop.f32.mrf.mxu0  ;;  %v723_v31 = vadd.f32 %v347_v30, %v194_v15  ;;  %v308_v33 = vpop.f32.mrf.mxu1  ;;  %v732_v38 = vadd.f32 %v388_v37, %v194_v15 }
  0xb4   : > { %v718_v27 = vadd.f32 %v266_v26, %v199_v25  ;;  %v727_v34 = vadd.f32 %v308_v33, %v199_v25 }
  0xb5   : > { %v352_v35 = vsel %vm269_vm0, %v723_v31, 0.0  ;;  %v393_v40 = vsel %vm269_vm0, %v732_v38, 0.0  ;;  %v360_v48 = vmul.f32 %v723_v31, %v723_v31  ;;  %v401_v51 = vmul.f32 %v732_v38, %v732_v38 }
  0xb6   : > { %v273_v29 = vsel %vm269_vm0, %v718_v27, 0.0  ;;  %v279_v32 = vmul.f32 %v718_v27, %v718_v27  ;;  %v320_v39 = vmul.f32 %v727_v34, %v727_v34  ;;  %v314_v44 = vsel %vm269_vm0, %v727_v34, 0.0 }
  0xb7   : > { %322 = vadd.xlane.f32.xlu2 %v321_v28  ;;  %274 = vadd.xlane.f32.xlu1 %v273_v29  ;;  %v362_v49 = vsel %vm269_vm0, %v360_v48, 0.0  ;;  %v403_v53 = vsel %vm269_vm0, %v401_v51, 0.0 }
  0xb8   : > { %v283_v36 = vsel %vm269_vm0, %v279_v32, 0.0  ;;  %v324_v41 = vsel %vm269_vm0, %v320_v39, 0.0 }
  0xba   : > { %v349_v42 = vpop.f32.mrf.mxu2  ;;  %v390_v46 = vpop.f32.mrf.mxu3 }
  0xbb   : > { %v739_v43 = vadd.f32 %v349_v42, %v199_v25  ;;  %v745_v47 = vadd.f32 %v390_v46, %v199_v25 }
  0xbd   : > { %v355_v45 = vsel %vm269_vm0, %v739_v43, 0.0  ;;  %v396_v50 = vsel %vm269_vm0, %v745_v47, 0.0  ;;  %v361_v52 = vmul.f32 %v739_v43, %v739_v43  ;;  %v402_v55 = vmul.f32 %v745_v47, %v745_v47 }
  0xbf   : > { %353 = vadd.xlane.f32.xlu2 %v352_v35  ;;  %284 = vadd.xlane.f32.xlu1 %v283_v36  ;;  %v365_v54 = vsel %vm269_vm0, %v361_v52, 0.0  ;;  %v406_v56 = vsel %vm269_vm0, %v402_v55, 0.0 }
  0xc7   : > { %394 = vadd.xlane.f32.xlu2 %v393_v40  ;;  %325 = vadd.xlane.f32.xlu1 %v324_v41 }
  0xcf   : > { %315 = vadd.xlane.f32.xlu2 %v314_v44  ;;  %356 = vadd.xlane.f32.xlu1 %v355_v45 }
  0xd7   : > { %363 = vadd.xlane.f32.xlu2 %v362_v49  ;;  %397 = vadd.xlane.f32.xlu1 %v396_v50 }
  0xdf   : > { %404 = vadd.xlane.f32.xlu2 %v403_v53  ;;  %366 = vadd.xlane.f32.xlu1 %v365_v54 }
  0xe7   : > { %407 = vadd.xlane.f32.xlu1 %v406_v56 }
 0x122   : > { %v313_v57 = vpop.xlane.xlu2 %312  ;;  %v272_v58 = vpop.xlane.xlu1 %271 }
 0x123   : > { %v317_v3 = vadd.f32 %v313_v57, %v272_v58 }
 0x124   : > { %v282_v8 = vpop.xlane.xlu0 %281 }
 0x12a   : > { %v323_v59 = vpop.xlane.xlu2 %322  ;;  %v275_v60 = vpop.xlane.xlu1 %274 }
 0x12b   : > { %v327_v9 = vadd.f32 %v323_v59, %v282_v8 }
 0x132   : > { %v354_v61 = vpop.xlane.xlu2 %353  ;;  %v285_v62 = vpop.xlane.xlu1 %284 }
 0x133   : > { %v358_v6 = vadd.f32 %v354_v61, %v317_v3 }
 0x13a   : > { %v395_v63 = vpop.xlane.xlu2 %394  ;;  %v326_v0 = vpop.xlane.xlu1 %325 }
 0x13b   : > { %v399_v7 = vadd.f32 %v395_v63, %v358_v6  ;;  %v328_v22 = vadd.f32 %v326_v0, %v285_v62 }
 0x13d   : > { %v411_v11 = vmul.f32 0.015625, %v399_v7 }
 0x13f   : > { %v415_v21 = vmul.f32 %v411_v11, %v411_v11  ;;  %v443_v49 = vsub.f32 %v705_v18, %v411_v11  ;;  %v451_v50 = vsub.f32 %v707_v19, %v411_v11  ;;  %v460_v51 = vsub.f32 %v723_v31, %v411_v11 }
 0x140   : > { %v469_v52 = vsub.f32 %v732_v38, %v411_v11 }
 0x142   : > { %v316_v1 = vpop.xlane.xlu2 %315  ;;  %v357_v2 = vpop.xlane.xlu1 %356 }
 0x143   : > { %v318_v10 = vadd.f32 %v316_v1, %v275_v60 }
 0x145   : > { %v359_v15 = vadd.f32 %v357_v2, %v318_v10 }
 0x14a   : > { %v364_v4 = vpop.xlane.xlu2 %363  ;;  %v398_v5 = vpop.xlane.xlu1 %397 }
 0x14b   : > { %v368_v12 = vadd.f32 %v364_v4, %v327_v9  ;;  %v400_v17 = vadd.f32 %v398_v5, %v359_v15 }
 0x14d   : > { %v412_v24 = vmul.f32 0.015625, %v400_v17 }
 0x14f   : > { %v416_v32 = vmul.f32 %v412_v24, %v412_v24  ;;  %v444_v62 = vsub.f32 %v718_v27, %v412_v24  ;;  %v452_v63 = vsub.f32 %v727_v34, %v412_v24  ;;  %v461_v0 = vsub.f32 %v739_v43, %v412_v24 }
 0x150   : > { %v470_v1 = vsub.f32 %v745_v47, %v412_v24 }
 0x152   : > { %v405_v13 = vpop.xlane.xlu2 %404  ;;  %v367_v14 = vpop.xlane.xlu1 %366 }
 0x153   : > { %v409_v16 = vadd.f32 %v405_v13, %v368_v12  ;;  %v369_v26 = vadd.f32 %v367_v14, %v328_v22 }
 0x155   : > { %v413_v20 = vmul.f32 0.015625, %v409_v16 }
 0x157   : > { %v417_v23 = vsub.f32 %v413_v20, %v415_v21 }
 0x159   : > { %v419_v25 = vmax.f32 %v417_v23, 0.0 }
 0x15a   : > { %v408_v28 = vpop.xlane.xlu1 %407 }
 0x15b   : > { %v421_v29 = vadd.f32 1e-05, %v419_v25  ;;  %v410_v30 = vadd.f32 %v408_v28, %v369_v26 }
 0x15d   : > { %628 = vrsqrt.f32 %v421_v29  ;;  %v414_v33 = vmul.f32 0.015625, %v410_v30  ;;  %vm429_vm2 = vweird.f32 %v421_v29 }
 0x15f   : > { %v418_v35 = vsub.f32 %v414_v33, %v416_v32 }
 0x161   : > { %v420_v36 = vmax.f32 %v418_v35, 0.0 }
 0x163   : > { %v629_v37 = vpop.eup %628  ;;  %v422_v39 = vadd.f32 1e-05, %v420_v36 }
 0x164   : > { %v424_v40 = vmul.f32 %v629_v37, %v421_v29  ;;  %vm430_vm1 = vweird.f32 %v629_v37 }
 0x165   : > { %630 = vrsqrt.f32 %v422_v39  ;;  %vm431_vm3 = vmor %vm429_vm2, %vm430_vm1  ;;  %vm439_vm5 = vweird.f32 %v422_v39 }
 0x166   : > { %v425_v41 = vmul.f32 %v629_v37, %v424_v40 }
 0x168   : > { %v426_v42 = vmul.f32 0.5, %v425_v41 }
 0x16a   : > { %v427_v44 = vsub.f32 1.5, %v426_v42 }
 0x16b   : > { %v631_v45 = vpop.eup %630 }
 0x16c   : > { %v428_v46 = vmul.f32 %v629_v37, %v427_v44  ;;  %v434_v48 = vmul.f32 %v631_v45, %v422_v39  ;;  %vm440_vm4 = vweird.f32 %v631_v45 }
 0x16d   : > { %vm441_vm6 = vmor %vm439_vm5, %vm440_vm4 }
 0x16e   : > { %v432_v53 = vsel %vm431_vm3, %v629_v37, %v428_v46  ;;  %v435_v54 = vmul.f32 %v631_v45, %v434_v48 }
 0x16f   : > { %v445_v55 = vmul.f32 %v443_v49, %v432_v53  ;;  %v453_v56 = vmul.f32 %v451_v50, %v432_v53  ;;  %v462_v57 = vmul.f32 %v460_v51, %v432_v53  ;;  %v471_v58 = vmul.f32 %v469_v52, %v432_v53 }
 0x170   : > { %v436_v18 = vmul.f32 0.5, %v435_v54 }
 0x171   : > { %v447_v19 = vmax.f32 %v445_v55, 0.0  ;;  %v455_v31 = vmax.f32 %v453_v56, 0.0  ;;  %v464_v38 = vmax.f32 %v462_v57, 0.0  ;;  %v473_v59 = vmax.f32 %v471_v58, 0.0 }
 0x172   : > { %v437_v60 = vsub.f32 1.5, %v436_v18 }
 0x173   : > { %449 = vst.msk [vmem:[%s770_s5] sm:$0xff] %vm269_vm0, %v447_v19 }
 0x174   : > { %596 = vst.msk [vmem:[%s770_s5 + $0x10] sm:$0xff] %vm269_vm0, %v455_v31  ;;  %v438_v61 = vmul.f32 %v631_v45, %v437_v60 }
 0x175   : > { %598 = vst.msk [vmem:[%s770_s5 + $0x20] sm:$0xff] %vm269_vm0, %v464_v38 }
 0x176   : > { %600 = vst.msk [vmem:[%s770_s5 + $0x30] sm:$0xff] %vm269_vm0, %v473_v59  ;;  %v442_v2 = vsel %vm441_vm6, %v631_v45, %v438_v61 }
 0x177   : > { %v446_v3 = vmul.f32 %v444_v62, %v442_v2  ;;  %v454_v4 = vmul.f32 %v452_v63, %v442_v2  ;;  %v463_v5 = vmul.f32 %v461_v0, %v442_v2  ;;  %v472_v27 = vmul.f32 %v470_v1, %v442_v2 }
 0x179   : > { %v448_v6 = vmax.f32 %v446_v3, 0.0  ;;  %v456_v7 = vmax.f32 %v454_v4, 0.0  ;;  %v465_v34 = vmax.f32 %v463_v5, 0.0  ;;  %v474_v8 = vmax.f32 %v472_v27, 0.0 }
 0x17b   : > { %450 = vst.msk [vmem:[%s770_s5 + $0x8] sm:$0xff] %vm269_vm0, %v448_v6 }
 0x17c   : > { %597 = vst.msk [vmem:[%s770_s5 + $0x18] sm:$0xff] %vm269_vm0, %v456_v7 }
 0x17d   : > { %599 = vst.msk [vmem:[%s770_s5 + $0x28] sm:$0xff] %vm269_vm0, %v465_v34 }
 0x17e   : > { %601 = vst.msk [vmem:[%s770_s5 + $0x38] sm:$0xff] %vm269_vm0, %v474_v8 }
 0x17f PF: > { %s13_s12 = sadd.s32 1, %s638_s12  }
 0x180   : > { %p10_p4 = scmp.ge.s32.totalorder %s13_s12, 4  }
 0x182   :  { %12 = sbr.rel (!%p10_p4) target bundleno = 1 (0x1), region = 68 }

// kernel: attention_generator_forward.21
= control target key start
LH: loop header
LB: loop body
LE: loop exit
PB: predicated region body
PF: predicated region fallthrough
CT: control target
= control target key end

     0   :  { %s492_s12 = smov 0   ;;  %s559_s0 = inlined_call_operand.vmem [shape: bf16[2,64,64], index: 0, kind: input, shape index: {}]   ;;  %s560_s1 = inlined_call_operand.vmem [shape: bf16[4,8,64], index: 1, kind: input, shape index: {}]   ;;  %s561_s2 = inlined_call_operand.vmem [shape: f32[8,1], index: 2, kind: input, shape index: {}]   ;;  %s562_s3 = inlined_call_operand.vmem [shape: f32[2,4,8,64], index: 3, kind: output, shape index: {}]  }
   0x1 LB: > { %s408_s13 = sadd.s32 4294967295, %s469_s12   ;;  %p412_p0 = scmp.ge.s32.totalorder %s469_s12, 1  ;;  %s469_s12 = sphi %s492_s12, %s13_s12  }
   0x2   : > { %p137_p1 = scmp.lt.s32.totalorder %s469_s12, 3 }
   0x4   : > { %p138_p2 = pnand %p412_p0, %p137_p1 }
   0x5   : > { %p161_p3 = scmp.lt.s32.totalorder (!%p138_p2), %s408_s13, 1 }
   0x6   : > { %141 = sbr.rel (%p138_p2) target bundleno = 335 (0x14f), region = 32 }
   0xb   : > { %v180_v0 = vld [vmem:[%s561_s2] sm:$0xff]  ;;  %s564_s13 = smov (!%p161_p3, %s408_s13), 1  ;;  %v471_v1 = vmov 0   ;;  %vm211_vm0 = vcmask 523264   ;;  %v436_v8 = vld [vmem:[%s560_s1 + $0x8] sm:$0xf] }
   0xc   : > { %460 = vset.pattern.permute.xlu0 %v471_v1  ;;  %s445_s16 = sshll.u32 %s564_s13, 5  ;;  %v181_v6 = vld [vmem:[%s560_s1] sm:$0xf]  ;;  %v434_v7 = vld [vmem:[%s560_s1 + $0x4] sm:$0xf] }
   0xd   : > { %184 = vperm.xlu0 %460, %v180_v0   ;;  %s165_s19 = scalar_lea.vmem %s559_s0, %s445_s16  ;;  %v438_v9 = vld [vmem:[%s560_s1 + $0xc] sm:$0xf]  ;;  %s170_s30 = scalar_lea.vmem %s562_s3, %s445_s16 }
   0xe   : > { %v450_v2 = vld [vmem:[%s165_s19 + $0x18] sm:$0xff]  ;;  %v449_v3 = vld [vmem:[%s165_s19 + $0x10] sm:$0xff]  ;;  %v448_v4 = vld [vmem:[%s165_s19 + $0x8] sm:$0xff] }
   0xf   : > { %219 = vmatpush.bf16.msra.mxu0 %v450_v2  ;;  %246 = vmatpush.bf16.msra.mxu1 %v450_v2  ;;  %v447_v5 = vld [vmem:[%s165_s19] sm:$0xff] }
  0x10   : > { %273 = vmatpush.bf16.msra.mxu2 %v450_v2  ;;  %300 = vmatpush.bf16.msra.mxu3 %v450_v2 }
  0x13   : > { %220 = vmatpush.bf16.msra.mxu0 %v449_v3  ;;  %247 = vmatpush.bf16.msra.mxu1 %v449_v3 }
  0x14   : > { %274 = vmatpush.bf16.msra.mxu2 %v449_v3  ;;  %301 = vmatpush.bf16.msra.mxu3 %v449_v3 }
  0x17   : > { %221 = vmatpush.bf16.msra.mxu0 %v448_v4  ;;  %248 = vmatpush.bf16.msra.mxu1 %v448_v4 }
  0x18   : > { %275 = vmatpush.bf16.msra.mxu2 %v448_v4  ;;  %302 = vmatpush.bf16.msra.mxu3 %v448_v4 }
  0x1b   : > { %222 = vmatpush.bf16.msra.mxu0 %v447_v5  ;;  %249 = vmatpush.bf16.msra.mxu1 %v447_v5 }
  0x1c   : > { %276 = vmatpush.bf16.msra.mxu2 %v447_v5  ;;  %303 = vmatpush.bf16.msra.mxu3 %v447_v5 }
  0x1e   : > { %433 = vmatmul.msk.bf16.vlgmr.msra.gmra.mxu0 %vm211_vm0, %v181_v6  ;;  %435 = vmatmul.msk.bf16.vlgmr.msra.gmra.mxu1 %vm211_vm0, %v434_v7 }
  0x1f   : > { %437 = vmatmul.msk.bf16.vlgmr.msra.gmra.mxu2 %vm211_vm0, %v436_v8  ;;  %439 = vmatmul.msk.bf16.vlgmr.msra.gmra.mxu3 %vm211_vm0, %v438_v9 }
  0x7f   : > { %v185_v10 = vpop.permute.xlu0 %184 }
  0x9b   : > { %v224_v11 = vpop.f32.mrf.mxu0  ;;  %v251_v12 = vpop.f32.mrf.mxu1 }
  0x9c   : > { %v527_v13 = vadd.f32 %v224_v11, %v185_v10  ;;  %v529_v14 = vadd.f32 %v251_v12, %v185_v10 }
  0x9e   : > { %v255_v15 = vsel %vm211_vm0, %v529_v14, 0.0  ;;  %v228_v16 = vsel %vm211_vm0, %v527_v13, 0.0  ;;  %v259_v17 = vmul.f32 %v529_v14, %v529_v14  ;;  %v232_v21 = vmul.f32 %v527_v13, %v527_v13 }
  0x9f   : > { %256 = vadd.xlane.f32.xlu1 %v255_v15  ;;  %229 = vadd.xlane.f32.xlu0 %v228_v16 }
  0xa0   : > { %v260_v18 = vsel %vm211_vm0, %v259_v17, 0.0  ;;  %v233_v25 = vsel %vm211_vm0, %v232_v21, 0.0 }
  0xa1   : > { %261 = vadd.xlane.f32.xlu2 %v260_v18 }
  0xa2   : > { %v278_v19 = vpop.f32.mrf.mxu2  ;;  %v305_v20 = vpop.f32.mrf.mxu3 }
  0xa3   : > { %v226_v22 = vpop.f32.mrf.mxu0  ;;  %v253_v23 = vpop.f32.mrf.mxu1  ;;  %v279_v24 = vadd.f32 %v278_v19, %v185_v10  ;;  %v306_v30 = vadd.f32 %v305_v20, %v185_v10 }
  0xa5   : > { %v282_v26 = vsel %vm211_vm0, %v279_v24, 0.0  ;;  %v286_v28 = vmul.f32 %v279_v24, %v279_v24  ;;  %v309_v32 = vsel %vm211_vm0, %v306_v30, 0.0  ;;  %v313_v33 = vmul.f32 %v306_v30, %v306_v30 }
  0xa7   : > { %234 = vadd.xlane.f32.xlu1 %v233_v25  ;;  %v287_v31 = vsel %vm211_vm0, %v286_v28, 0.0  ;;  %v314_v34 = vsel %vm211_vm0, %v313_v33, 0.0 }
  0xa9   : > { %283 = vadd.xlane.f32.xlu2 %v282_v26 }
  0xaa   : > { %v280_v27 = vpop.f32.mrf.mxu2  ;;  %v307_v29 = vpop.f32.mrf.mxu3 }
  0xaf   : > { %288 = vadd.xlane.f32.xlu1 %v287_v31 }
  0xb1   : > { %310 = vadd.xlane.f32.xlu2 %v309_v32 }
  0xb7   : > { %315 = vadd.xlane.f32.xlu1 %v314_v34 }
 0x112   : > { %v257_v35 = vpop.xlane.xlu1 %256  ;;  %v230_v39 = vpop.xlane.xlu0 %229 }
 0x113   : > { %v258_v40 = vadd.f32 %v257_v35, %v230_v39 }
 0x114   : > { %v262_v36 = vpop.xlane.xlu2 %261 }
 0x11a   : > { %v235_v37 = vpop.xlane.xlu1 %234 }
 0x11b   : > { %v263_v45 = vadd.f32 %v262_v36, %v235_v37 }
 0x11c   : > { %v284_v38 = vpop.xlane.xlu2 %283 }
 0x11d   : > { %v285_v42 = vadd.f32 %v284_v38, %v258_v40 }
 0x122   : > { %v289_v41 = vpop.xlane.xlu1 %288 }
 0x123   : > { %v290_v46 = vadd.f32 %v289_v41, %v263_v45 }
 0x124   : > { %v311_v43 = vpop.xlane.xlu2 %310 }
 0x125   : > { %v312_v44 = vadd.f32 %v311_v43, %v285_v42 }
 0x127   : > { %v318_v47 = vmul.f32 0.00390625, %v312_v44 }
 0x129   : > { %v320_v51 = vmul.f32 %v318_v47, %v318_v47  ;;  %v334_v61 = vsub.f32 %v527_v13, %v318_v47  ;;  %v338_v62 = vsub.f32 %v529_v14, %v318_v47  ;;  %v343_v63 = vsub.f32 %v279_v24, %v318_v47 }
 0x12a   : > { %v316_v48 = vpop.xlane.xlu1 %315  ;;  %v348_v0 = vsub.f32 %v306_v30, %v318_v47 }
 0x12b   : > { %v317_v49 = vadd.f32 %v316_v48, %v290_v46 }
 0x12d   : > { %v319_v50 = vmul.f32 0.00390625, %v317_v49 }
 0x12f   : > { %v321_v52 = vsub.f32 %v319_v50, %v320_v51 }
 0x131   : > { %v322_v53 = vmax.f32 %v321_v52, 0.0 }
 0x133   : > { %v323_v54 = vadd.f32 1e-05, %v322_v53 }
 0x135   : > { %461 = vrsqrt.f32 %v323_v54  ;;  %vm330_vm2 = vweird.f32 %v323_v54 }
 0x13b   : > { %v462_v55 = vpop.eup %461 }
 0x13c   : > { %v325_v56 = vmul.f32 %v462_v55, %v323_v54  ;;  %vm331_vm1 = vweird.f32 %v462_v55 }
 0x13d   : > { %vm332_vm3 = vmor %vm330_vm2, %vm331_vm1 }
 0x13e   : > { %v326_v57 = vmul.f32 %v462_v55, %v325_v56 }
 0x140   : > { %v327_v58 = vmul.f32 0.5, %v326_v57 }
 0x142   : > { %v328_v59 = vsub.f32 1.5, %v327_v58 }
 0x144   : > { %v329_v60 = vmul.f32 %v462_v55, %v328_v59 }
 0x146   : > { %v333_v1 = vsel %vm332_vm3, %v462_v55, %v329_v60 }
 0x147   : > { %v335_v2 = vmul.f32 %v334_v61, %v333_v1  ;;  %v339_v3 = vmul.f32 %v338_v62, %v333_v1  ;;  %v344_v4 = vmul.f32 %v343_v63, %v333_v1  ;;  %v349_v5 = vmul.f32 %v348_v0, %v333_v1 }
 0x149   : > { %v336_v6 = vmax.f32 %v335_v2, 0.0  ;;  %v340_v7 = vmax.f32 %v339_v3, 0.0  ;;  %v345_v8 = vmax.f32 %v344_v4, 0.0  ;;  %v350_v9 = vmax.f32 %v349_v5, 0.0 }
 0x14b   : > { %337 = vst.msk [vmem:[%s170_s30] sm:$0xff] %vm211_vm0, %v336_v6 }
 0x14c   : > { %440 = vst.msk [vmem:[%s170_s30 + $0x8] sm:$0xff] %vm211_vm0, %v340_v7 }
 0x14d   : > { %441 = vst.msk [vmem:[%s170_s30 + $0x10] sm:$0xff] %vm211_vm0, %v345_v8 }
 0x14e   : > { %442 = vst.msk [vmem:[%s170_s30 + $0x18] sm:$0xff] %vm211_vm0, %v350_v9 }
 0x14f PF: > { %s13_s12 = sadd.s32 1, %s469_s12  }
 0x150   : > { %p10_p4 = scmp.ge.s32.totalorder %s13_s12, 4  }
 0x152   :  { %12 = sbr.rel (!%p10_p4) target bundleno = 1 (0x1), region = 68 }

// kernel: attention_generator_forward.22
= control target key start
LH: loop header
LB: loop body
LE: loop exit
PB: predicated region body
PF: predicated region fallthrough
CT: control target
= control target key end

     0   :  { %s961_s14 = smov 0   ;;  %s1104_s0 = inlined_call_operand.vmem [shape: bf16[2,392,256], index: 0, kind: input, shape index: {}]   ;;  %s1105_s1 = inlined_call_operand.vmem [shape: bf16[1,392], index: 1, kind: input, shape index: {}]   ;;  %s1106_s2 = inlined_call_operand.<no memory space> [shape: f32[1,1], index: 2, kind: input, shape index: {}]   ;;  %s1107_s3 = inlined_call_operand.vmem [shape: f32[2,1,256], index: 3, kind: output, shape index: {}]  }
   0x1   :  { %v8_v0 = vstv %s1106_s2 }
   0x2   :  { %9 = vst [vmem:[#allocation2] sm:$0x1] %v8_v0 }
   0x3 LB: > { %s663_s15 = sadd.s32 4294967295, %s935_s14   ;;  %p667_p0 = scmp.ge.s32.totalorder %s935_s14, 1  ;;  %s935_s14 = sphi %s961_s14, %s15_s14  }
   0x4   : > { %p139_p1 = scmp.lt.s32.totalorder %s935_s14, 3 }
   0x6   : > { %p140_p2 = pnand %p667_p0, %p139_p1 }
   0x7   : > { %p162_p3 = scmp.lt.s32.totalorder (!%p140_p2), %s663_s15, 1 }
   0x8   : > { %143 = sbr.rel (%p140_p2) target bundleno = 226 (0xe2), region = 32 }
   0xd   : > { %v172_v1 = vld [vmem:[%s1105_s1] sm:$0xf]  ;;  %s1109_s15 = smov (!%p162_p3, %s663_s15), 1  ;;  %vm486_vm0 = vcmask 1043456   ;;  %vm483_vm1 = vcmask 64512   ;;  %vm602_vm2 = vcmask 1040384  }
   0xe   : > { %230 = vst [vmem:[#allocation1] ss:$9 sm:$0xff] %v172_v1  ;;  %s914_s2 = smul.u32 392, %s1109_s15  ;;  %s669_s21 = sshll.u32 %s1109_s15, 1 }
   0xf   : > { %s170_s24 = scalar_lea.vmem %s1107_s3, %s669_s21 }
  0x10   : > { %s978_s20 = scalar_lea.vmem %s1104_s0, %s914_s2 }
  0x11   : > { %v728_v2 = vld [vmem:[%s978_s20 + $0x70] sm:$0xf]  ;;  %v881_v3 = vld [vmem:[%s978_s20 + $0x74] sm:$0xf0]  ;;  %v720_v11 = vld [vmem:[%s978_s20 + $0x60] sm:$0xf] }
  0x12   : > { %v792_v4 = vld [vmem:[%s978_s20 + $0xf0] sm:$0xf]  ;;  %v729_v5 = vor.u32 %v881_v3, %v728_v2  ;;  %v897_v6 = vld [vmem:[%s978_s20 + $0xf4] sm:$0xf0]  ;;  %v879_v12 = vld [vmem:[%s978_s20 + $0x64] sm:$0xf0] }
  0x13   : > { %v856_v7 = vld [vmem:[%s978_s20 + $0x170] sm:$0xf]  ;;  %v913_v8 = vld [vmem:[%s978_s20 + $0x174] sm:$0xf0]  ;;  %v793_v9 = vor.u32 %v897_v6, %v792_v4  ;;  %v784_v13 = vld [vmem:[%s978_s20 + $0xe0] sm:$0xf]  ;;  %v721_v14 = vor.u32 %v879_v12, %v720_v11 }
  0x14   : > { %v857_v10 = vor.u32 %v913_v8, %v856_v7  ;;  %493 = vmatpush.bf16.msra.mxu0 %v729_v5  ;;  %v895_v15 = vld [vmem:[%s978_s20 + $0xe4] sm:$0xf0]  ;;  %v848_v16 = vld [vmem:[%s978_s20 + $0x160] sm:$0xf]  ;;  %v712_v20 = vld [vmem:[%s978_s20 + $0x50] sm:$0xf] }
  0x15   : > { %v911_v17 = vld [vmem:[%s978_s20 + $0x164] sm:$0xf0]  ;;  %506 = vmatpush.bf16.msra.mxu1 %v793_v9  ;;  %v785_v18 = vor.u32 %v895_v15, %v784_v13  ;;  %v877_v21 = vld [vmem:[%s978_s20 + $0x54] sm:$0xf0]  ;;  %v776_v22 = vld [vmem:[%s978_s20 + $0xd0] sm:$0xf] }
  0x16   : > { %519 = vmatpush.bf16.msra.mxu2 %v857_v10  ;;  %v849_v19 = vor.u32 %v911_v17, %v848_v16  ;;  %v893_v23 = vld [vmem:[%s978_s20 + $0xd4] sm:$0xf0]  ;;  %v840_v24 = vld [vmem:[%s978_s20 + $0x150] sm:$0xf]  ;;  %v713_v26 = vor.u32 %v877_v21, %v712_v20  ;;  %v704_v27 = vld [vmem:[%s978_s20 + $0x40] sm:$0xf] }
  0x17   : > { %v909_v25 = vld [vmem:[%s978_s20 + $0x154] sm:$0xf0]  ;;  %v1000_v28 = vld [vmem:[%s978_s20 + $0x180] sm:$0xff]  ;;  %v880_v29 = vld [vmem:[%s978_s20 + $0x74] sm:$0xf]  ;;  %v777_v30 = vor.u32 %v893_v23, %v776_v22 }
  0x18   : > { %494 = vmatpush.bf16.msra.mxu0 %v721_v14  ;;  %v841_v31 = vor.u32 %v909_v25, %v840_v24  ;;  %v875_v32 = vld [vmem:[%s978_s20 + $0x44] sm:$0xf0]  ;;  %v768_v33 = vld [vmem:[%s978_s20 + $0xc0] sm:$0xf]  ;;  %v383_v34 = vunpack.c.l.b16 %v1000_v28  ;;  %v730_v35 = vld [vmem:[%s978_s20 + $0x78] sm:$0xf0]  ;;  %v384_v24 = vunpack.c.h.b16 %v1000_v28 }
  0x19   : > { %507 = vmatpush.bf16.msra.mxu1 %v785_v18  ;;  %v891_v36 = vld [vmem:[%s978_s20 + $0xc4] sm:$0xf0]  ;;  %v832_v37 = vld [vmem:[%s978_s20 + $0x140] sm:$0xf]  ;;  %v733_v40 = vor.u32 %v880_v29, %v730_v35  ;;  %v705_v41 = vor.u32 %v875_v32, %v704_v27  ;;  %v696_v42 = vld [vmem:[%s978_s20 + $0x30] sm:$0xf] }
  0x1a   : > { %520 = vmatpush.bf16.msra.mxu2 %v849_v19  ;;  %v907_v38 = vld [vmem:[%s978_s20 + $0x144] sm:$0xf0]  ;;  %v433_v39 = vpack.c.b16 %v383_v34, %v383_v34  ;;  %v878_v43 = vld [vmem:[%s978_s20 + $0x64] sm:$0xf]  ;;  %v722_v44 = vld [vmem:[%s978_s20 + $0x68] sm:$0xf0]  ;;  %v769_v45 = vor.u32 %v891_v36, %v768_v33 }
  0x1b   : > { %v833_v47 = vor.u32 %v907_v38, %v832_v37  ;;  %v873_v48 = vld [vmem:[%s978_s20 + $0x34] sm:$0xf0]  ;;  %v760_v49 = vld [vmem:[%s978_s20 + $0xb0] sm:$0xf]  ;;  %v725_v53 = vor.u32 %v878_v43, %v722_v44  ;;  %v876_v56 = vld [vmem:[%s978_s20 + $0x54] sm:$0xf]  ;;  %v434_v38 = vpack.c.b16 %v384_v24, %v384_v24 }
  0x1c   : > { %495 = vmatpush.bf16.msra.mxu0 %v713_v26  ;;  %v488_v46 = vsel %vm486_vm0, %v433_v39, 0  ;;  %v889_v50 = vld [vmem:[%s978_s20 + $0xb4] sm:$0xf0]  ;;  %v824_v51 = vld [vmem:[%s978_s20 + $0x130] sm:$0xf]  ;;  %v697_v55 = vor.u32 %v873_v48, %v696_v42  ;;  %v937_v29 = vmov 0  }
  0x1d   : > { %508 = vmatpush.bf16.msra.mxu1 %v777_v30  ;;  %539 = vmatpush.bf16.msra.mxu3 %v488_v46  ;;  %v905_v52 = vld [vmem:[%s978_s20 + $0x134] sm:$0xf0]  ;;  %v714_v57 = vld [vmem:[%s978_s20 + $0x58] sm:$0xf0]  ;;  %v761_v58 = vor.u32 %v889_v50, %v760_v49  ;;  %v688_v60 = vld [vmem:[%s978_s20 + $0x20] sm:$0xf] }
  0x1e   : > { %521 = vmatpush.bf16.msra.mxu2 %v841_v31  ;;  %v1019_v54 = vld [vmem:[#allocation1 + $0x1b] sm:$0xff]  ;;  %v825_v59 = vor.u32 %v905_v52, %v824_v51  ;;  %v871_v61 = vld [vmem:[%s978_s20 + $0x24] sm:$0xf0]  ;;  %v717_v2 = vor.u32 %v876_v56, %v714_v57  ;;  %v874_v4 = vld [vmem:[%s978_s20 + $0x44] sm:$0xf]  ;;  %924 = vset.pattern.permute.xlu0 %v937_v29  ;;  %v491_v52 = vsel %vm486_vm0, %v434_v38, 0 }
  0x1f   : > { %v752_v62 = vld [vmem:[%s978_s20 + $0xa0] sm:$0xf]  ;;  %v887_v63 = vld [vmem:[%s978_s20 + $0xa4] sm:$0xf0]  ;;  %v689_v3 = vor.u32 %v871_v61, %v688_v60  ;;  %v706_v5 = vld [vmem:[%s978_s20 + $0x48] sm:$0xf0] }
  0x20   : > { %496 = vmatpush.bf16.msra.mxu0 %v705_v41  ;;  %v816_v0 = vld [vmem:[%s978_s20 + $0x120] sm:$0xf]  ;;  %v903_v1 = vld [vmem:[%s978_s20 + $0x124] sm:$0xf0]  ;;  %862 = vmatmul.msk.bf16.vlgmr.msra.gmra.mxu3 %vm483_vm1, %v1019_v54  ;;  %v753_v6 = vor.u32 %v887_v63, %v752_v62  ;;  %v680_v8 = vld [vmem:[%s978_s20 + $0x10] sm:$0xf]  ;;  %v709_v14 = vor.u32 %v874_v4, %v706_v5 }
  0x21   : > { %545 = vmatpush.bf16.msrb.mxu3 %v733_v40  ;;  %509 = vmatpush.bf16.msra.mxu1 %v769_v45  ;;  %v817_v7 = vor.u32 %v903_v1, %v816_v0  ;;  %v869_v9 = vld [vmem:[%s978_s20 + $0x14] sm:$0xf0]  ;;  %v744_v10 = vld [vmem:[%s978_s20 + $0x90] sm:$0xf]  ;;  %v672_v15 = vld [vmem:[%s978_s20] sm:$0xf] }
  0x22   : > { %522 = vmatpush.bf16.msra.mxu2 %v833_v47  ;;  %v885_v11 = vld [vmem:[%s978_s20 + $0x94] sm:$0xf0]  ;;  %v808_v12 = vld [vmem:[%s978_s20 + $0x110] sm:$0xf]  ;;  %v681_v16 = vor.u32 %v869_v9, %v680_v8  ;;  %v872_v17 = vld [vmem:[%s978_s20 + $0x34] sm:$0xf] }
  0x23   : > { %v901_v13 = vld [vmem:[%s978_s20 + $0x114] sm:$0xf0]  ;;  %v698_v18 = vld [vmem:[%s978_s20 + $0x38] sm:$0xf0]  ;;  %v745_v19 = vor.u32 %v885_v11, %v744_v10  ;;  %v867_v21 = vld [vmem:[%s978_s20 + $0x4] sm:$0xf0] }
  0x24   : > { %497 = vmatpush.bf16.msra.mxu0 %v697_v55  ;;  %v809_v20 = vor.u32 %v901_v13, %v808_v12  ;;  %v736_v22 = vld [vmem:[%s978_s20 + $0x80] sm:$0xf]  ;;  %v883_v23 = vld [vmem:[%s978_s20 + $0x84] sm:$0xf0]  ;;  %v896_v25 = vld [vmem:[%s978_s20 + $0xf4] sm:$0xf]  ;;  %v701_v30 = vor.u32 %v872_v17, %v698_v18  ;;  %v673_v34 = vor.u32 %v867_v21, %v672_v15 }
  0x25   : > { %546 = vmatpush.bf16.msrb.mxu3 %v725_v53  ;;  %510 = vmatpush.bf16.msra.mxu1 %v761_v58  ;;  %v794_v26 = vld [vmem:[%s978_s20 + $0xf8] sm:$0xf0]  ;;  %v912_v27 = vld [vmem:[%s978_s20 + $0x174] sm:$0xf]  ;;  %v800_v32 = vld [vmem:[%s978_s20 + $0x100] sm:$0xf]  ;;  %v737_v28 = vor.u32 %v883_v23, %v736_v22 }
  0x26   : > { %523 = vmatpush.bf16.msra.mxu2 %v825_v59  ;;  %v858_v31 = vld [vmem:[%s978_s20 + $0x178] sm:$0xf0]  ;;  %v899_v33 = vld [vmem:[%s978_s20 + $0x104] sm:$0xf0]  ;;  %v870_v35 = vld [vmem:[%s978_s20 + $0x24] sm:$0xf]  ;;  %v797_v37 = vor.u32 %v896_v25, %v794_v26 }
  0x27   : > { %v690_v36 = vld [vmem:[%s978_s20 + $0x28] sm:$0xf0]  ;;  %v222_v39 = vld [vmem:[#allocation2] sm:$0x1]  ;;  %v861_v40 = vor.u32 %v912_v27, %v858_v31  ;;  %v801_v41 = vor.u32 %v899_v33, %v800_v32  ;;  %v894_v42 = vld [vmem:[%s978_s20 + $0xe4] sm:$0xf] }
  0x28   : > { %498 = vmatpush.bf16.msra.mxu0 %v689_v3  ;;  %v786_v43 = vld [vmem:[%s978_s20 + $0xe8] sm:$0xf0]  ;;  %225 = vperm.xlu0 %924, %v222_v39   ;;  %v693_v44 = vor.u32 %v870_v35, %v690_v36  ;;  %v910_v45 = vld [vmem:[%s978_s20 + $0x164] sm:$0xf]  ;;  %v868_v48 = vld [vmem:[%s978_s20 + $0x14] sm:$0xf] }
  0x29   : > { %547 = vmatpush.bf16.msrb.mxu3 %v717_v2  ;;  %511 = vmatpush.bf16.msra.mxu1 %v753_v6  ;;  %v850_v46 = vld [vmem:[%s978_s20 + $0x168] sm:$0xf0]  ;;  %v231_v47 = vld [vmem:[#allocation1] sm:$0xff]  ;;  %v682_v49 = vld [vmem:[%s978_s20 + $0x18] sm:$0xf0]  ;;  %v789_v50 = vor.u32 %v894_v42, %v786_v43 }
  0x2a   : > { %524 = vmatpush.bf16.msra.mxu2 %v817_v7  ;;  %v1060_v51 = vld [vmem:[#allocation1 + $0x9] sm:$0xff]  ;;  %v853_v53 = vor.u32 %v910_v45, %v850_v46  ;;  %v1063_v55 = vld [vmem:[#allocation1 + $0x12] sm:$0xff]  ;;  %v778_v57 = vld [vmem:[%s978_s20 + $0xd8] sm:$0xf0]  ;;  %v685_v58 = vor.u32 %v868_v48, %v682_v49 }
  0x2b   : > { %v892_v56 = vld [vmem:[%s978_s20 + $0xd4] sm:$0xf]  ;;  %v842_v60 = vld [vmem:[%s978_s20 + $0x158] sm:$0xf0]  ;;  %v866_v61 = vld [vmem:[%s978_s20 + $0x4] sm:$0xf] }
  0x2c   : > { %499 = vmatpush.bf16.msra.mxu0 %v681_v16  ;;  %v908_v59 = vld [vmem:[%s978_s20 + $0x154] sm:$0xf]  ;;  %v674_v62 = vld [vmem:[%s978_s20 + $0x8] sm:$0xf0]  ;;  %v781_v63 = vor.u32 %v892_v56, %v778_v57  ;;  %v890_v1 = vld [vmem:[%s978_s20 + $0xc4] sm:$0xf] }
  0x2d   : > { %548 = vmatpush.bf16.msrb.mxu3 %v709_v14  ;;  %512 = vmatpush.bf16.msra.mxu1 %v745_v19  ;;  %v845_v0 = vor.u32 %v908_v59, %v842_v60  ;;  %v770_v2 = vld [vmem:[%s978_s20 + $0xc8] sm:$0xf0]  ;;  %v677_v3 = vor.u32 %v866_v61, %v674_v62  ;;  %v906_v4 = vld [vmem:[%s978_s20 + $0x144] sm:$0xf]  ;;  %v888_v8 = vld [vmem:[%s978_s20 + $0xb4] sm:$0xf] }
  0x2e   : > { %525 = vmatpush.bf16.msra.mxu2 %v809_v20  ;;  %v834_v5 = vld [vmem:[%s978_s20 + $0x148] sm:$0xf0]  ;;  %v773_v6 = vor.u32 %v890_v1, %v770_v2  ;;  %v762_v9 = vld [vmem:[%s978_s20 + $0xb8] sm:$0xf0]  ;;  %v904_v10 = vld [vmem:[%s978_s20 + $0x134] sm:$0xf] }
  0x2f   : > { %v837_v7 = vor.u32 %v906_v4, %v834_v5  ;;  %v826_v11 = vld [vmem:[%s978_s20 + $0x138] sm:$0xf0]  ;;  %v765_v12 = vor.u32 %v888_v8, %v762_v9  ;;  %v886_v14 = vld [vmem:[%s978_s20 + $0xa4] sm:$0xf]  ;;  %v754_v15 = vld [vmem:[%s978_s20 + $0xa8] sm:$0xf0] }
  0x30   : > { %500 = vmatpush.bf16.msra.mxu0 %v673_v34  ;;  %v829_v13 = vor.u32 %v904_v10, %v826_v11  ;;  %v902_v16 = vld [vmem:[%s978_s20 + $0x124] sm:$0xf]  ;;  %v818_v17 = vld [vmem:[%s978_s20 + $0x128] sm:$0xf0]  ;;  %v757_v18 = vor.u32 %v886_v14, %v754_v15  ;;  %v884_v20 = vld [vmem:[%s978_s20 + $0x94] sm:$0xf] }
  0x31   : > { %549 = vmatpush.bf16.msrb.mxu3 %v701_v30  ;;  %513 = vmatpush.bf16.msra.mxu1 %v737_v28  ;;  %v821_v19 = vor.u32 %v902_v16, %v818_v17  ;;  %v746_v21 = vld [vmem:[%s978_s20 + $0x98] sm:$0xf0]  ;;  %v900_v22 = vld [vmem:[%s978_s20 + $0x114] sm:$0xf]  ;;  %v882_v26 = vld [vmem:[%s978_s20 + $0x84] sm:$0xf] }
  0x32   : > { %526 = vmatpush.bf16.msra.mxu2 %v801_v41  ;;  %v810_v23 = vld [vmem:[%s978_s20 + $0x118] sm:$0xf0]  ;;  %v749_v24 = vor.u32 %v884_v20, %v746_v21  ;;  %v738_v27 = vld [vmem:[%s978_s20 + $0x88] sm:$0xf0]  ;;  %v898_v29 = vld [vmem:[%s978_s20 + $0x104] sm:$0xf] }
  0x33   : > { %501 = vmatmul.bf16.vlgmr.msra.gmra.mxu0 %v231_v47  ;;  %v813_v25 = vor.u32 %v900_v22, %v810_v23  ;;  %v802_v30 = vld [vmem:[%s978_s20 + $0x108] sm:$0xf0]  ;;  %v741_v31 = vor.u32 %v882_v26, %v738_v27 }
  0x34   : > { %558 = vmatpush.bf16.msrb.mxu0 %v797_v37  ;;  %514 = vmatmul.bf16.vlgmr.msra.gmra.mxu1 %v1060_v51  ;;  %v805_v32 = vor.u32 %v898_v29, %v802_v30 }
  0x35   : > { %571 = vmatpush.bf16.msrb.mxu1 %v861_v40  ;;  %550 = vmatpush.bf16.msrb.mxu3 %v693_v44 }
  0x36   : > { %591 = vmatpush.bf16.msrb.mxu2 %v491_v52 }
  0x37   : > { %527 = vmatmul.bf16.vlgmr.msra.gmra.mxu2 %v1063_v55 }
  0x38   : > { %559 = vmatpush.bf16.msrb.mxu0 %v789_v50 }
  0x39   : > { %572 = vmatpush.bf16.msrb.mxu1 %v853_v53  ;;  %551 = vmatpush.bf16.msrb.mxu3 %v685_v58  ;;  %v605_v58 = vlaneseq }
  0x3b   : > { %vm607_vm3 = vcmp.lt.s32.totalorder %v605_v58, 256 }
  0x3c   : > { %560 = vmatpush.bf16.msrb.mxu0 %v781_v63 }
  0x3d   : > { %573 = vmatpush.bf16.msrb.mxu1 %v845_v0  ;;  %552 = vmatpush.bf16.msrb.mxu3 %v677_v3 }
  0x40   : > { %561 = vmatpush.bf16.msrb.mxu0 %v773_v6  ;;  %553 = vmatmul.bf16.vlgmr.msrb.gmra.mxu3 %v231_v47 }
  0x41   : > { %574 = vmatpush.bf16.msrb.mxu1 %v837_v7 }
  0x44   : > { %562 = vmatpush.bf16.msrb.mxu0 %v765_v12 }
  0x45   : > { %575 = vmatpush.bf16.msrb.mxu1 %v829_v13 }
  0x47   : > { %863 = vmatmul.msk.bf16.vlgmr.msrb.gmra.mxu2 %vm483_vm1, %v1019_v54 }
  0x48   : > { %563 = vmatpush.bf16.msrb.mxu0 %v757_v18 }
  0x49   : > { %576 = vmatpush.bf16.msrb.mxu1 %v821_v19 }
  0x4c   : > { %564 = vmatpush.bf16.msrb.mxu0 %v749_v24 }
  0x4d   : > { %577 = vmatpush.bf16.msrb.mxu1 %v813_v25 }
  0x50   : > { %565 = vmatpush.bf16.msrb.mxu0 %v741_v31 }
  0x51   : > { %578 = vmatpush.bf16.msrb.mxu1 %v805_v32 }
  0x53   : > { %566 = vmatmul.bf16.vlgmr.msrb.gmra.mxu0 %v1060_v51 }
  0x54   : > { %579 = vmatmul.bf16.vlgmr.msrb.gmra.mxu1 %v1063_v55 }
  0x9a   : > { %v226_v38 = vpop.permute.xlu0 %225 }
  0x9b   : > { %v228_v41 = vperm.slane %v226_v38, 0 }
  0xa3   : > { %v541_v33 = vpop.f32.mrf.mxu3 }
  0xab   : > { %v543_v34 = vpop.f32.mrf.mxu3 }
  0xb0   : > { %v502_v54 = vpop.f32.mrf.mxu0 }
  0xb1   : > { %v515_v35 = vpop.f32.mrf.mxu1  ;;  %v503_v42 = vadd.f32 %v502_v54, %v228_v41 }
  0xb3   : > { %v516_v45 = vadd.f32 %v515_v35, %v503_v42 }
  0xb8   : > { %v504_v28 = vpop.f32.mrf.mxu0 }
  0xb9   : > { %v517_v37 = vpop.f32.mrf.mxu1 }
  0xba   : > { %v528_v36 = vpop.f32.mrf.mxu2 }
  0xbb   : > { %v529_v48 = vadd.f32 %v528_v36, %v516_v45 }
  0xbd   : > { %v542_v53 = vadd.f32 %v541_v33, %v529_v48 }
  0xc2   : > { %v530_v39 = vpop.f32.mrf.mxu2 }
  0xc3   : > { %v554_v40 = vpop.f32.mrf.mxu3 }
  0xc4   : > { %v555_v46 = vadd.f32 %v554_v40, %v228_v41 }
  0xca   : > { %v593_v43 = vpop.f32.mrf.mxu2 }
  0xcb   : > { %v556_v44 = vpop.f32.mrf.mxu3 }
  0xd0   : > { %v567_v47 = vpop.f32.mrf.mxu0 }
  0xd1   : > { %v568_v49 = vadd.f32 %v567_v47, %v555_v46  ;;  %v580_v50 = vpop.f32.mrf.mxu1 }
  0xd2   : > { %v595_v52 = vpop.f32.mrf.mxu2 }
  0xd3   : > { %v581_v51 = vadd.f32 %v580_v50, %v568_v49 }
  0xd5   : > { %v594_v55 = vadd.f32 %v593_v43, %v581_v51 }
  0xd7   : > { %925 = vtanh.f32 %v594_v55 }
  0xd8   : > { %v569_v56 = vpop.f32.mrf.mxu0  ;;  %927 = vtanh.f32 %v542_v53 }
  0xd9   : > { %v582_v57 = vpop.f32.mrf.mxu1 }
  0xdd   : > { %v926_v59 = vpop.eup %925 }
  0xde   : > { %v601_v60 = vrot.slane %v926_v59, 7  ;;  %v928_v61 = vpop.eup %927 }
  0xe0   : > { %v603_v62 = vsel %vm602_vm2, %v928_v61, %v601_v60 }
  0xe1   : > { %609 = vst.msk [vmem:[%s170_s24] sm:$0x3] %vm607_vm3, %v603_v62 }
  0xe2 PF: > { %s15_s14 = sadd.s32 1, %s935_s14  }
  0xe3   : > { %p12_p4 = scmp.ge.s32.totalorder %s15_s14, 4  }
  0xe5   :  { %14 = sbr.rel (!%p12_p4) target bundleno = 3 (0x3), region = 62 }

</bundles_post_ra>
